<compile_context>
chip_gen: v6e
topology: v6e:2x2x1
jax: 0.10.0
libtpu: 0.0.40
codegen_flags: <defaults>
</compile_context>

<pallas_src>
import numpy as np
import jax
import jax.numpy as jnp
from jax.experimental import pallas as pl
from jax.experimental.pallas import tpu as pltpu

# ----- model constants (from the PyTorch spec) -----
MODEL_BATCH = 3                 # graphs per Model.forward (reshape(3, -1))
NODES_PER_GRAPH = 22
IN_FEATS = 9
HIDDEN = 200
HIDDEN_PAD = 256                # lane-pad 200 -> 256 (clean MXU/VPU tiles)

# ----- mega-batch configuration -----
BATCHES_PER_STEP = 4                                  # model forwards per grid step
GRAPHS_PER_STEP = BATCHES_PER_STEP * MODEL_BATCH      # 12 graphs
NODES_PER_STEP = GRAPHS_PER_STEP * NODES_PER_GRAPH    # 264 nodes (>= 256 MXU rows)
NUM_STEPS = 2                                         # grid length -> 8 forwards total


# ---------------- fused forward kernel (one grid step = 4 forwards) ----------------

def _fused_gcn_kernel(adj_ref, feat_ref,
                      lw_ref, lb_ref,
                      w1_ref, b1_ref, w2_ref, b2_ref, w3_ref, b3_ref,
                      rw_ref, sel_ref, rb_ref,
                      o_ref):
    """lift -> 3x GCN -> readout for GRAPHS_PER_STEP graphs, all VMEM-resident.

    lift   : h = relu(feat @ Wl + bl)
    gcn x3 : h = relu(A @ (h @ W) + b)          (== relu((A @ h) @ W + b))
    readout: out[g] = sum_n sel[g,n] * sum_d (h[n,d] * Wr_tiled[n,d]) + br
    """
    adj = adj_ref[0]                                        # (NPS, NPS) bf16

    # Lifting layer: relu(features @ Wl + bl); f32 epilogue (v5e-safe).
    h = jnp.dot(feat_ref[...].astype(jnp.bfloat16), lw_ref[...],
                preferred_element_type=jnp.float32)
    h = jnp.maximum(h + lb_ref[...], 0.0)                   # (NPS, HIDDEN_PAD) f32

    def gcn(h, w_ref, b_ref):
        # Well-shaped 256x256 matmul first, then the adjacency contraction.
        hw = jnp.dot(h.astype(jnp.bfloat16), w_ref[...],
                     preferred_element_type=jnp.float32)
        agg = jnp.dot(adj, hw.astype(jnp.bfloat16),
                      preferred_element_type=jnp.float32)   # copy_src + sum
        return jnp.maximum(agg + b_ref[...], 0.0)           # f32 epilogue

    h = gcn(h, w1_ref, b1_ref)
    h = gcn(h, w2_ref, b2_ref)
    h = gcn(h, w3_ref, b3_ref)

    # Readout (lane-dense): elementwise multiply with the tiled readout weight,
    # sum nodes per graph via the 0/1 selection matmul (N = HIDDEN_PAD, no
    # lane-width-1 operand), then a cheap lane reduce over HIDDEN_PAD.
    per_graph = jnp.dot(sel_ref[...], h * rw_ref[...],
                        preferred_element_type=jnp.float32)  # (GRAPHS, HIDDEN_PAD)
    out = jnp.sum(per_graph, axis=1, keepdims=True) + rb_ref[0, 0]
    o_ref[0] = out                                           # (GRAPHS, 1)
    # TODO(synk): nn.Dropout(p=0.2) treated as identity (inference mode).


def model_forward(adj_bf16, features, kp):
    num_steps = adj_bf16.shape[0]
    nps = NODES_PER_STEP

    def const(shape):  # weight blocks: constant index -> fetched once, VMEM-resident
        return pl.BlockSpec(shape, lambda b: (0, 0))

    in_specs = [
        pl.BlockSpec((1, nps, nps), lambda b: (b, 0, 0)),          # adjacency (streamed)
        pl.BlockSpec((nps, IN_FEATS), lambda b: (b, 0)),           # features  (streamed)
        const((IN_FEATS, HIDDEN_PAD)), const((1, HIDDEN_PAD)),     # lifting layer
        const((HIDDEN_PAD, HIDDEN_PAD)), const((1, HIDDEN_PAD)),   # gcn1
        const((HIDDEN_PAD, HIDDEN_PAD)), const((1, HIDDEN_PAD)),   # gcn2
        const((HIDDEN_PAD, HIDDEN_PAD)), const((1, HIDDEN_PAD)),   # gcn3
        const((nps, HIDDEN_PAD)),                                  # tiled readout weight
        const((GRAPHS_PER_STEP, nps)),                             # graph selection 0/1
        pl.BlockSpec(memory_space=pltpu.MemorySpace.SMEM),         # readout bias scalar
    ]

    out = pl.pallas_call(
        _fused_gcn_kernel,
        out_shape=jax.ShapeDtypeStruct((num_steps, GRAPHS_PER_STEP, 1), jnp.float32),
        grid=(num_steps,),
        in_specs=in_specs,
        out_specs=pl.BlockSpec((1, GRAPHS_PER_STEP, 1), lambda b: (b, 0, 0)),
        compiler_params=pltpu.CompilerParams(
            dimension_semantics=("parallel",)),   # v7x: shard steps over both TCs
    )(adj_bf16, features,
      kp["lift_w"], kp["lift_b"],
      kp["gcn1_w"], kp["gcn1_b"],
      kp["gcn2_w"], kp["gcn2_b"],
      kp["gcn3_w"], kp["gcn3_b"],
      kp["read_w_tiled"], kp["sel"], kp["read_b"])

    # (NUM_STEPS, GRAPHS_PER_STEP, 1) -> (num model forwards, MODEL_BATCH, 1)
    return out.reshape(num_steps * BATCHES_PER_STEP, MODEL_BATCH, 1)


# ---------------- deterministic parameter init & kernel-layout prep ----------------

def init_params(key):
    # Torch-equivalent layout: weights stored as (in, out) so x @ W matches
    # torch.nn.Linear; readout weight is (4400, 1).
    def lin(k, fan_in, fan_out):
        kw, kb = jax.random.split(k)
        lim = 1.0 / np.sqrt(fan_in)
        w = jax.random.uniform(kw, (fan_in, fan_out), jnp.float32, -lim, lim)
        b = jax.random.uniform(kb, (1, fan_out), jnp.float32, -lim, lim)
        return w, b

    keys = jax.random.split(key, 5)
    p = {}
    p["lift_w"], p["lift_b"] = lin(keys[0], IN_FEATS, HIDDEN)
    p["gcn1_w"], p["gcn1_b"] = lin(keys[1], HIDDEN, HIDDEN)
    p["gcn2_w"], p["gcn2_b"] = lin(keys[2], HIDDEN, HIDDEN)
    p["gcn3_w"], p["gcn3_b"] = lin(keys[3], HIDDEN, HIDDEN)
    p["read_w"], p["read_b"] = lin(keys[4], NODES_PER_GRAPH * HIDDEN, 1)
    return p


def prepare_kernel_params(p):
    # Kernel-ready layouts: zero-pad HIDDEN 200->256 (padded lanes stay exactly
    # zero through every relu), bf16 MXU weights, f32 biases, lane-dense readout.
    pad = HIDDEN_PAD - HIDDEN
    pad_cols = lambda a: jnp.pad(a, ((0, 0), (0, pad)))
    pad_both = lambda a: jnp.pad(a, ((0, pad), (0, pad)))

    kp = {}
    kp["lift_w"] = pad_cols(p["lift_w"]).astype(jnp.bfloat16)        # (9, 256)
    kp["lift_b"] = pad_cols(p["lift_b"])                             # (1, 256) f32
    for name in ("gcn1", "gcn2", "gcn3"):
        kp[f"{name}_w"] = pad_both(p[f"{name}_w"]).astype(jnp.bfloat16)  # (256, 256)
        kp[f"{name}_b"] = pad_cols(p[f"{name}_b"])                       # (1, 256) f32

    # (4400, 1) readout weight -> (22, 200) per-node rows, zero-pad lanes to
    # 256, tile over all graphs in a step -> (264, 256): readout becomes a
    # pure VPU multiply + lane-dense selection matmul.
    rw = pad_cols(p["read_w"].reshape(NODES_PER_GRAPH, HIDDEN))
    kp["read_w_tiled"] = jnp.tile(rw, (GRAPHS_PER_STEP, 1))          # (264, 256) f32
    kp["read_b"] = p["read_b"]                                       # (1, 1) f32 -> SMEM

    sel = np.zeros((GRAPHS_PER_STEP, NODES_PER_STEP), dtype=np.float32)
    for g in range(GRAPHS_PER_STEP):
        sel[g, g * NODES_PER_GRAPH:(g + 1) * NODES_PER_GRAPH] = 1.0
    kp["sel"] = jnp.asarray(sel)                                     # (12, 264) f32
    return kp


def build_adjacency():
    # Deterministic batched graphs: each grid step holds 12 disjoint 22-node
    # cycles with self-loops.  A[dst, src] = 1 (DGL copy_src + sum).  Values
    # are 0/1 -> exact in bf16.
    A = np.zeros((NUM_STEPS, NODES_PER_STEP, NODES_PER_STEP), dtype=np.float32)
    for s in range(NUM_STEPS):
        for g in range(GRAPHS_PER_STEP):
            base = g * NODES_PER_GRAPH
            for i in range(NODES_PER_GRAPH):
                src = base + i
                dst = base + (i + 1) % NODES_PER_GRAPH
                A[s, dst, src] = 1.0
                A[s, src, src] = 1.0  # self-loop
    return jnp.asarray(A, dtype=jnp.bfloat16)


if __name__ == "__main__":
    key = jax.random.PRNGKey(0)
    kp_key, kf_key = jax.random.split(key)

    params = init_params(kp_key)
    kernel_params = prepare_kernel_params(params)
    # Node features for all graphs of all grid steps (g.ndata['features']).
    features = jax.random.normal(
        kf_key, (NUM_STEPS * NODES_PER_STEP, IN_FEATS), jnp.float32)
    adj = build_adjacency()

    out = model_forward(adj, features, kernel_params)
    out = jax.block_until_ready(out)
    assert out.shape == (NUM_STEPS * BATCHES_PER_STEP, MODEL_BATCH, 1), out.shape
    print("KERNEL_OK")
</pallas_src>

<mosaic_0001>
module attributes {stable_mosaic.version = 11 : i64} {
  func.func @_fused_gcn_kernel(%arg0: i32, %arg1: memref<1x264x264xbf16, #tpu.memory_space<vmem>>, %arg2: memref<264x9xf32, #tpu.memory_space<vmem>>, %arg3: memref<9x256xbf16, #tpu.memory_space<vmem>>, %arg4: memref<1x256xf32, #tpu.memory_space<vmem>>, %arg5: memref<256x256xbf16, #tpu.memory_space<vmem>>, %arg6: memref<1x256xf32, #tpu.memory_space<vmem>>, %arg7: memref<256x256xbf16, #tpu.memory_space<vmem>>, %arg8: memref<1x256xf32, #tpu.memory_space<vmem>>, %arg9: memref<256x256xbf16, #tpu.memory_space<vmem>>, %arg10: memref<1x256xf32, #tpu.memory_space<vmem>>, %arg11: memref<264x256xf32, #tpu.memory_space<vmem>>, %arg12: memref<12x264xf32, #tpu.memory_space<vmem>>, %arg13: memref<1x1xf32, #tpu.memory_space<smem>>, %arg14: memref<1x12x1xf32, #tpu.memory_space<vmem>>) attributes {dimension_semantics = [#tpu.dimension_semantics<parallel>], iteration_bounds = array<i64: 2>, scalar_prefetch = 0 : i64, scratch_operands = 0 : i64, tpu.core_type = #tpu.core_type<tc>, window_params = [{transform_indices = @transform_0, window_bounds = array<i64: 1, 264, 264>}, {transform_indices = @transform_1, window_bounds = array<i64: 264, 9>}, {pipeline_mode = #tpu.pipeline_mode<synchronous>, transform_indices = @transform_2, window_bounds = array<i64: 9, 256>}, {pipeline_mode = #tpu.pipeline_mode<synchronous>, transform_indices = @transform_3, window_bounds = array<i64: 1, 256>}, {pipeline_mode = #tpu.pipeline_mode<synchronous>, transform_indices = @transform_4, window_bounds = array<i64: 256, 256>}, {pipeline_mode = #tpu.pipeline_mode<synchronous>, transform_indices = @transform_5, window_bounds = array<i64: 1, 256>}, {pipeline_mode = #tpu.pipeline_mode<synchronous>, transform_indices = @transform_6, window_bounds = array<i64: 256, 256>}, {pipeline_mode = #tpu.pipeline_mode<synchronous>, transform_indices = @transform_7, window_bounds = array<i64: 1, 256>}, {pipeline_mode = #tpu.pipeline_mode<synchronous>, transform_indices = @transform_8, window_bounds = array<i64: 256, 256>}, {pipeline_mode = #tpu.pipeline_mode<synchronous>, transform_indices = @transform_9, window_bounds = array<i64: 1, 256>}, {pipeline_mode = #tpu.pipeline_mode<synchronous>, transform_indices = @transform_10, window_bounds = array<i64: 264, 256>}, {pipeline_mode = #tpu.pipeline_mode<synchronous>, transform_indices = @transform_11, window_bounds = array<i64: 12, 264>}, {transform_indices = @transform_12, window_bounds = array<i64: 1, 1>}, {transform_indices = @transform_13, window_bounds = array<i64: 1, 12, 1>}]} {
    %c0 = arith.constant 0 : index
    %c0_0 = arith.constant 0 : index
    %c0_1 = arith.constant 0 : index
    %0 = vector.load %arg1[%c0, %c0_0, %c0_1] : memref<1x264x264xbf16, #tpu.memory_space<vmem>>, vector<1x264x264xbf16>
    %1 = vector.shape_cast %0 : vector<1x264x264xbf16> to vector<264x264xbf16>
    %c0_2 = arith.constant 0 : index
    %c0_3 = arith.constant 0 : index
    %2 = vector.load %arg2[%c0_2, %c0_3] : memref<264x9xf32, #tpu.memory_space<vmem>>, vector<264x9xf32>
    %3 = arith.truncf %2 : vector<264x9xf32> to vector<264x9xbf16>
    %c0_4 = arith.constant 0 : index
    %c0_5 = arith.constant 0 : index
    %4 = vector.load %arg3[%c0_4, %c0_5] : memref<9x256xbf16, #tpu.memory_space<vmem>>, vector<9x256xbf16>
    %cst = arith.constant dense<0.000000e+00> : vector<264x256xf32>
    %5 = tpu.matmul %3, %4, %cst {dimension_numbers = #tpu.dot_dimension_numbers<[1], [0], [0], [1], [0, 0, 1, 1], [], []>} : vector<264x9xbf16>, vector<9x256xbf16>, vector<264x256xf32> -> vector<264x256xf32>
    %c0_6 = arith.constant 0 : index
    %c0_7 = arith.constant 0 : index
    %6 = vector.load %arg4[%c0_6, %c0_7] : memref<1x256xf32, #tpu.memory_space<vmem>>, vector<1x256xf32>
    %7 = vector.broadcast %6 : vector<1x256xf32> to vector<264x256xf32>
    %8 = arith.addf %5, %7 : vector<264x256xf32>
    %cst_8 = arith.constant 0.000000e+00 : f32
    %9 = vector.broadcast %cst_8 : f32 to vector<264x256xf32>
    %10 = arith.maximumf %8, %9 : vector<264x256xf32>
    %11 = arith.truncf %10 : vector<264x256xf32> to vector<264x256xbf16>
    %c0_9 = arith.constant 0 : index
    %c0_10 = arith.constant 0 : index
    %12 = vector.load %arg5[%c0_9, %c0_10] : memref<256x256xbf16, #tpu.memory_space<vmem>>, vector<256x256xbf16>
    %cst_11 = arith.constant dense<0.000000e+00> : vector<264x256xf32>
    %13 = tpu.matmul %11, %12, %cst_11 {dimension_numbers = #tpu.dot_dimension_numbers<[1], [0], [0], [1], [0, 0, 1, 1], [], []>} : vector<264x256xbf16>, vector<256x256xbf16>, vector<264x256xf32> -> vector<264x256xf32>
    %14 = arith.truncf %13 : vector<264x256xf32> to vector<264x256xbf16>
    %cst_12 = arith.constant dense<0.000000e+00> : vector<264x256xf32>
    %15 = tpu.matmul %1, %14, %cst_12 {dimension_numbers = #tpu.dot_dimension_numbers<[1], [0], [0], [1], [0, 0, 1, 1], [], []>} : vector<264x264xbf16>, vector<264x256xbf16>, vector<264x256xf32> -> vector<264x256xf32>
    %c0_13 = arith.constant 0 : index
    %c0_14 = arith.constant 0 : index
    %16 = vector.load %arg6[%c0_13, %c0_14] : memref<1x256xf32, #tpu.memory_space<vmem>>, vector<1x256xf32>
    %17 = vector.broadcast %16 : vector<1x256xf32> to vector<264x256xf32>
    %18 = arith.addf %15, %17 : vector<264x256xf32>
    %cst_15 = arith.constant 0.000000e+00 : f32
    %19 = vector.broadcast %cst_15 : f32 to vector<264x256xf32>
    %20 = arith.maximumf %18, %19 : vector<264x256xf32>
    %21 = arith.truncf %20 : vector<264x256xf32> to vector<264x256xbf16>
    %c0_16 = arith.constant 0 : index
    %c0_17 = arith.constant 0 : index
    %22 = vector.load %arg7[%c0_16, %c0_17] : memref<256x256xbf16, #tpu.memory_space<vmem>>, vector<256x256xbf16>
    %cst_18 = arith.constant dense<0.000000e+00> : vector<264x256xf32>
    %23 = tpu.matmul %21, %22, %cst_18 {dimension_numbers = #tpu.dot_dimension_numbers<[1], [0], [0], [1], [0, 0, 1, 1], [], []>} : vector<264x256xbf16>, vector<256x256xbf16>, vector<264x256xf32> -> vector<264x256xf32>
    %24 = arith.truncf %23 : vector<264x256xf32> to vector<264x256xbf16>
    %cst_19 = arith.constant dense<0.000000e+00> : vector<264x256xf32>
    %25 = tpu.matmul %1, %24, %cst_19 {dimension_numbers = #tpu.dot_dimension_numbers<[1], [0], [0], [1], [0, 0, 1, 1], [], []>} : vector<264x264xbf16>, vector<264x256xbf16>, vector<264x256xf32> -> vector<264x256xf32>
    %c0_20 = arith.constant 0 : index
    %c0_21 = arith.constant 0 : index
    %26 = vector.load %arg8[%c0_20, %c0_21] : memref<1x256xf32, #tpu.memory_space<vmem>>, vector<1x256xf32>
    %27 = vector.broadcast %26 : vector<1x256xf32> to vector<264x256xf32>
    %28 = arith.addf %25, %27 : vector<264x256xf32>
    %cst_22 = arith.constant 0.000000e+00 : f32
    %29 = vector.broadcast %cst_22 : f32 to vector<264x256xf32>
    %30 = arith.maximumf %28, %29 : vector<264x256xf32>
    %31 = arith.truncf %30 : vector<264x256xf32> to vector<264x256xbf16>
    %c0_23 = arith.constant 0 : index
    %c0_24 = arith.constant 0 : index
    %32 = vector.load %arg9[%c0_23, %c0_24] : memref<256x256xbf16, #tpu.memory_space<vmem>>, vector<256x256xbf16>
    %cst_25 = arith.constant dense<0.000000e+00> : vector<264x256xf32>
    %33 = tpu.matmul %31, %32, %cst_25 {dimension_numbers = #tpu.dot_dimension_numbers<[1], [0], [0], [1], [0, 0, 1, 1], [], []>} : vector<264x256xbf16>, vector<256x256xbf16>, vector<264x256xf32> -> vector<264x256xf32>
    %34 = arith.truncf %33 : vector<264x256xf32> to vector<264x256xbf16>
    %cst_26 = arith.constant dense<0.000000e+00> : vector<264x256xf32>
    %35 = tpu.matmul %1, %34, %cst_26 {dimension_numbers = #tpu.dot_dimension_numbers<[1], [0], [0], [1], [0, 0, 1, 1], [], []>} : vector<264x264xbf16>, vector<264x256xbf16>, vector<264x256xf32> -> vector<264x256xf32>
    %c0_27 = arith.constant 0 : index
    %c0_28 = arith.constant 0 : index
    %36 = vector.load %arg10[%c0_27, %c0_28] : memref<1x256xf32, #tpu.memory_space<vmem>>, vector<1x256xf32>
    %37 = vector.broadcast %36 : vector<1x256xf32> to vector<264x256xf32>
    %38 = arith.addf %35, %37 : vector<264x256xf32>
    %cst_29 = arith.constant 0.000000e+00 : f32
    %39 = vector.broadcast %cst_29 : f32 to vector<264x256xf32>
    %40 = arith.maximumf %38, %39 : vector<264x256xf32>
    %c0_30 = arith.constant 0 : index
    %c0_31 = arith.constant 0 : index
    %41 = vector.load %arg12[%c0_30, %c0_31] : memref<12x264xf32, #tpu.memory_space<vmem>>, vector<12x264xf32>
    %c0_32 = arith.constant 0 : index
    %c0_33 = arith.constant 0 : index
    %42 = vector.load %arg11[%c0_32, %c0_33] : memref<264x256xf32, #tpu.memory_space<vmem>>, vector<264x256xf32>
    %43 = arith.mulf %40, %42 : vector<264x256xf32>
    %cst_34 = arith.constant dense<0.000000e+00> : vector<12x256xf32>
    %44 = tpu.matmul %41, %43, %cst_34 {dimension_numbers = #tpu.dot_dimension_numbers<[1], [0], [0], [1], [0, 0, 1, 1], [], []>} : vector<12x264xf32>, vector<264x256xf32>, vector<12x256xf32> -> vector<12x256xf32>
    %cst_35 = arith.constant dense<0.000000e+00> : vector<12xf32>
    %45 = vector.multi_reduction <add>, %44, %cst_35 [1] : vector<12x256xf32> to vector<12xf32>
    %46 = vector.shape_cast %45 : vector<12xf32> to vector<12x1xf32>
    %c0_36 = arith.constant 0 : index
    %c0_37 = arith.constant 0 : index
    %47 = memref.load %arg13[%c0_36, %c0_37] : memref<1x1xf32, #tpu.memory_space<smem>>
    %48 = vector.broadcast %47 : f32 to vector<12x1xf32>
    %49 = arith.addf %46, %48 : vector<12x1xf32>
    %c0_38 = arith.constant 0 : index
    %c0_39 = arith.constant 0 : index
    %c0_40 = arith.constant 0 : index
    %50 = vector.load %arg14[%c0_38, %c0_39, %c0_40] : memref<1x12x1xf32, #tpu.memory_space<vmem>>, vector<1x12x1xf32>
    %51 = vector.shape_cast %50 : vector<1x12x1xf32> to vector<12x1xf32>
    %52 = vector.shape_cast %49 : vector<12x1xf32> to vector<1x12x1xf32>
    tpu.vector_store %arg14[%c0_38, %c0_39, %c0_40], %52 {strides = array<i32>} : memref<1x12x1xf32, #tpu.memory_space<vmem>>, vector<1x12x1xf32>,
    return
  }
  func.func @transform_0(%arg0: i32) -> (i32, i32, i32) {
    %c0_i32 = arith.constant 0 : i32
    %c0_i32_0 = arith.constant 0 : i32
    %c0_i32_1 = arith.constant 0 : i32
    return %arg0, %c0_i32, %c0_i32_0 : i32, i32, i32
  }
  func.func @transform_1(%arg0: i32) -> (i32, i32) {
    %c0_i32 = arith.constant 0 : i32
    %c0_i32_0 = arith.constant 0 : i32
    return %arg0, %c0_i32 : i32, i32
  }
  func.func @transform_2(%arg0: i32) -> (i32, i32) {
    %c0_i32 = arith.constant 0 : i32
    %c0_i32_0 = arith.constant 0 : i32
    %c0_i32_1 = arith.constant 0 : i32
    return %c0_i32, %c0_i32_0 : i32, i32
  }
  func.func @transform_3(%arg0: i32) -> (i32, i32) {
    %c0_i32 = arith.constant 0 : i32
    %c0_i32_0 = arith.constant 0 : i32
    %c0_i32_1 = arith.constant 0 : i32
    return %c0_i32, %c0_i32_0 : i32, i32
  }
  func.func @transform_4(%arg0: i32) -> (i32, i32) {
    %c0_i32 = arith.constant 0 : i32
    %c0_i32_0 = arith.constant 0 : i32
    %c0_i32_1 = arith.constant 0 : i32
    return %c0_i32, %c0_i32_0 : i32, i32
  }
  func.func @transform_5(%arg0: i32) -> (i32, i32) {
    %c0_i32 = arith.constant 0 : i32
    %c0_i32_0 = arith.constant 0 : i32
    %c0_i32_1 = arith.constant 0 : i32
    return %c0_i32, %c0_i32_0 : i32, i32
  }
  func.func @transform_6(%arg0: i32) -> (i32, i32) {
    %c0_i32 = arith.constant 0 : i32
    %c0_i32_0 = arith.constant 0 : i32
    %c0_i32_1 = arith.constant 0 : i32
    return %c0_i32, %c0_i32_0 : i32, i32
  }
  func.func @transform_7(%arg0: i32) -> (i32, i32) {
    %c0_i32 = arith.constant 0 : i32
    %c0_i32_0 = arith.constant 0 : i32
    %c0_i32_1 = arith.constant 0 : i32
    return %c0_i32, %c0_i32_0 : i32, i32
  }
  func.func @transform_8(%arg0: i32) -> (i32, i32) {
    %c0_i32 = arith.constant 0 : i32
    %c0_i32_0 = arith.constant 0 : i32
    %c0_i32_1 = arith.constant 0 : i32
    return %c0_i32, %c0_i32_0 : i32, i32
  }
  func.func @transform_9(%arg0: i32) -> (i32, i32) {
    %c0_i32 = arith.constant 0 : i32
    %c0_i32_0 = arith.constant 0 : i32
    %c0_i32_1 = arith.constant 0 : i32
    return %c0_i32, %c0_i32_0 : i32, i32
  }
  func.func @transform_10(%arg0: i32) -> (i32, i32) {
    %c0_i32 = arith.constant 0 : i32
    %c0_i32_0 = arith.constant 0 : i32
    %c0_i32_1 = arith.constant 0 : i32
    return %c0_i32, %c0_i32_0 : i32, i32
  }
  func.func @transform_11(%arg0: i32) -> (i32, i32) {
    %c0_i32 = arith.constant 0 : i32
    %c0_i32_0 = arith.constant 0 : i32
    %c0_i32_1 = arith.constant 0 : i32
    return %c0_i32, %c0_i32_0 : i32, i32
  }
  func.func @transform_12(%arg0: i32) -> (i32, i32) {
    %c0_i32 = arith.constant 0 : i32
    %c0_i32_0 = arith.constant 0 : i32
    %c0_i32_1 = arith.constant 0 : i32
    return %c0_i32, %c0_i32_0 : i32, i32
  }
  func.func @transform_13(%arg0: i32) -> (i32, i32, i32) {
    %c0_i32 = arith.constant 0 : i32
    %c0_i32_0 = arith.constant 0 : i32
    %c0_i32_1 = arith.constant 0 : i32
    return %arg0, %c0_i32, %c0_i32_0 : i32, i32, i32
  }
}

</mosaic_0001>

<bundles_post_ra>
// kernel: tpu_custom_call.1
= control target key start
LH: loop header
LB: loop body
LE: loop exit
PB: predicated region body
PF: predicated region fallthrough
CT: control target
= control target key end

     0   :  { %s7315_s0 = inlined_call_operand.hbm [shape: bf16[2,264,264], index: 0, kind: input, shape index: {}]   ;;  %s7316_s1 = inlined_call_operand.vmem [shape: f32[528,9], index: 1, kind: input, shape index: {}]   ;;  %s7317_s2 = inlined_call_operand.vmem [shape: bf16[9,256], index: 2, kind: input, shape index: {}]   ;;  %s7318_s3 = inlined_call_operand.vmem [shape: f32[1,256], index: 3, kind: input, shape index: {}]   ;;  %s7319_s4 = inlined_call_operand.hbm [shape: bf16[256,256], index: 4, kind: input, shape index: {}]   ;;  %s7320_s5 = inlined_call_operand.vmem [shape: f32[1,256], index: 5, kind: input, shape index: {}]   ;;  %s7321_s6 = inlined_call_operand.hbm [shape: bf16[256,256], index: 6, kind: input, shape index: {}]   ;;  %s7322_s7 = inlined_call_operand.vmem [shape: f32[1,256], index: 7, kind: input, shape index: {}]   ;;  %s7323_s8 = inlined_call_operand.hbm [shape: bf16[256,256], index: 8, kind: input, shape index: {}]   ;;  %s7324_s9 = inlined_call_operand.vmem [shape: f32[1,256], index: 9, kind: input, shape index: {}]   ;;  %s7325_s10 = inlined_call_operand.vmem [shape: f32[264,256], index: 10, kind: input, shape index: {}]   ;;  %s7326_s11 = inlined_call_operand.vmem [shape: f32[12,264], index: 11, kind: input, shape index: {}]   ;;  %s7327_s12 = inlined_call_operand.<no memory space> [shape: f32[1,1], index: 12, kind: input, shape index: {}]   ;;  %s7328_s13 = inlined_call_operand.vmem [shape: f32[2,12,1], index: 13, kind: output, shape index: {}]  }
   0x1   :  { %7332 = sst [smem:[#allocation34_spill]] %s7319_s4 }
   0x2   :  { %7333 = sst [smem:[#allocation35_spill]] %s7321_s6 }
   0x3   :  { %18 = sst [smem:[#allocation2]] %s7327_s12 }
   0x4   :  { %19 = vsyncpa [#allocation4], 0 }
   0x5   :  { %21 = vsyncpa [#allocation4 + $0x1], 0 }
   0x6   :  { %22 = vsyncpa [#allocation6], 0 }
   0x7   :  { %23 = vsyncpa [#allocation9], 0  ;;  %s5456_s27 = smov 0   ;;  %s5458_s28 = smov 0  }
   0x8   :  { %s5460_s29 = smov 0   ;;  %s5462_s30 = smov 0  }
   0x9 LB: > { %s5475_s12 = sadd.s32 4294967295, %s5370_s30   ;;  %p49_p0 = scmp.ne.s32.totalorder %s5362_s28, %s5358_s27  ;;  %s5370_s30 = sphi %s5462_s30, %s7393_s30   ;;  %s5366_s29 = sphi %s5460_s29, %s7392_s29   ;;  %s5362_s28 = sphi %s5458_s28, %s7391_s28   ;;  %s5358_s27 = sphi %s5456_s27, %s7390_s27  }
   0xa   : > { %p7329_p1 = scmp.eq.s32.totalorder %s5475_s12, 0  ;;  %p4562_p2 = scmp.ge.s32.totalorder %s5370_s30, 1 }
   0xb   : > { %p343_p3 = scmp.lt.s32.totalorder %s5370_s30, 3  ;;  %s5372_s16 = smov [#allocation5]  }
   0xc   : > { %p5483_p4 = por %p7329_p1, %p49_p0  ;;  %s361_s17 = sshll.u32 %s5372_s16, 4  ;;  %s362_s17 = int_to_ptr.vmem [resolvable:$true] %s361_s17 }
   0xd   : > { %p5487_p5 = pnand %p4562_p2, %p343_p3  ;;  %s5373_s19 = smov [#allocation7]  }
   0xe   : > { %s7334_s14 = scalar_select %p5483_p4, 1, 0 }
   0xf   : > { %s7335_s15 = scalar_select %p5487_p5, 1, 0 }
  0x10   : > { %p4849_p6 = pneg %p5487_p5  ;;  %s377_s20 = sshll.u32 %s5373_s19, 4  ;;  %s378_s20 = int_to_ptr.vmem [resolvable:$true] %s377_s20 }
  0x11   : > { %s5374_s21 = smov [#allocation8]   ;;  %s5233_s23 = scalar_lea.vmem %s362_s17, 4096 }
  0x12   : > { %p5495_p7 = pnand %p4849_p6, %p7329_p1  ;;  %s393_s22 = sshll.u32 %s5374_s21, 4  ;;  %s394_s22 = int_to_ptr.vmem [resolvable:$true] %s393_s22 }
  0x13   : > { %p5234_p9 = scmp.ne.s32.totalorder %s362_s17, %s5233_s23  ;;  %p5241_p12 = scmp.lt.s32.totalorder %s362_s17, %s362_s17 }
  0x14   : > { %p5224_p8 = pneg %p5495_p7  ;;  %p5242_p13 = scmp.lt.s32.totalorder %s5233_s23, %s5233_s23 }
  0x16   : > { %p5236_p10 = pnand %p5234_p9, %p5224_p8  ;;  %p5243_p0 = por %p5242_p13, %p5241_p12 }
  0x18   : > { %p5237_p11 = pneg %p5236_p10 }
  0x1a   : > { %p5244_p2 = pnand %p5243_p0, %p5237_p11 }
  0x1c   : > { %5247 = shalt.err (!%p5244_p2)
}
  0x1d   : > { %s5375_s24 = smov 128   ;;  %s5376_s25 = smov 8  }
  0x1e   : > { %s7337_s4 = sld [smem:[#allocation34_spill]]  ;;  %s5259_s16 = scalar_lea.vmem %s378_s20, 4096 }
  0x1f   : > { %p5260_p3 = scmp.ne.s32.totalorder %s378_s20, %s5259_s16  ;;  %p5267_p10 = scmp.lt.s32.totalorder %s378_s20, %s378_s20 }
  0x20   : > { %p5268_p1 = scmp.lt.s32.totalorder %s5259_s16, %s5259_s16 }
  0x21   : > { %p5262_p6 = pnand %p5260_p3, %p5224_p8 }
  0x22   : > { %p5269_p12 = por %p5268_p1, %p5267_p10 }
  0x23   : > { %p5263_p9 = pneg %p5262_p6 }
  0x24   : > { %4852 = dma.hbm_to_vmem [thread:$0]  (!%p5495_p7), %s7337_s4, 4096, %s362_s17, [#allocation6], %s5375_s24, %s5375_s24, %s5376_s25  }
  0x25   : > { %p5270_p11 = pnand %p5269_p12, %p5263_p9 }
  0x27   : > { %5273 = shalt.err (!%p5270_p11)
}
  0x28   : > { %s7338_s6 = sld [smem:[#allocation35_spill]]  ;;  %s5285_s17 = scalar_lea.vmem %s394_s22, 4096 }
  0x29   : > { %p5286_p13 = scmp.ne.s32.totalorder %s394_s22, %s5285_s17  ;;  %p5293_p3 = scmp.lt.s32.totalorder %s394_s22, %s394_s22 }
  0x2a   : > { %p5294_p6 = scmp.lt.s32.totalorder %s5285_s17, %s5285_s17 }
  0x2b   : > { %p5288_p0 = pnand %p5286_p13, %p5224_p8 }
  0x2c   : > { %p5295_p4 = por %p5294_p6, %p5293_p3 }
  0x2d   : > { %p5289_p2 = pneg %p5288_p0 }
  0x2e   : > { %4855 = dma.hbm_to_vmem [thread:$0]  (!%p5495_p7), %s7338_s6, 4096, %s378_s20, [#allocation6], %s5375_s24, %s5375_s24, %s5376_s25  }
  0x2f   : > { %p5296_p1 = pnand %p5295_p4, %p5289_p2 }
  0x31   : > { %5299 = shalt.err (!%p5296_p1)
}
  0x32   : > { %4858 = dma.hbm_to_vmem [thread:$0]  (!%p5495_p7), %s7323_s8, 4096, %s394_s22, [#allocation9], %s5375_s24, %s5375_s24, %s5376_s25  }
  0x33   : > { %s5526_s20 = sadd.s32 1, %s5370_s30   ;;  %s36_s16 = sadd.s32 1, %s5366_s29 }
  0x34   : > { %s33_s27 = ssub.s32 %s5370_s30, %s5526_s20  ;;  %p43_p8 = scmp.ne.s32.totalorder %s5366_s29, %s5362_s28 }
  0x35   : > { %p34_p4 = scmp.eq.s32.totalorder %s33_s27, 0  ;;  %p44_p9 = scmp.eq.s32.totalorder %s5370_s30, 0 }
  0x36   : > { %p4866_p10 = scmp.lt.s32.totalorder %s5370_s30, 2  ;;  %s419_s19 = sand.u32 1, %s5366_s29  }
  0x37   : > { %s5536_s18 = scalar_select %p34_p4, %s5366_s29, %s36_s16  }
  0x38   : > { %p45_p12 = por %p44_p9, %p43_p8  ;;  %s4832_s21 = smul.u32 396, %s419_s19 }
  0x39   : > { %s4833_s17 = smul.u32 6336, %s5370_s30  ;;  %s5551_s16 = scalar_lea.sflag [#allocation4], %s419_s19 }
  0x3a   : > { %p5540_p11 = pnand %p4866_p10, %p45_p12  ;;  %s423_s26 = scalar_lea.vmem [#allocation3], %s4832_s21 }
  0x3b   : > { %s5547_s25 = scalar_lea.hbm %s7315_s0, %s4833_s17  ;;  %s430_s27 = sshll.u32 %s423_s26, 4  ;;  %s5549_s27 = int_to_ptr.vmem [resolvable:$true] %s430_s27 }
  0x3c   : > { %s5300_s30 = scalar_lea.hbm %s5547_s25, 6336  ;;  %p5302_p13 = pneg %p5540_p11 }
  0x3d   : > { %p5301_p7 = scmp.ne.s32.totalorder %s5547_s25, %s5300_s30  ;;  %s5305_s17 = scalar_lea.hbm %s7315_s0, 12672 }
  0x3e   : > { %p5306_p3 = scmp.lt.s32.totalorder %s5547_s25, %s7315_s0  ;;  %p5307_p6 = scmp.lt.s32.totalorder %s5305_s17, %s5300_s30 }
  0x3f   : > { %p5303_p0 = pnand %p5302_p13, %p5301_p7 }
  0x40   : > { %p5308_p1 = por %p5307_p6, %p5306_p3 }
  0x41   : > { %p5304_p2 = pneg %p5303_p0 }
  0x43   : > { %p5309_p4 = pnand %p5308_p1, %p5304_p2 }
  0x45   : > { %5312 = shalt.err (!%p5309_p4)
}
  0x46   : > { %s5313_s19 = scalar_lea.vmem %s5549_s27, 6336  ;;  %s5377_s21 = smov [#allocation3]  }
  0x47   : > { %p5314_p8 = scmp.ne.s32.totalorder %s5549_s27, %s5313_s19  ;;  %s5318_s26 = sshll.u32 %s5377_s21, 4  ;;  %s5319_s26 = int_to_ptr.vmem [resolvable:$false] %s5318_s26 }
  0x48   : > { %s5320_s4 = scalar_lea.vmem %s5319_s26, 12672  ;;  %p5321_p12 = scmp.lt.s32.totalorder %s5549_s27, %s5319_s26 }
  0x49   : > { %p5316_p9 = pnand %p5314_p8, %p5302_p13  ;;  %p5322_p7 = scmp.lt.s32.totalorder %s5320_s4, %s5313_s19 }
  0x4b   : > { %p5317_p10 = pneg %p5316_p9  ;;  %p5323_p0 = por %p5322_p7, %p5321_p12 }
  0x4d   : > { %p5324_p5 = pnand %p5323_p0, %p5317_p10 }
  0x4f   : > { %5327 = shalt.err (!%p5324_p5)
}
  0x50   : > { %s5378_s6 = smov 192   ;;  %s5379_s30 = smov 12  }
  0x51   : > { %4862 = dma.hbm_to_vmem [thread:$0]  (!%p5540_p11), %s5547_s25, 6336, %s5549_s27, %s5551_s16, %s5378_s6, %s5378_s6, %s5379_s30  }
  0x52   : > { %p7340_p13 = scmp.ne.s32.totalorder %s7335_s15, 0 }
  0x54   : > { %451 = sbr.rel (%p7340_p13) target bundleno = 2517 (0x9d5), region = 72 }
  0x59   : > { %s453_s22 = sand.u32 1, %s5362_s28   ;;  %p7341_p2 = scmp.ne.s32.totalorder %s7334_s14, 0 }
  0x5a   : > { %s4834_s17 = smul.u32 396, %s453_s22  ;;  %s454_s24 = scalar_lea.sflag [#allocation4], %s453_s22 }
  0x5c   : > { %s5575_s19 = scalar_lea.vmem [#allocation3], %s4834_s17 }
  0x5d   : > { %5345 = dma.done.wait (%p7341_p2), %s454_s24, 6336  }
  0x5e   : > { %5347 = vsyncadd (%p7341_p2), %s454_s24, 4294960960  ;;  %p7342_p5 = scmp.eq.s32.totalorder %s5475_s12, 0 }
  0x60   : > { %5349 = dma.done.wait (%p7342_p5), [#allocation6], 8192   ;;  %p7343_p11 = pmov %p7342_p5 }
  0x61   : > { %p7344_p3 = pmov %p7342_p5 }
  0x62   : > { %5351 = vsyncadd (%p7343_p11), [#allocation6], 4294959104 }
  0x63   : > { %5353 = dma.done.wait (%p7344_p3), [#allocation9], 4096   ;;  %p7345_p6 = pmov %p7344_p3 }
  0x64   : > { %vm719_vm0 = vcmask 1043456   ;;  %v5380_v0 = vmov 0   ;;  %s517_s15 = smul.u32 33, %s5475_s12  ;;  %vm720_vm1 = vcmask 1044480   ;;  %v5381_v1 = vmov 65535   ;;  %p523_p4 = scmp.lt.s32.totalorder %s5475_s12, 1 }
  0x65   : > { %5355 = vsyncadd (%p7345_p6), [#allocation9], 4294963200  ;;  %761 = vmatprep.mubr.bf16.mxu0 %v5380_v0  ;;  %v721_v2 = vsel %vm719_vm0, 4294967295, %v5381_v1  ;;  %v4912_v4 = vld [vmem:[%s7317_s2 + $0x4] ss:$8 sps:$4 sm:$0x1f]  }
  0x66   : > { %p518_p1 = scmp.lt.s32.totalorder %s517_s15, 65  ;;  %v722_v3 = vsel %vm720_vm1, %v721_v2, 0  ;;  %v4914_v5 = vld [vmem:[%s7317_s2] ss:$8 sps:$4 sm:$0x1f]   ;;  %vm667_vm2 = vcmask 72704  }
  0x67   : > { %v727_v6 = vand.u32 %v4912_v4, %v722_v3  ;;  %v724_v7 = vand.u32 %v4914_v5, %v722_v3  ;;  %v4915_v14 = vld [vmem:[#allocation5 + $0x74] ss:$8 sps:$4 sm:$0xff]   ;;  %v4917_v15 = vld [vmem:[#allocation5 + $0x70] ss:$8 sps:$4 sm:$0xff]   ;;  %v4918_v16 = vld [vmem:[#allocation5 + $0x64] ss:$8 sps:$4 sm:$0xff]  }
  0x68   : > { %s7395_s15 = smov (!%p518_p1, %s517_s15), 65  ;;  %1222 = vmatprep.subr.bf16.mxu1 %v4915_v14  ;;  %v4920_v19 = vld [vmem:[#allocation5 + $0x60] ss:$8 sps:$4 sm:$0xff]   ;;  %v4921_v20 = vld [vmem:[#allocation5 + $0x54] ss:$8 sps:$4 sm:$0xff]   ;;  %vm1719_vm3 = vcmask 64512  }
  0x69   : > { %s4572_s16 = sshll.u32 %s7395_s15, 3  ;;  %743 = vmatprep.subr.bf16.mxu0 %v727_v6  ;;  %1223 = vmatpush1.bf16.msra.mxu1 %v4917_v15  ;;  %v4923_v22 = vld [vmem:[#allocation5 + $0x50] ss:$8 sps:$4 sm:$0xff]   ;;  %v4924_v23 = vld [vmem:[#allocation5 + $0x44] ss:$8 sps:$4 sm:$0xff]   ;;  %s4445_s22 = sld [smem:[#allocation2]] }
  0x6a   : > { %s5601_s4 = scalar_lea.vmem %s7316_s1, %s4572_s16  ;;  %744 = vmatpush1.bf16.msra.mxu0 %v724_v7  ;;  %1224 = vmatprep.subr.bf16.mxu1 %v4918_v16  ;;  %v4926_v26 = vld [vmem:[#allocation5 + $0x40] ss:$8 sps:$4 sm:$0xff]   ;;  %v4927_v27 = vld [vmem:[#allocation5 + $0x34] ss:$8 sps:$4 sm:$0xff]   ;;  %v4929_v29 = vld [vmem:[#allocation5 + $0x30] ss:$8 sps:$4 sm:$0xff]  }
  0x6b   : > { %v595_v8 = vld [vmem:[%s5601_s4] sm:$0xff]  ;;  %v596_v9 = vld [vmem:[%s5601_s4 + $0x8] sm:$0xff]  ;;  %v597_v11 = vld [vmem:[%s5601_s4 + $0x10] sm:$0xff]  ;;  %s7397_s12 = smov (!%p523_p4, %s5475_s12), 1  ;;  %vm4449_vm4 = vcmask 7168   ;;  %vm4451_vm5 = vcmask 3072  }
  0x6c   : > { %v628_v10 = vpack.c.bf16 %v596_v9, %v595_v8  ;;  %v598_v12 = vld [vmem:[%s5601_s4 + $0x18] sm:$0xff]  ;;  %v599_v17 = vld [vmem:[%s5601_s4 + $0x20] sm:$0xff]  ;;  %v600_v18 = vld [vmem:[%s5601_s4 + $0x28] sm:$0xff]  ;;  %s4799_s17 = sshll.u32 %s7397_s12, 4 }
  0x6d   : > { %v629_v13 = vpack.c.bf16 %v598_v12, %v597_v11  ;;  %v630_v21 = vpack.c.bf16 %v600_v18, %v599_v17  ;;  %1225 = vmatpush1.bf16.msra.mxu1 %v4920_v19  ;;  %v601_v24 = vld [vmem:[%s5601_s4 + $0x30] sm:$0xff]  ;;  %v602_v25 = vld [vmem:[%s5601_s4 + $0x38] sm:$0xff]  ;;  %v603_v31 = vld [vmem:[%s5601_s4 + $0x40] sm:$0xff]  ;;  %s527_s14 = scalar_lea.vmem %s7328_s13, %s4799_s17 }
  0x6e   : > { %4577 = vmatmul.mubr.msk.bf16.vlgmr.msra.gmra.mxu0 %vm667_vm2, %v628_v10  ;;  %1226 = vmatprep.subr.bf16.mxu1 %v4921_v20  ;;  %v631_v28 = vpack.c.bf16 %v602_v25, %v601_v24  ;;  %v4930_v30 = vld [vmem:[#allocation5 + $0x24] ss:$8 sps:$4 sm:$0xff]   ;;  %v604_v32 = vld [vmem:[%s5601_s4 + $0x48] sm:$0xff]  ;;  %v4932_v33 = vld [vmem:[#allocation5 + $0x20] ss:$8 sps:$4 sm:$0xff]  }
  0x6f   : > { %771 = vmatprep.mubr.bf16.mxu0 %v5380_v0  ;;  %v4933_v34 = vld [vmem:[#allocation5 + $0x14] ss:$8 sps:$4 sm:$0xff]   ;;  %v4935_v35 = vld [vmem:[#allocation5 + $0x10] ss:$8 sps:$4 sm:$0xff]   ;;  %v632_v36 = vpack.c.bf16 %v604_v32, %v603_v31  ;;  %v4936_v37 = vld [vmem:[#allocation5 + $0x4] ss:$8 sps:$4 sm:$0xff]  }
  0x70   : > { %v605_v38 = vld [vmem:[%s5601_s4 + $0x50] sm:$0xff]  ;;  %v606_v39 = vld [vmem:[%s5601_s4 + $0x58] sm:$0xff]  ;;  %v607_v45 = vld [vmem:[%s5601_s4 + $0x60] sm:$0xff] }
  0x71   : > { %1227 = vmatpush1.bf16.msra.mxu1 %v4923_v22  ;;  %v4938_v40 = vld [vmem:[#allocation5] ss:$8 sps:$4 sm:$0xff]   ;;  %v4939_v41 = vld [vmem:[#allocation5 + $0xf4] ss:$8 sps:$4 sm:$0xff]   ;;  %v4941_v42 = vld [vmem:[#allocation5 + $0xf0] ss:$8 sps:$4 sm:$0xff]   ;;  %v633_v43 = vpack.c.bf16 %v606_v39, %v605_v38 }
  0x72   : > { %1228 = vmatprep.subr.bf16.mxu1 %v4924_v23  ;;  %v4942_v44 = vld [vmem:[#allocation5 + $0xe4] ss:$8 sps:$4 sm:$0xff]   ;;  %v608_v46 = vld [vmem:[%s5601_s4 + $0x68] sm:$0xff]  ;;  %v4944_v47 = vld [vmem:[#allocation5 + $0xe0] ss:$8 sps:$4 sm:$0xff]  }
  0x73   : > { %v4945_v48 = vld [vmem:[#allocation5 + $0xd4] ss:$8 sps:$4 sm:$0xff]   ;;  %v4947_v49 = vld [vmem:[#allocation5 + $0xd0] ss:$8 sps:$4 sm:$0xff]   ;;  %v634_v50 = vpack.c.bf16 %v608_v46, %v607_v45  ;;  %v4948_v51 = vld [vmem:[#allocation5 + $0xc4] ss:$8 sps:$4 sm:$0xff]  }
  0x74   : > { %v609_v52 = vld [vmem:[%s5601_s4 + $0x70] sm:$0xff]  ;;  %v610_v53 = vld [vmem:[%s5601_s4 + $0x78] sm:$0xff]  ;;  %v611_v58 = vld [vmem:[%s5601_s4 + $0x80] sm:$0xff] }
  0x75   : > { %1229 = vmatpush1.bf16.msra.mxu1 %v4926_v26  ;;  %v4950_v54 = vld [vmem:[#allocation5 + $0xc0] ss:$8 sps:$4 sm:$0xff]   ;;  %v4951_v55 = vld [vmem:[#allocation5 + $0xb4] ss:$8 sps:$4 sm:$0xff]   ;;  %v4953_v56 = vld [vmem:[#allocation5 + $0xb0] ss:$8 sps:$4 sm:$0xff]   ;;  %v635_v57 = vpack.c.bf16 %v610_v53, %v609_v52 }
  0x76   : > { %4578 = vmatmul.mubr.msk.bf16.gmra.mxu0 %vm667_vm2, %v629_v13  ;;  %1230 = vmatprep.subr.bf16.mxu1 %v4927_v27  ;;  %v612_v59 = vld [vmem:[%s5601_s4 + $0x88] sm:$0xff]  ;;  %v613_v61 = vld [vmem:[%s5601_s4 + $0x90] sm:$0xff]  ;;  %v614_v62 = vld [vmem:[%s5601_s4 + $0x98] sm:$0xff]  ;;  %v649_v27 = vlaneseq }
  0x77   : > { %781 = vmatprep.mubr.bf16.mxu0 %v5380_v0  ;;  %v636_v60 = vpack.c.bf16 %v612_v59, %v611_v58  ;;  %v4954_v63 = vld [vmem:[#allocation5 + $0xa4] ss:$8 sps:$4 sm:$0xff]   ;;  %v4956_v1 = vld [vmem:[#allocation5 + $0xa0] ss:$8 sps:$4 sm:$0xff]   ;;  %v637_v2 = vpack.c.bf16 %v614_v62, %v613_v61  ;;  %v4957_v3 = vld [vmem:[#allocation5 + $0x94] ss:$8 sps:$4 sm:$0xff]  }
  0x78   : > { %v4959_v4 = vld [vmem:[#allocation5 + $0x90] ss:$8 sps:$4 sm:$0xff]   ;;  %v4960_v5 = vld [vmem:[#allocation5 + $0x84] ss:$8 sps:$4 sm:$0xff]   ;;  %v4962_v8 = vld [vmem:[#allocation5 + $0x80] ss:$8 sps:$4 sm:$0xff]  }
  0x79   : > { %1231 = vmatpush1.bf16.msra.mxu1 %v4929_v29  ;;  %v615_v6 = vld [vmem:[%s5601_s4 + $0xa0] sm:$0xff]  ;;  %v616_v7 = vld [vmem:[%s5601_s4 + $0xa8] sm:$0xff]  ;;  %v617_v10 = vld [vmem:[%s5601_s4 + $0xb0] sm:$0xff] }
  0x7a   : > { %1232 = vmatprep.subr.bf16.mxu1 %v4930_v30  ;;  %v638_v9 = vpack.c.bf16 %v616_v7, %v615_v6  ;;  %v618_v11 = vld [vmem:[%s5601_s4 + $0xb8] sm:$0xff]  ;;  %v619_v13 = vld [vmem:[%s5601_s4 + $0xc0] sm:$0xff]  ;;  %v620_v14 = vld [vmem:[%s5601_s4 + $0xc8] sm:$0xff] }
  0x7b   : > { %v639_v12 = vpack.c.bf16 %v618_v11, %v617_v10  ;;  %v640_v15 = vpack.c.bf16 %v620_v14, %v619_v13  ;;  %v621_v16 = vld [vmem:[%s5601_s4 + $0xd0] sm:$0xff]  ;;  %v622_v17 = vld [vmem:[%s5601_s4 + $0xd8] sm:$0xff]  ;;  %v623_v19 = vld [vmem:[%s5601_s4 + $0xe0] sm:$0xff] }
  0x7c   : > { %v641_v18 = vpack.c.bf16 %v622_v17, %v621_v16  ;;  %v624_v20 = vld [vmem:[%s5601_s4 + $0xe8] sm:$0xff]  ;;  %v625_v22 = vld [vmem:[%s5601_s4 + $0xf0] sm:$0xff]  ;;  %v626_v23 = vld [vmem:[%s5601_s4 + $0xf8] sm:$0xff] }
  0x7d   : > { %1233 = vmatpush1.bf16.msra.mxu1 %v4932_v33  ;;  %v643_v24 = vpack.c.bf16 %v626_v23, %v625_v22  ;;  %v627_v25 = vld [vmem:[%s5601_s4 + $0x100] sm:$0xff] }
  0x7e   : > { %4579 = vmatmul.mubr.msk.bf16.gmra.mxu0 %vm667_vm2, %v630_v21  ;;  %1234 = vmatprep.subr.bf16.mxu1 %v4933_v34  ;;  %v642_v21 = vpack.c.bf16 %v624_v20, %v623_v19  ;;  %v644_v26 = vpack.c.bf16 %v627_v25, %v627_v25  ;;  %v647_v31 = vld [vmem:[%s7318_s3] sm:$0x3] }
  0x7f   : > { %791 = vmatprep.mubr.bf16.mxu0 %v5380_v0 }
  0x81   : > { %1235 = vmatpush1.bf16.msra.mxu1 %v4935_v35 }
  0x82   : > { %1236 = vmatprep.subr.bf16.mxu1 %v4936_v37 }
  0x85   : > { %1237 = vmatpush1.bf16.msra.mxu1 %v4938_v40 }
  0x86   : > { %4580 = vmatmul.mubr.msk.bf16.gmra.mxu0 %vm667_vm2, %v631_v28  ;;  %1238 = vmatprep.subr.bf16.mxu1 %v4939_v41  ;;  %v650_v28 = vshrl.u32 %v649_v27, 7 }
  0x87   : > { %801 = vmatprep.mubr.bf16.mxu0 %v5380_v0 }
  0x88   : > { %v5669_v29 = vsub.s32 1, %v650_v28  ;;  %v5671_v30 = vsub.s32 0, %v650_v28 }
  0x89   : > { %1239 = vmatpush2.bf16.msra.mxu1 %v4941_v42 }
  0x8a   : > { %1240 = vmatprep.subr.bf16.mxu1 %v4942_v44  ;;  %v5677_v33 = vrot.slane %v647_v31, %v5669_v29  ;;  %v5680_v34 = vrot.slane %v647_v31, %v5671_v30 }
  0x8d   : > { %1241 = vmatpush2.bf16.msra.mxu1 %v4944_v47 }
  0x8e   : > { %4581 = vmatmul.mubr.msk.bf16.gmra.mxu0 %vm667_vm2, %v632_v36  ;;  %1242 = vmatprep.subr.bf16.mxu1 %v4945_v48 }
  0x8f   : > { %811 = vmatprep.mubr.bf16.mxu0 %v5380_v0 }
  0x91   : > { %1243 = vmatpush2.bf16.msra.mxu1 %v4947_v49 }
  0x92   : > { %1244 = vmatprep.subr.bf16.mxu1 %v4948_v51 }
  0x95   : > { %1245 = vmatpush2.bf16.msra.mxu1 %v4950_v54 }
  0x96   : > { %4582 = vmatmul.mubr.msk.bf16.gmra.mxu0 %vm667_vm2, %v633_v43  ;;  %1246 = vmatprep.subr.bf16.mxu1 %v4951_v55 }
  0x97   : > { %821 = vmatprep.mubr.bf16.mxu0 %v5380_v0 }
  0x99   : > { %1247 = vmatpush2.bf16.msra.mxu1 %v4953_v56 }
  0x9a   : > { %1248 = vmatprep.subr.bf16.mxu1 %v4954_v63 }
  0x9d   : > { %1249 = vmatpush2.bf16.msra.mxu1 %v4956_v1 }
  0x9e   : > { %4583 = vmatmul.mubr.msk.bf16.gmra.mxu0 %vm667_vm2, %v634_v50  ;;  %1250 = vmatprep.subr.bf16.mxu1 %v4957_v3 }
  0x9f   : > { %831 = vmatprep.mubr.bf16.mxu0 %v5380_v0 }
  0xa1   : > { %1251 = vmatpush2.bf16.msra.mxu1 %v4959_v4 }
  0xa2   : > { %1252 = vmatprep.subr.bf16.mxu1 %v4960_v5 }
  0xa5   : > { %1253 = vmatpush2.bf16.msra.mxu1 %v4962_v8 }
  0xa6   : > { %4584 = vmatmul.mubr.msk.bf16.gmra.mxu0 %vm667_vm2, %v635_v57 }
  0xa7   : > { %841 = vmatprep.mubr.bf16.mxu0 %v5380_v0 }
  0xae   : > { %4585 = vmatmul.mubr.msk.bf16.gmra.mxu0 %vm667_vm2, %v636_v60 }
  0xaf   : > { %851 = vmatprep.mubr.bf16.mxu0 %v5380_v0 }
  0xb6   : > { %4586 = vmatmul.mubr.msk.bf16.gmra.mxu0 %vm667_vm2, %v637_v2 }
  0xb7   : > { %861 = vmatprep.mubr.bf16.mxu0 %v5380_v0 }
  0xbe   : > { %4587 = vmatmul.mubr.msk.bf16.gmra.mxu0 %vm667_vm2, %v638_v9 }
  0xbf   : > { %871 = vmatprep.mubr.bf16.mxu0 %v5380_v0 }
  0xc6   : > { %4588 = vmatmul.mubr.msk.bf16.gmra.mxu0 %vm667_vm2, %v639_v12 }
  0xc7   : > { %881 = vmatprep.mubr.bf16.mxu0 %v5380_v0 }
  0xce   : > { %4589 = vmatmul.mubr.msk.bf16.gmra.mxu0 %vm667_vm2, %v640_v15 }
  0xcf   : > { %891 = vmatprep.mubr.bf16.mxu0 %v5380_v0 }
  0xd6   : > { %4590 = vmatmul.mubr.msk.bf16.gmra.mxu0 %vm667_vm2, %v641_v18 }
  0xd7   : > { %901 = vmatprep.mubr.bf16.mxu0 %v5380_v0 }
  0xde   : > { %4591 = vmatmul.mubr.msk.bf16.gmra.mxu0 %vm667_vm2, %v642_v21 }
  0xdf   : > { %911 = vmatprep.mubr.bf16.mxu0 %v5380_v0 }
  0xe6   : > { %4592 = vmatmul.mubr.msk.bf16.gmra.mxu0 %vm667_vm2, %v643_v24 }
  0xe7   : > { %921 = vmatprep.mubr.bf16.mxu0 %v5380_v0 }
  0xee   : > { %4593 = vmatmul.mubr.msk.bf16.gmra.mxu0 %vm667_vm2, %v644_v26 }
 0x12e   : > { %v763_v32 = vpop.f32.mrf.mxu0 }
 0x12f   : > { %v764_v39 = vadd.f32 %v763_v32, %v5680_v34 }
 0x130   : > { %v765_v35 = vpop.f32.mrf.mxu0 }
 0x131   : > { %v766_v37 = vadd.f32 %v765_v35, %v5677_v33  ;;  %v930_v46 = vmax.f32 %v764_v39, 0.0 }
 0x132   : > { %v767_v36 = vpop.f32.mrf.mxu0 }
 0x133   : > { %v768_v38 = vadd.f32 %v767_v36, %v5680_v34  ;;  %v931_v44 = vmax.f32 %v766_v37, 0.0 }
 0x134   : > { %v769_v40 = vpop.f32.mrf.mxu0 }
 0x135   : > { %v770_v41 = vadd.f32 %v769_v40, %v5677_v33  ;;  %v932_v42 = vmax.f32 %v768_v38, 0.0 }
 0x136   : > { %v773_v43 = vpop.f32.mrf.mxu0 }
 0x137   : > { %v933_v45 = vmax.f32 %v770_v41, 0.0  ;;  %v996_v49 = vpack.c.bf16 %v932_v42, %v930_v46  ;;  %v774_v53 = vadd.f32 %v773_v43, %v5680_v34 }
 0x138   : > { %v775_v47 = vpop.f32.mrf.mxu0 }
 0x139   : > { %v997_v48 = vpack.c.bf16 %v933_v45, %v931_v44  ;;  %v776_v51 = vadd.f32 %v775_v47, %v5677_v33  ;;  %v934_v60 = vmax.f32 %v774_v53, 0.0 }
 0x13a   : > { %v777_v50 = vpop.f32.mrf.mxu0 }
 0x13b   : > { %v778_v52 = vadd.f32 %v777_v50, %v5680_v34  ;;  %1254 = vmatprep.mubr.bf16.mxu1 %v997_v48  ;;  %v935_v58 = vmax.f32 %v776_v51, 0.0 }
 0x13c   : > { %v779_v54 = vpop.f32.mrf.mxu0  ;;  %1255 = vmatmul.mubr.bf16.vlgmr.msra.gmra.mxu1 %v996_v49 }
 0x13d   : > { %v780_v55 = vadd.f32 %v779_v54, %v5677_v33  ;;  %v936_v56 = vmax.f32 %v778_v52, 0.0 }
 0x13e   : > { %v783_v57 = vpop.f32.mrf.mxu0 }
 0x13f   : > { %v937_v59 = vmax.f32 %v780_v55, 0.0  ;;  %v998_v63 = vpack.c.bf16 %v936_v56, %v934_v60  ;;  %v784_v4 = vadd.f32 %v783_v57, %v5680_v34 }
 0x140   : > { %v785_v61 = vpop.f32.mrf.mxu0 }
 0x141   : > { %v999_v62 = vpack.c.bf16 %v937_v59, %v935_v58  ;;  %v786_v2 = vadd.f32 %v785_v61, %v5677_v33  ;;  %v938_v11 = vmax.f32 %v784_v4, 0.0 }
 0x142   : > { %v787_v1 = vpop.f32.mrf.mxu0 }
 0x143   : > { %v788_v3 = vadd.f32 %v787_v1, %v5680_v34  ;;  %1264 = vmatprep.mubr.bf16.mxu1 %v999_v62  ;;  %v939_v9 = vmax.f32 %v786_v2, 0.0 }
 0x144   : > { %v789_v5 = vpop.f32.mrf.mxu0  ;;  %1265 = vmatmul.mubr.bf16.gmra.mxu1 %v998_v63 }
 0x145   : > { %v790_v6 = vadd.f32 %v789_v5, %v5677_v33  ;;  %v940_v7 = vmax.f32 %v788_v3, 0.0 }
 0x146   : > { %v793_v8 = vpop.f32.mrf.mxu0 }
 0x147   : > { %v941_v10 = vmax.f32 %v790_v6, 0.0  ;;  %v1000_v14 = vpack.c.bf16 %v940_v7, %v938_v11  ;;  %v794_v18 = vadd.f32 %v793_v8, %v5680_v34 }
 0x148   : > { %v795_v12 = vpop.f32.mrf.mxu0 }
 0x149   : > { %v1001_v13 = vpack.c.bf16 %v941_v10, %v939_v9  ;;  %v796_v16 = vadd.f32 %v795_v12, %v5677_v33  ;;  %v942_v25 = vmax.f32 %v794_v18, 0.0 }
 0x14a   : > { %v797_v15 = vpop.f32.mrf.mxu0 }
 0x14b   : > { %v798_v17 = vadd.f32 %v797_v15, %v5680_v34  ;;  %1274 = vmatprep.mubr.bf16.mxu1 %v1001_v13  ;;  %v943_v23 = vmax.f32 %v796_v16, 0.0 }
 0x14c   : > { %v799_v19 = vpop.f32.mrf.mxu0  ;;  %1275 = vmatmul.mubr.bf16.gmra.mxu1 %v1000_v14 }
 0x14d   : > { %v800_v20 = vadd.f32 %v799_v19, %v5677_v33  ;;  %v944_v21 = vmax.f32 %v798_v17, 0.0 }
 0x14e   : > { %v803_v22 = vpop.f32.mrf.mxu0 }
 0x14f   : > { %v945_v24 = vmax.f32 %v800_v20, 0.0  ;;  %v1002_v28 = vpack.c.bf16 %v944_v21, %v942_v25  ;;  %v804_v36 = vadd.f32 %v803_v22, %v5680_v34 }
 0x150   : > { %v805_v26 = vpop.f32.mrf.mxu0 }
 0x151   : > { %v1003_v27 = vpack.c.bf16 %v945_v24, %v943_v23  ;;  %v806_v32 = vadd.f32 %v805_v26, %v5677_v33  ;;  %v946_v43 = vmax.f32 %v804_v36, 0.0 }
 0x152   : > { %v807_v31 = vpop.f32.mrf.mxu0 }
 0x153   : > { %v808_v35 = vadd.f32 %v807_v31, %v5680_v34  ;;  %1284 = vmatprep.mubr.bf16.mxu1 %v1003_v27  ;;  %v947_v41 = vmax.f32 %v806_v32, 0.0 }
 0x154   : > { %v809_v37 = vpop.f32.mrf.mxu0  ;;  %1285 = vmatmul.mubr.bf16.gmra.mxu1 %v1002_v28 }
 0x155   : > { %v810_v38 = vadd.f32 %v809_v37, %v5677_v33  ;;  %v948_v39 = vmax.f32 %v808_v35, 0.0 }
 0x156   : > { %v813_v40 = vpop.f32.mrf.mxu0 }
 0x157   : > { %v949_v42 = vmax.f32 %v810_v38, 0.0  ;;  %v1004_v46 = vpack.c.bf16 %v948_v39, %v946_v43  ;;  %v814_v50 = vadd.f32 %v813_v40, %v5680_v34 }
 0x158   : > { %v815_v44 = vpop.f32.mrf.mxu0 }
 0x159   : > { %v1005_v45 = vpack.c.bf16 %v949_v42, %v947_v41  ;;  %v816_v48 = vadd.f32 %v815_v44, %v5677_v33  ;;  %v950_v57 = vmax.f32 %v814_v50, 0.0 }
 0x15a   : > { %v817_v47 = vpop.f32.mrf.mxu0 }
 0x15b   : > { %v818_v49 = vadd.f32 %v817_v47, %v5680_v34  ;;  %1294 = vmatprep.mubr.bf16.mxu1 %v1005_v45  ;;  %v951_v55 = vmax.f32 %v816_v48, 0.0 }
 0x15c   : > { %v819_v51 = vpop.f32.mrf.mxu0  ;;  %1295 = vmatmul.mubr.bf16.gmra.mxu1 %v1004_v46 }
 0x15d   : > { %v820_v52 = vadd.f32 %v819_v51, %v5677_v33  ;;  %v952_v53 = vmax.f32 %v818_v49, 0.0 }
 0x15e   : > { %v823_v54 = vpop.f32.mrf.mxu0 }
 0x15f   : > { %v953_v56 = vmax.f32 %v820_v52, 0.0  ;;  %v1006_v60 = vpack.c.bf16 %v952_v53, %v950_v57  ;;  %v824_v1 = vadd.f32 %v823_v54, %v5680_v34 }
 0x160   : > { %v825_v58 = vpop.f32.mrf.mxu0 }
 0x161   : > { %v1007_v59 = vpack.c.bf16 %v953_v56, %v951_v55  ;;  %v826_v62 = vadd.f32 %v825_v58, %v5677_v33  ;;  %v954_v8 = vmax.f32 %v824_v1, 0.0 }
 0x162   : > { %v827_v61 = vpop.f32.mrf.mxu0 }
 0x163   : > { %v828_v63 = vadd.f32 %v827_v61, %v5680_v34  ;;  %1304 = vmatprep.mubr.bf16.mxu1 %v1007_v59  ;;  %v955_v6 = vmax.f32 %v826_v62, 0.0 }
 0x164   : > { %v829_v2 = vpop.f32.mrf.mxu0  ;;  %1305 = vmatmul.mubr.bf16.gmra.mxu1 %v1006_v60 }
 0x165   : > { %v830_v3 = vadd.f32 %v829_v2, %v5677_v33  ;;  %v956_v4 = vmax.f32 %v828_v63, 0.0 }
 0x166   : > { %v833_v5 = vpop.f32.mrf.mxu0 }
 0x167   : > { %v957_v7 = vmax.f32 %v830_v3, 0.0  ;;  %v1008_v11 = vpack.c.bf16 %v956_v4, %v954_v8  ;;  %v834_v15 = vadd.f32 %v833_v5, %v5680_v34 }
 0x168   : > { %v835_v9 = vpop.f32.mrf.mxu0 }
 0x169   : > { %v1009_v10 = vpack.c.bf16 %v957_v7, %v955_v6  ;;  %v836_v13 = vadd.f32 %v835_v9, %v5677_v33  ;;  %v958_v22 = vmax.f32 %v834_v15, 0.0 }
 0x16a   : > { %v837_v12 = vpop.f32.mrf.mxu0 }
 0x16b   : > { %v838_v14 = vadd.f32 %v837_v12, %v5680_v34  ;;  %1314 = vmatprep.mubr.bf16.mxu1 %v1009_v10  ;;  %v959_v20 = vmax.f32 %v836_v13, 0.0 }
 0x16c   : > { %v839_v16 = vpop.f32.mrf.mxu0  ;;  %1315 = vmatmul.mubr.bf16.gmra.mxu1 %v1008_v11 }
 0x16d   : > { %v840_v17 = vadd.f32 %v839_v16, %v5677_v33  ;;  %v960_v18 = vmax.f32 %v838_v14, 0.0 }
 0x16e   : > { %v843_v19 = vpop.f32.mrf.mxu0 }
 0x16f   : > { %v961_v21 = vmax.f32 %v840_v17, 0.0  ;;  %v1010_v25 = vpack.c.bf16 %v960_v18, %v958_v22  ;;  %v844_v31 = vadd.f32 %v843_v19, %v5680_v34 }
 0x170   : > { %v845_v23 = vpop.f32.mrf.mxu0 }
 0x171   : > { %v1011_v24 = vpack.c.bf16 %v961_v21, %v959_v20  ;;  %v846_v27 = vadd.f32 %v845_v23, %v5677_v33  ;;  %v962_v40 = vmax.f32 %v844_v31, 0.0 }
 0x172   : > { %v847_v26 = vpop.f32.mrf.mxu0 }
 0x173   : > { %v848_v28 = vadd.f32 %v847_v26, %v5680_v34  ;;  %1324 = vmatprep.mubr.bf16.mxu1 %v1011_v24  ;;  %v963_v38 = vmax.f32 %v846_v27, 0.0 }
 0x174   : > { %v849_v32 = vpop.f32.mrf.mxu0  ;;  %1325 = vmatmul.mubr.bf16.gmra.mxu1 %v1010_v25 }
 0x175   : > { %v850_v35 = vadd.f32 %v849_v32, %v5677_v33  ;;  %v964_v36 = vmax.f32 %v848_v28, 0.0 }
 0x176   : > { %v853_v37 = vpop.f32.mrf.mxu0 }
 0x177   : > { %v965_v39 = vmax.f32 %v850_v35, 0.0  ;;  %v1012_v43 = vpack.c.bf16 %v964_v36, %v962_v40  ;;  %v854_v47 = vadd.f32 %v853_v37, %v5680_v34 }
 0x178   : > { %v855_v41 = vpop.f32.mrf.mxu0 }
 0x179   : > { %v1013_v42 = vpack.c.bf16 %v965_v39, %v963_v38  ;;  %v856_v45 = vadd.f32 %v855_v41, %v5677_v33  ;;  %v966_v54 = vmax.f32 %v854_v47, 0.0 }
 0x17a   : > { %v857_v44 = vpop.f32.mrf.mxu0 }
 0x17b   : > { %v858_v46 = vadd.f32 %v857_v44, %v5680_v34  ;;  %1334 = vmatprep.mubr.bf16.mxu1 %v1013_v42  ;;  %v967_v52 = vmax.f32 %v856_v45, 0.0 }
 0x17c   : > { %v859_v48 = vpop.f32.mrf.mxu0  ;;  %1335 = vmatmul.mubr.bf16.gmra.mxu1 %v1012_v43 }
 0x17d   : > { %v860_v49 = vadd.f32 %v859_v48, %v5677_v33  ;;  %v968_v50 = vmax.f32 %v858_v46, 0.0 }
 0x17e   : > { %v863_v51 = vpop.f32.mrf.mxu0 }
 0x17f   : > { %v969_v53 = vmax.f32 %v860_v49, 0.0  ;;  %v1014_v57 = vpack.c.bf16 %v968_v50, %v966_v54  ;;  %v864_v61 = vadd.f32 %v863_v51, %v5680_v34 }
 0x180   : > { %v865_v55 = vpop.f32.mrf.mxu0 }
 0x181   : > { %v1015_v56 = vpack.c.bf16 %v969_v53, %v967_v52  ;;  %v866_v59 = vadd.f32 %v865_v55, %v5677_v33  ;;  %v970_v5 = vmax.f32 %v864_v61, 0.0 }
 0x182   : > { %v867_v58 = vpop.f32.mrf.mxu0 }
 0x183   : > { %v868_v60 = vadd.f32 %v867_v58, %v5680_v34  ;;  %1344 = vmatprep.mubr.bf16.mxu1 %v1015_v56  ;;  %v971_v3 = vmax.f32 %v866_v59, 0.0 }
 0x184   : > { %v869_v62 = vpop.f32.mrf.mxu0  ;;  %1345 = vmatmul.mubr.bf16.gmra.mxu1 %v1014_v57 }
 0x185   : > { %v870_v63 = vadd.f32 %v869_v62, %v5677_v33  ;;  %v972_v1 = vmax.f32 %v868_v60, 0.0 }
 0x186   : > { %v873_v2 = vpop.f32.mrf.mxu0 }
 0x187   : > { %v973_v4 = vmax.f32 %v870_v63, 0.0  ;;  %v1016_v8 = vpack.c.bf16 %v972_v1, %v970_v5  ;;  %v874_v12 = vadd.f32 %v873_v2, %v5680_v34 }
 0x188   : > { %v875_v6 = vpop.f32.mrf.mxu0 }
 0x189   : > { %v1017_v7 = vpack.c.bf16 %v973_v4, %v971_v3  ;;  %v876_v10 = vadd.f32 %v875_v6, %v5677_v33  ;;  %v974_v19 = vmax.f32 %v874_v12, 0.0 }
 0x18a   : > { %v877_v9 = vpop.f32.mrf.mxu0 }
 0x18b   : > { %v878_v11 = vadd.f32 %v877_v9, %v5680_v34  ;;  %1354 = vmatprep.mubr.bf16.mxu1 %v1017_v7  ;;  %v975_v17 = vmax.f32 %v876_v10, 0.0 }
 0x18c   : > { %v879_v13 = vpop.f32.mrf.mxu0  ;;  %1355 = vmatmul.mubr.bf16.gmra.mxu1 %v1016_v8 }
 0x18d   : > { %v880_v14 = vadd.f32 %v879_v13, %v5677_v33  ;;  %v976_v15 = vmax.f32 %v878_v11, 0.0 }
 0x18e   : > { %v883_v16 = vpop.f32.mrf.mxu0 }
 0x18f   : > { %v977_v18 = vmax.f32 %v880_v14, 0.0  ;;  %v1018_v22 = vpack.c.bf16 %v976_v15, %v974_v19  ;;  %v884_v26 = vadd.f32 %v883_v16, %v5680_v34 }
 0x190   : > { %v885_v20 = vpop.f32.mrf.mxu0 }
 0x191   : > { %v1019_v21 = vpack.c.bf16 %v977_v18, %v975_v17  ;;  %v886_v24 = vadd.f32 %v885_v20, %v5677_v33  ;;  %v978_v37 = vmax.f32 %v884_v26, 0.0 }
 0x192   : > { %v887_v23 = vpop.f32.mrf.mxu0 }
 0x193   : > { %v888_v25 = vadd.f32 %v887_v23, %v5680_v34  ;;  %1364 = vmatprep.mubr.bf16.mxu1 %v1019_v21  ;;  %v979_v35 = vmax.f32 %v886_v24, 0.0 }
 0x194   : > { %v889_v27 = vpop.f32.mrf.mxu0  ;;  %1365 = vmatmul.mubr.bf16.gmra.mxu1 %v1018_v22 }
 0x195   : > { %v890_v28 = vadd.f32 %v889_v27, %v5677_v33  ;;  %v980_v31 = vmax.f32 %v888_v25, 0.0 }
 0x196   : > { %v893_v32 = vpop.f32.mrf.mxu0 }
 0x197   : > { %v981_v36 = vmax.f32 %v890_v28, 0.0  ;;  %v1020_v40 = vpack.c.bf16 %v980_v31, %v978_v37  ;;  %v894_v44 = vadd.f32 %v893_v32, %v5680_v34 }
 0x198   : > { %v895_v38 = vpop.f32.mrf.mxu0 }
 0x199   : > { %v1021_v39 = vpack.c.bf16 %v981_v36, %v979_v35  ;;  %v896_v42 = vadd.f32 %v895_v38, %v5677_v33  ;;  %v982_v51 = vmax.f32 %v894_v44, 0.0 }
 0x19a   : > { %v897_v41 = vpop.f32.mrf.mxu0 }
 0x19b   : > { %v898_v43 = vadd.f32 %v897_v41, %v5680_v34  ;;  %1374 = vmatprep.mubr.bf16.mxu1 %v1021_v39  ;;  %v983_v49 = vmax.f32 %v896_v42, 0.0 }
 0x19c   : > { %v899_v45 = vpop.f32.mrf.mxu0  ;;  %1375 = vmatmul.mubr.bf16.gmra.mxu1 %v1020_v40 }
 0x19d   : > { %v900_v46 = vadd.f32 %v899_v45, %v5677_v33  ;;  %v984_v47 = vmax.f32 %v898_v43, 0.0 }
 0x19e   : > { %v903_v48 = vpop.f32.mrf.mxu0 }
 0x19f   : > { %v985_v50 = vmax.f32 %v900_v46, 0.0  ;;  %v1022_v54 = vpack.c.bf16 %v984_v47, %v982_v51  ;;  %v904_v58 = vadd.f32 %v903_v48, %v5680_v34  ;;  %v4966_v48 = vld [vmem:[%s5575_s19 + $0x4] ss:$12 sps:$4 sm:$0xff]  }
 0x1a0   : > { %v905_v52 = vpop.f32.mrf.mxu0  ;;  %1809 = vmatprep.mubr.bf16.mxu0 %v4966_v48 }
 0x1a1   : > { %v1023_v53 = vpack.c.bf16 %v985_v50, %v983_v49  ;;  %v906_v56 = vadd.f32 %v905_v52, %v5677_v33  ;;  %v986_v2 = vmax.f32 %v904_v58, 0.0 }
 0x1a2   : > { %v907_v55 = vpop.f32.mrf.mxu0 }
 0x1a3   : > { %v908_v57 = vadd.f32 %v907_v55, %v5680_v34  ;;  %1384 = vmatprep.mubr.bf16.mxu1 %v1023_v53  ;;  %v987_v63 = vmax.f32 %v906_v56, 0.0 }
 0x1a4   : > { %v909_v59 = vpop.f32.mrf.mxu0  ;;  %1385 = vmatmul.mubr.bf16.gmra.mxu1 %v1022_v54 }
 0x1a5   : > { %v910_v60 = vadd.f32 %v909_v59, %v5677_v33  ;;  %v988_v61 = vmax.f32 %v908_v57, 0.0 }
 0x1a6   : > { %v913_v62 = vpop.f32.mrf.mxu0 }
 0x1a7   : > { %v989_v1 = vmax.f32 %v910_v60, 0.0  ;;  %v1024_v5 = vpack.c.bf16 %v988_v61, %v986_v2  ;;  %v914_v9 = vadd.f32 %v913_v62, %v5680_v34 }
 0x1a8   : > { %v915_v3 = vpop.f32.mrf.mxu0 }
 0x1a9   : > { %v1025_v4 = vpack.c.bf16 %v989_v1, %v987_v63  ;;  %v916_v7 = vadd.f32 %v915_v3, %v5677_v33  ;;  %v990_v16 = vmax.f32 %v914_v9, 0.0 }
 0x1aa   : > { %v917_v6 = vpop.f32.mrf.mxu0 }
 0x1ab   : > { %v918_v8 = vadd.f32 %v917_v6, %v5680_v34  ;;  %1394 = vmatprep.mubr.bf16.mxu1 %v1025_v4  ;;  %v991_v14 = vmax.f32 %v916_v7, 0.0 }
 0x1ac   : > { %v919_v10 = vpop.f32.mrf.mxu0  ;;  %1395 = vmatmul.mubr.bf16.gmra.mxu1 %v1024_v5 }
 0x1ad   : > { %v920_v11 = vadd.f32 %v919_v10, %v5677_v33  ;;  %v992_v12 = vmax.f32 %v918_v8, 0.0 }
 0x1ae   : > { %v923_v13 = vpop.f32.mrf.mxu0 }
 0x1af   : > { %v993_v15 = vmax.f32 %v920_v11, 0.0  ;;  %v924_v17 = vadd.f32 %v923_v13, %v5680_v34  ;;  %v1026_v21 = vpack.c.bf16 %v992_v12, %v990_v16 }
 0x1b0   : > { %v925_v18 = vpop.f32.mrf.mxu0 }
 0x1b1   : > { %v926_v19 = vadd.f32 %v925_v18, %v5677_v33  ;;  %v1027_v20 = vpack.c.bf16 %v993_v15, %v991_v14  ;;  %v994_v24 = vmax.f32 %v924_v17, 0.0 }
 0x1b2   : > { %v927_v22 = vpop.f32.mrf.mxu0 }
 0x1b3   : > { %v995_v23 = vmax.f32 %v926_v19, 0.0  ;;  %1404 = vmatprep.mubr.bf16.mxu1 %v1027_v20  ;;  %v1028_v27 = vpack.c.bf16 %v994_v24, %v994_v24 }
 0x1b4   : > { %v928_v25 = vpop.f32.mrf.mxu0  ;;  %1405 = vmatmul.mubr.bf16.gmra.mxu1 %v1026_v21 }
 0x1b5   : > { %v1029_v26 = vpack.c.bf16 %v995_v23, %v995_v23 }
 0x1b7   : > { %1414 = vmatprep.mubr.bf16.mxu1 %v1029_v26 }
 0x1bc   : > { %1415 = vmatmul.mubr.bf16.gmra.mxu1 %v1028_v27 }
 0x1bd   : > { %2010 = vmatprep.mubr.bf16.mxu1 %v5380_v0 }
 0x1fc   : > { %v5749_v28 = vpop.f32.mrf.mxu1 }
 0x1fe   : > { %v5751_v34 = vpop.f32.mrf.mxu1 }
 0x200   : > { %v5753_v31 = vpop.f32.mrf.mxu1 }
 0x201   : > { %v1423_v33 = vpack.c.bf16 %v5753_v31, %v5749_v28 }
 0x202   : > { %v5757_v32 = vpop.f32.mrf.mxu1 }
 0x204   : > { %v5759_v35 = vpop.f32.mrf.mxu1 }
 0x206   : > { %v5761_v36 = vpop.f32.mrf.mxu1 }
 0x208   : > { %v5763_v37 = vpop.f32.mrf.mxu1 }
 0x209   : > { %v1425_v38 = vpack.c.bf16 %v5763_v37, %v5759_v35 }
 0x20a   : > { %v5767_v39 = vpop.f32.mrf.mxu1 }
 0x20b   : > { %v1426_v27 = vpack.c.bf16 %v5767_v39, %v5761_v36 }
 0x20c   : > { %v5769_v40 = vpop.f32.mrf.mxu1 }
 0x20e   : > { %v1278_v41 = vpop.f32.mrf.mxu1 }
 0x210   : > { %v1280_v42 = vpop.f32.mrf.mxu1 }
 0x211   : > { %v1427_v25 = vpack.c.bf16 %v1280_v42, %v5769_v40 }
 0x212   : > { %v1282_v43 = vpop.f32.mrf.mxu1 }
 0x213   : > { %v1428_v23 = vpack.c.bf16 %v1282_v43, %v1278_v41 }
 0x214   : > { %v1286_v44 = vpop.f32.mrf.mxu1 }
 0x216   : > { %v1288_v45 = vpop.f32.mrf.mxu1 }
 0x218   : > { %v1290_v46 = vpop.f32.mrf.mxu1 }
 0x219   : > { %v1429_v21 = vpack.c.bf16 %v1290_v46, %v1286_v44  ;;  %v1424_v44 = vpack.c.bf16 %v5757_v32, %v5751_v34 }
 0x21a   : > { %v1292_v47 = vpop.f32.mrf.mxu1 }
 0x21b   : > { %v1430_v18 = vpack.c.bf16 %v1292_v47, %v1288_v45 }
 0x21c   : > { %v1296_v49 = vpop.f32.mrf.mxu1 }
 0x21e   : > { %v1298_v50 = vpop.f32.mrf.mxu1 }
 0x220   : > { %v1300_v51 = vpop.f32.mrf.mxu1 }
 0x221   : > { %v1431_v16 = vpack.c.bf16 %v1300_v51, %v1296_v49 }
 0x222   : > { %v1302_v52 = vpop.f32.mrf.mxu1 }
 0x223   : > { %v1432_v14 = vpack.c.bf16 %v1302_v52, %v1298_v50 }
 0x224   : > { %v1306_v53 = vpop.f32.mrf.mxu1 }
 0x226   : > { %v1308_v54 = vpop.f32.mrf.mxu1 }
 0x228   : > { %v1310_v55 = vpop.f32.mrf.mxu1 }
 0x229   : > { %v1433_v12 = vpack.c.bf16 %v1310_v55, %v1306_v53 }
 0x22a   : > { %v1312_v56 = vpop.f32.mrf.mxu1 }
 0x22b   : > { %v1434_v9 = vpack.c.bf16 %v1312_v56, %v1308_v54 }
 0x22c   : > { %v1316_v57 = vpop.f32.mrf.mxu1 }
 0x22e   : > { %v1318_v58 = vpop.f32.mrf.mxu1 }
 0x230   : > { %v1320_v59 = vpop.f32.mrf.mxu1 }
 0x231   : > { %v1435_v7 = vpack.c.bf16 %v1320_v59, %v1316_v57 }
 0x232   : > { %v1322_v60 = vpop.f32.mrf.mxu1 }
 0x233   : > { %v1436_v5 = vpack.c.bf16 %v1322_v60, %v1318_v58 }
 0x234   : > { %v1326_v61 = vpop.f32.mrf.mxu1 }
 0x236   : > { %v1328_v62 = vpop.f32.mrf.mxu1 }
 0x238   : > { %v1330_v63 = vpop.f32.mrf.mxu1 }
 0x239   : > { %v1437_v3 = vpack.c.bf16 %v1330_v63, %v1326_v61  ;;  %v4963_v63 = vld [vmem:[%s5575_s19 + $0x8] ss:$12 sps:$4 sm:$0xff]  }
 0x23a   : > { %v1332_v1 = vpop.f32.mrf.mxu1 }
 0x23b   : > { %v1438_v2 = vpack.c.bf16 %v1332_v1, %v1328_v62 }
 0x23c   : > { %v5772_v4 = vpop.f32.mrf.mxu1 }
 0x23d   : > { %1777 = vmatprep.subr.bf16.mxu0 %v1438_v2 }
 0x23e   : > { %v5774_v6 = vpop.f32.mrf.mxu1  ;;  %1778 = vmatpush1.bf16.msra.mxu0 %v1437_v3 }
 0x23f   : > { %1779 = vmatprep.subr.bf16.mxu0 %v1436_v5 }
 0x240   : > { %v5776_v8 = vpop.f32.mrf.mxu1 }
 0x241   : > { %v1439_v10 = vpack.c.bf16 %v5776_v8, %v5772_v4  ;;  %v4979_v4 = vld [vmem:[%s5575_s19 + $0x68] ss:$12 sps:$4 sm:$0xff]  }
 0x242   : > { %v5780_v11 = vpop.f32.mrf.mxu1  ;;  %1780 = vmatpush1.bf16.msra.mxu0 %v1435_v7  ;;  %v5844_v8 = vld [vmem:[%s5575_s19 + $0x34] ss:$12 sps:$4 sm:$0xff]  }
 0x243   : > { %1781 = vmatprep.subr.bf16.mxu0 %v1434_v9  ;;  %v4967_v9 = vld [vmem:[%s5575_s19 + $0x20] ss:$12 sps:$4 sm:$0xff]  }
 0x244   : > { %v5782_v13 = vpop.f32.mrf.mxu1 }
 0x246   : > { %v5784_v15 = vpop.f32.mrf.mxu1  ;;  %1782 = vmatpush1.bf16.msra.mxu0 %v1433_v12 }
 0x247   : > { %1783 = vmatprep.subr.bf16.mxu0 %v1432_v14 }
 0x248   : > { %v5786_v17 = vpop.f32.mrf.mxu1 }
 0x249   : > { %v1441_v19 = vpack.c.bf16 %v5786_v17, %v5782_v13  ;;  %v5030_v13 = vld [vmem:[#allocation7 + $0x60] ss:$8 sps:$4 sm:$0xff]   ;;  %v5035_v17 = vld [vmem:[#allocation7 + $0x54] ss:$8 sps:$4 sm:$0xff]  }
 0x24a   : > { %v5790_v20 = vpop.f32.mrf.mxu1  ;;  %1784 = vmatpush1.bf16.msra.mxu0 %v1431_v16 }
 0x24b   : > { %1785 = vmatprep.subr.bf16.mxu0 %v1430_v18  ;;  %v1442_v18 = vpack.c.bf16 %v5790_v20, %v5784_v15  ;;  %v4975_v15 = vld [vmem:[%s5575_s19 + $0x50] ss:$12 sps:$4 sm:$0xff]  }
 0x24c   : > { %v5792_v22 = vpop.f32.mrf.mxu1  ;;  %v5032_v20 = vld [vmem:[#allocation7 + $0x64] ss:$8 sps:$4 sm:$0xff]  }
 0x24e   : > { %v5794_v24 = vpop.f32.mrf.mxu1  ;;  %1786 = vmatpush1.bf16.msra.mxu0 %v1429_v21  ;;  %v4971_v21 = vld [vmem:[%s5575_s19 + $0x38] ss:$12 sps:$4 sm:$0xff]  }
 0x24f   : > { %1787 = vmatprep.subr.bf16.mxu0 %v1428_v23  ;;  %v1440_v23 = vpack.c.bf16 %v5780_v11, %v5774_v6  ;;  %v4968_v6 = vld [vmem:[%s5575_s19 + $0x1c] ss:$12 sps:$4 sm:$0xff]  }
 0x250   : > { %v5797_v26 = vpop.f32.mrf.mxu1  ;;  %v5027_v11 = vld [vmem:[#allocation7 + $0x70] ss:$8 sps:$4 sm:$0xff]  }
 0x251   : > { %v1443_v16 = vpack.c.bf16 %v5797_v26, %v5792_v22  ;;  %v4964_v22 = vld [vmem:[%s5575_s19] ss:$12 sps:$4 sm:$0xff]  }
 0x252   : > { %v5801_v45 = vpop.f32.mrf.mxu1  ;;  %1788 = vmatpush1.bf16.msra.mxu0 %v1427_v25  ;;  %v5038_v25 = vld [vmem:[#allocation7 + $0x44] ss:$8 sps:$4 sm:$0xff]   ;;  %v5036_v26 = vld [vmem:[#allocation7 + $0x40] ss:$8 sps:$4 sm:$0xff]  }
 0x253   : > { %1789 = vmatprep.subr.bf16.mxu0 %v1426_v27  ;;  %v1444_v14 = vpack.c.bf16 %v5801_v45, %v5794_v24  ;;  %v5029_v24 = vld [vmem:[#allocation7 + $0x74] ss:$8 sps:$4 sm:$0xff]   ;;  %v4974_v45 = vld [vmem:[%s5575_s19 + $0x30] ss:$12 sps:$4 sm:$0xff]  }
 0x254   : > { %v1366_v47 = vpop.f32.mrf.mxu1  ;;  %v5041_v27 = vld [vmem:[#allocation7 + $0x34] ss:$8 sps:$4 sm:$0xff]  }
 0x256   : > { %v1368_v41 = vpop.f32.mrf.mxu1  ;;  %1790 = vmatpush1.bf16.msra.mxu0 %v1425_v38 }
 0x257   : > { %1791 = vmatprep.subr.bf16.mxu0 %v1424_v44  ;;  %v4976_v44 = vld [vmem:[%s5575_s19 + $0x4c] ss:$12 sps:$4 sm:$0xff]  }
 0x258   : > { %v1370_v40 = vpop.f32.mrf.mxu1 }
 0x259   : > { %v1445_v12 = vpack.c.bf16 %v1370_v40, %v1366_v47  ;;  %v4983_v47 = vld [vmem:[%s5575_s19 + $0x80] ss:$12 sps:$4 sm:$0xff]   ;;  %v5046_v40 = vld [vmem:[#allocation7 + $0x24] ss:$8 sps:$4 sm:$0xff]  }
 0x25a   : > { %v1372_v42 = vpop.f32.mrf.mxu1  ;;  %1792 = vmatpush1.bf16.msra.mxu0 %v1423_v33 }
 0x25b   : > { %v1446_v7 = vpack.c.bf16 %v1372_v42, %v1368_v41  ;;  %v5039_v41 = vld [vmem:[#allocation7 + $0x30] ss:$8 sps:$4 sm:$0xff]   ;;  %v5044_v42 = vld [vmem:[#allocation7 + $0x20] ss:$8 sps:$4 sm:$0xff]  }
 0x25c   : > { %v1376_v36 = vpop.f32.mrf.mxu1 }
 0x25e   : > { %v1378_v39 = vpop.f32.mrf.mxu1 }
 0x260   : > { %v1380_v43 = vpop.f32.mrf.mxu1 }
 0x261   : > { %v1447_v5 = vpack.c.bf16 %v1380_v43, %v1376_v36  ;;  %v5050_v36 = vld [vmem:[#allocation7 + $0x14] ss:$8 sps:$4 sm:$0xff]   ;;  %v4987_v43 = vld [vmem:[%s5575_s19 + $0x98] ss:$12 sps:$4 sm:$0xff]  }
 0x262   : > { %v1382_v46 = vpop.f32.mrf.mxu1 }
 0x263   : > { %v1448_v3 = vpack.c.bf16 %v1382_v46, %v1378_v39  ;;  %v4978_v39 = vld [vmem:[%s5575_s19 + $0x48] ss:$12 sps:$4 sm:$0xff]   ;;  %v4980_v46 = vld [vmem:[%s5575_s19 + $0x64] ss:$12 sps:$4 sm:$0xff]  }
 0x264   : > { %v1386_v48 = vpop.f32.mrf.mxu1 }
 0x266   : > { %v1388_v49 = vpop.f32.mrf.mxu1 }
 0x268   : > { %v1390_v50 = vpop.f32.mrf.mxu1 }
 0x269   : > { %v1449_v2 = vpack.c.bf16 %v1390_v50, %v1386_v48  ;;  %v5048_v48 = vld [vmem:[#allocation7 + $0x10] ss:$8 sps:$4 sm:$0xff]   ;;  %v5051_v50 = vld [vmem:[#allocation7] ss:$8 sps:$4 sm:$0xff]  }
 0x26a   : > { %v1392_v34 = vpop.f32.mrf.mxu1 }
 0x26b   : > { %v1450_v62 = vpack.c.bf16 %v1392_v34, %v1388_v49  ;;  %v5053_v49 = vld [vmem:[#allocation7 + $0x4] ss:$8 sps:$4 sm:$0xff]   ;;  %v5056_v34 = vld [vmem:[#allocation7 + $0xf4] ss:$8 sps:$4 sm:$0xff]  }
 0x26c   : > { %v1396_v32 = vpop.f32.mrf.mxu1 }
 0x26e   : > { %v1398_v51 = vpop.f32.mrf.mxu1 }
 0x270   : > { %v1400_v52 = vpop.f32.mrf.mxu1 }
 0x271   : > { %v1451_v60 = vpack.c.bf16 %v1400_v52, %v1396_v32  ;;  %v4982_v32 = vld [vmem:[%s5575_s19 + $0x60] ss:$12 sps:$4 sm:$0xff]   ;;  %v4984_v52 = vld [vmem:[%s5575_s19 + $0x7c] ss:$12 sps:$4 sm:$0xff]  }
 0x272   : > { %v1402_v35 = vpop.f32.mrf.mxu1 }
 0x273   : > { %v1452_v33 = vpack.c.bf16 %v1402_v35, %v1398_v51  ;;  %v4991_v51 = vld [vmem:[%s5575_s19 + $0xb0] ss:$12 sps:$4 sm:$0xff]  }
 0x274   : > { %v1406_v37 = vpop.f32.mrf.mxu1  ;;  %v5054_v35 = vld [vmem:[#allocation7 + $0xf0] ss:$8 sps:$4 sm:$0xff]  }
 0x276   : > { %v1408_v38 = vpop.f32.mrf.mxu1 }
 0x278   : > { %v1410_v53 = vpop.f32.mrf.mxu1 }
 0x279   : > { %v1453_v28 = vpack.c.bf16 %v1410_v53, %v1406_v37  ;;  %v5059_v37 = vld [vmem:[#allocation7 + $0xe4] ss:$8 sps:$4 sm:$0xff]   ;;  %v5062_v53 = vld [vmem:[#allocation7 + $0xd4] ss:$8 sps:$4 sm:$0xff]  }
 0x27a   : > { %v1412_v54 = vpop.f32.mrf.mxu1 }
 0x27b   : > { %v1454_v55 = vpack.c.bf16 %v1412_v54, %v1408_v38  ;;  %v5057_v38 = vld [vmem:[#allocation7 + $0xe0] ss:$8 sps:$4 sm:$0xff]  }
 0x27c   : > { %v1416_v31 = vpop.f32.mrf.mxu1  ;;  %v4986_v54 = vld [vmem:[%s5575_s19 + $0x78] ss:$12 sps:$4 sm:$0xff]  }
 0x27d   : > { %v1455_v56 = vpack.c.bf16 %v1416_v31, %v1416_v31  ;;  %1793 = vmatprep.subr.bf16.mxu0 %v1454_v55  ;;  %v4995_v55 = vld [vmem:[%s5575_s19 + $0xc8] ss:$12 sps:$4 sm:$0xff]  }
 0x27e   : > { %v1418_v57 = vpop.f32.mrf.mxu1  ;;  %1794 = vmatpush2.bf16.msra.mxu0 %v1453_v28  ;;  %v4988_v28 = vld [vmem:[%s5575_s19 + $0x94] ss:$12 sps:$4 sm:$0xff]   ;;  %v5060_v31 = vld [vmem:[#allocation7 + $0xd0] ss:$8 sps:$4 sm:$0xff]  }
 0x27f   : > { %v1772_v58 = vsel %vm719_vm0, %v1455_v56, 0  ;;  %v1456_v59 = vpack.c.bf16 %v1418_v57, %v1418_v57  ;;  %1795 = vmatprep.subr.bf16.mxu0 %v1452_v33  ;;  %v5065_v33 = vld [vmem:[#allocation7 + $0xc4] ss:$8 sps:$4 sm:$0xff]   ;;  %v5063_v56 = vld [vmem:[#allocation7 + $0xc0] ss:$8 sps:$4 sm:$0xff]  }
 0x280   : > { %v1420_v61 = vpop.f32.mrf.mxu1  ;;  %v4990_v57 = vld [vmem:[%s5575_s19 + $0x90] ss:$12 sps:$4 sm:$0xff]  }
 0x281   : > { %4677 = vmatprep.subr.msk.bf16.mxu1 %vm719_vm0, %v1456_v59  ;;  %v4992_v59 = vld [vmem:[%s5575_s19 + $0xac] ss:$12 sps:$4 sm:$0xff]  }
 0x282   : > { %v1421_v1 = vpop.f32.mrf.mxu1  ;;  %1796 = vmatpush2.bf16.msra.mxu0 %v1451_v60  ;;  %1993 = vmatpush1.bf16.msra.mxu1 %v1772_v58  ;;  %v4999_v58 = vld [vmem:[%s5575_s19 + $0xe0] ss:$12 sps:$4 sm:$0xff]   ;;  %v4994_v60 = vld [vmem:[%s5575_s19 + $0xa8] ss:$12 sps:$4 sm:$0xff]   ;;  %v5003_v61 = vld [vmem:[%s5575_s19 + $0xf8] ss:$12 sps:$4 sm:$0xff]  }
 0x283   : > { %1797 = vmatprep.subr.bf16.mxu0 %v1450_v62  ;;  %v4996_v62 = vld [vmem:[%s5575_s19 + $0xc4] ss:$12 sps:$4 sm:$0xff]  }
 0x284   : > { %v5007_v1 = vld [vmem:[%s5575_s19 + $0x110] ss:$12 sps:$4 sm:$0xff]  }
 0x285   : > { %4678 = vmatmul.mubr.msk.bf16.vlgmr.msra.gmra.mxu1 %vm1719_vm3, %v4963_v63  ;;  %v4998_v63 = vld [vmem:[%s5575_s19 + $0xc0] ss:$12 sps:$4 sm:$0xff]  }
 0x286   : > { %1798 = vmatpush2.bf16.msra.mxu0 %v1449_v2  ;;  %2020 = vmatprep.mubr.bf16.mxu1 %v5380_v0  ;;  %v5000_v2 = vld [vmem:[%s5575_s19 + $0xdc] ss:$12 sps:$4 sm:$0xff]  }
 0x287   : > { %1799 = vmatprep.subr.bf16.mxu0 %v1448_v3  ;;  %v5068_v3 = vld [vmem:[#allocation7 + $0xb4] ss:$8 sps:$4 sm:$0xff]  }
 0x28a   : > { %1800 = vmatpush2.bf16.msra.mxu0 %v1447_v5  ;;  %v5066_v5 = vld [vmem:[#allocation7 + $0xb0] ss:$8 sps:$4 sm:$0xff]  }
 0x28b   : > { %1801 = vmatprep.subr.bf16.mxu0 %v1446_v7  ;;  %v5071_v7 = vld [vmem:[#allocation7 + $0xa4] ss:$8 sps:$4 sm:$0xff]  }
 0x28d   : > { %4679 = vmatmul.mubr.msk.bf16.gmra.mxu1 %vm1719_vm3, %v4967_v9  ;;  %v5069_v9 = vld [vmem:[#allocation7 + $0xa0] ss:$8 sps:$4 sm:$0xff]  }
 0x28e   : > { %1802 = vmatpush2.bf16.msra.mxu0 %v1445_v12  ;;  %2030 = vmatprep.mubr.bf16.mxu1 %v5380_v0  ;;  %v5002_v12 = vld [vmem:[%s5575_s19 + $0xd8] ss:$12 sps:$4 sm:$0xff]  }
 0x28f   : > { %1803 = vmatprep.subr.bf16.mxu0 %v1444_v14  ;;  %v5011_v14 = vld [vmem:[%s5575_s19 + $0x128] ss:$12 sps:$4 sm:$0xff]  }
 0x292   : > { %1804 = vmatpush2.bf16.msra.mxu0 %v1443_v16  ;;  %v5004_v16 = vld [vmem:[%s5575_s19 + $0xf4] ss:$12 sps:$4 sm:$0xff]  }
 0x293   : > { %1805 = vmatprep.subr.bf16.mxu0 %v1442_v18  ;;  %v5074_v18 = vld [vmem:[#allocation7 + $0x94] ss:$8 sps:$4 sm:$0xff]  }
 0x295   : > { %4680 = vmatmul.mubr.msk.bf16.gmra.mxu1 %vm1719_vm3, %v4971_v21  ;;  %v5072_v21 = vld [vmem:[#allocation7 + $0x90] ss:$8 sps:$4 sm:$0xff]  }
 0x296   : > { %1806 = vmatpush2.bf16.msra.mxu0 %v1441_v19  ;;  %2040 = vmatprep.mubr.bf16.mxu1 %v5380_v0  ;;  %v4970_v19 = vld [vmem:[%s5575_s19 + $0x18] ss:$12 sps:$4 sm:$0xff]  }
 0x297   : > { %1807 = vmatprep.subr.bf16.mxu0 %v1440_v23  ;;  %v5077_v23 = vld [vmem:[#allocation7 + $0x84] ss:$8 sps:$4 sm:$0xff]  }
 0x29a   : > { %1808 = vmatpush2.bf16.msra.mxu0 %v1439_v10  ;;  %v5033_v10 = vld [vmem:[#allocation7 + $0x50] ss:$8 sps:$4 sm:$0xff]  }
 0x29b   : > { %2471 = vmatprep.subr.bf16.mxu0 %v5029_v24  ;;  %v5075_v24 = vld [vmem:[#allocation7 + $0x80] ss:$8 sps:$4 sm:$0xff]  }
 0x29d   : > { %1810 = vmatmul.mubr.bf16.vlgmr.msra.gmra.mxu0 %v4964_v22  ;;  %4681 = vmatmul.mubr.msk.bf16.gmra.mxu1 %vm1719_vm3, %v4975_v15  ;;  %v5006_v22 = vld [vmem:[%s5575_s19 + $0xf0] ss:$12 sps:$4 sm:$0xff]   ;;  %v5015_v15 = vld [vmem:[%s5575_s19 + $0x140] ss:$12 sps:$4 sm:$0xff]  }
 0x29e   : > { %1819 = vmatprep.mubr.bf16.mxu0 %v4968_v6  ;;  %2050 = vmatprep.mubr.bf16.mxu1 %v5380_v0  ;;  %v5010_v6 = vld [vmem:[%s5575_s19 + $0x10c] ss:$12 sps:$4 sm:$0xff]  }
 0x29f   : > { %2472 = vmatpush1.bf16.msra.mxu0 %v5027_v11  ;;  %v5008_v11 = vld [vmem:[%s5575_s19 + $0x108] ss:$12 sps:$4 sm:$0xff]  }
 0x2a0   : > { %2473 = vmatprep.subr.bf16.mxu0 %v5032_v20  ;;  %v5019_v20 = vld [vmem:[%s5575_s19 + $0x158] ss:$12 sps:$4 sm:$0xff]  }
 0x2a3   : > { %2474 = vmatpush1.bf16.msra.mxu0 %v5030_v13  ;;  %v5014_v13 = vld [vmem:[%s5575_s19 + $0x124] ss:$12 sps:$4 sm:$0xff]  }
 0x2a4   : > { %2475 = vmatprep.subr.bf16.mxu0 %v5035_v17  ;;  %v5012_v17 = vld [vmem:[%s5575_s19 + $0x120] ss:$12 sps:$4 sm:$0xff]  }
 0x2a5   : > { %1820 = vmatmul.mubr.bf16.gmra.mxu0 %v4970_v19  ;;  %4682 = vmatmul.mubr.msk.bf16.gmra.mxu1 %vm1719_vm3, %v4979_v4  ;;  %v5023_v19 = vld [vmem:[%s5575_s19 + $0x170] ss:$12 sps:$4 sm:$0xff]  }
 0x2a6   : > { %1829 = vmatprep.mubr.bf16.mxu0 %v5844_v8  ;;  %2060 = vmatprep.mubr.bf16.mxu1 %v5380_v0  ;;  %v5018_v4 = vld [vmem:[%s5575_s19 + $0x13c] ss:$12 sps:$4 sm:$0xff]  }
 0x2a7   : > { %2476 = vmatpush1.bf16.msra.mxu0 %v5033_v10  ;;  %v5016_v10 = vld [vmem:[%s5575_s19 + $0x138] ss:$12 sps:$4 sm:$0xff]  }
 0x2a8   : > { %2477 = vmatprep.subr.bf16.mxu0 %v5038_v25  ;;  %v5047_v25 = vld [vmem:[%s5575_s19 + $0x188] ss:$0 sps:$4 sm:$0xff]  }
 0x2ab   : > { %2478 = vmatpush1.bf16.msra.mxu0 %v5036_v26  ;;  %v5022_v26 = vld [vmem:[%s5575_s19 + $0x154] ss:$12 sps:$4 sm:$0xff]  }
 0x2ac   : > { %2479 = vmatprep.subr.bf16.mxu0 %v5041_v27  ;;  %v5020_v27 = vld [vmem:[%s5575_s19 + $0x150] ss:$12 sps:$4 sm:$0xff]  }
 0x2ad   : > { %1830 = vmatmul.mubr.bf16.gmra.mxu0 %v4974_v45  ;;  %4683 = vmatmul.mubr.msk.bf16.gmra.mxu1 %vm1719_vm3, %v4983_v47  ;;  %v5026_v45 = vld [vmem:[%s5575_s19 + $0x16c] ss:$12 sps:$4 sm:$0xff]   ;;  %v593_v47 = vld [vmem:[%s5575_s19 + $0x180] sm:$0xff] }
 0x2ae   : > { %1839 = vmatprep.mubr.bf16.mxu0 %v4976_v44  ;;  %2070 = vmatprep.mubr.bf16.mxu1 %v5380_v0  ;;  %v5024_v44 = vld [vmem:[%s5575_s19 + $0x168] ss:$12 sps:$4 sm:$0xff]  }
 0x2af   : > { %2480 = vmatpush1.bf16.msra.mxu0 %v5039_v41  ;;  %v5913_v41 = vcombine.high %v593_v47, %v593_v47 }
 0x2b0   : > { %2481 = vmatprep.subr.bf16.mxu0 %v5046_v40  ;;  %v5916_v40 = vcombine.low %v593_v47, %v593_v47 }
 0x2b3   : > { %2482 = vmatpush1.bf16.msra.mxu0 %v5044_v42 }
 0x2b4   : > { %2483 = vmatprep.subr.bf16.mxu0 %v5050_v36 }
 0x2b5   : > { %1840 = vmatmul.mubr.bf16.gmra.mxu0 %v4978_v39  ;;  %4684 = vmatmul.mubr.msk.bf16.gmra.mxu1 %vm1719_vm3, %v4987_v43 }
 0x2b6   : > { %1849 = vmatprep.mubr.bf16.mxu0 %v4980_v46  ;;  %2080 = vmatprep.mubr.bf16.mxu1 %v5380_v0 }
 0x2b7   : > { %2484 = vmatpush1.bf16.msra.mxu0 %v5048_v48 }
 0x2b8   : > { %2485 = vmatprep.subr.bf16.mxu0 %v5053_v49 }
 0x2bb   : > { %2486 = vmatpush1.bf16.msra.mxu0 %v5051_v50 }
 0x2bc   : > { %2487 = vmatprep.subr.bf16.mxu0 %v5056_v34 }
 0x2bd   : > { %1850 = vmatmul.mubr.bf16.gmra.mxu0 %v4982_v32  ;;  %4685 = vmatmul.mubr.msk.bf16.gmra.mxu1 %vm1719_vm3, %v4991_v51  ;;  %v1457_v51 = vld [vmem:[%s7320_s5] sm:$0x3] }
 0x2be   : > { %1859 = vmatprep.mubr.bf16.mxu0 %v4984_v52  ;;  %2090 = vmatprep.mubr.bf16.mxu1 %v5380_v0 }
 0x2bf   : > { %2488 = vmatpush2.bf16.msra.mxu0 %v5054_v35  ;;  %v5931_v35 = vrot.slane %v1457_v51, %v5669_v29 }
 0x2c0   : > { %2489 = vmatprep.subr.bf16.mxu0 %v5059_v37  ;;  %v5934_v37 = vrot.slane %v1457_v51, %v5671_v30 }
 0x2c3   : > { %2490 = vmatpush2.bf16.msra.mxu0 %v5057_v38 }
 0x2c4   : > { %2491 = vmatprep.subr.bf16.mxu0 %v5062_v53 }
 0x2c5   : > { %1860 = vmatmul.mubr.bf16.gmra.mxu0 %v4986_v54  ;;  %4686 = vmatmul.mubr.msk.bf16.gmra.mxu1 %vm1719_vm3, %v4995_v55 }
 0x2c6   : > { %1869 = vmatprep.mubr.bf16.mxu0 %v4988_v28  ;;  %2100 = vmatprep.mubr.bf16.mxu1 %v5380_v0 }
 0x2c7   : > { %2492 = vmatpush2.bf16.msra.mxu0 %v5060_v31 }
 0x2c8   : > { %2493 = vmatprep.subr.bf16.mxu0 %v5065_v33 }
 0x2cb   : > { %2494 = vmatpush2.bf16.msra.mxu0 %v5063_v56 }
 0x2cc   : > { %2495 = vmatprep.subr.bf16.mxu0 %v5068_v3 }
 0x2cd   : > { %1870 = vmatmul.mubr.bf16.gmra.mxu0 %v4990_v57  ;;  %4687 = vmatmul.mubr.msk.bf16.gmra.mxu1 %vm1719_vm3, %v4999_v58 }
 0x2ce   : > { %1879 = vmatprep.mubr.bf16.mxu0 %v4992_v59  ;;  %2110 = vmatprep.mubr.bf16.mxu1 %v5380_v0 }
 0x2cf   : > { %2496 = vmatpush2.bf16.msra.mxu0 %v5066_v5 }
 0x2d0   : > { %2497 = vmatprep.subr.bf16.mxu0 %v5071_v7 }
 0x2d3   : > { %2498 = vmatpush2.bf16.msra.mxu0 %v5069_v9 }
 0x2d4   : > { %2499 = vmatprep.subr.bf16.mxu0 %v5074_v18 }
 0x2d5   : > { %1880 = vmatmul.mubr.bf16.gmra.mxu0 %v4994_v60  ;;  %4688 = vmatmul.mubr.msk.bf16.gmra.mxu1 %vm1719_vm3, %v5003_v61 }
 0x2d6   : > { %1889 = vmatprep.mubr.bf16.mxu0 %v4996_v62  ;;  %2120 = vmatprep.mubr.bf16.mxu1 %v5380_v0 }
 0x2d7   : > { %2500 = vmatpush2.bf16.msra.mxu0 %v5072_v21 }
 0x2d8   : > { %2501 = vmatprep.subr.bf16.mxu0 %v5077_v23 }
 0x2db   : > { %2502 = vmatpush2.bf16.msra.mxu0 %v5075_v24 }
 0x2dd   : > { %1890 = vmatmul.mubr.bf16.gmra.mxu0 %v4998_v63  ;;  %4689 = vmatmul.mubr.msk.bf16.gmra.mxu1 %vm1719_vm3, %v5007_v1 }
 0x2de   : > { %1899 = vmatprep.mubr.bf16.mxu0 %v5000_v2  ;;  %2130 = vmatprep.mubr.bf16.mxu1 %v5380_v0 }
 0x2e5   : > { %1900 = vmatmul.mubr.bf16.gmra.mxu0 %v5002_v12  ;;  %4690 = vmatmul.mubr.msk.bf16.gmra.mxu1 %vm1719_vm3, %v5011_v14 }
 0x2e6   : > { %1909 = vmatprep.mubr.bf16.mxu0 %v5004_v16  ;;  %2140 = vmatprep.mubr.bf16.mxu1 %v5380_v0 }
 0x2ed   : > { %1910 = vmatmul.mubr.bf16.gmra.mxu0 %v5006_v22  ;;  %4691 = vmatmul.mubr.msk.bf16.gmra.mxu1 %vm1719_vm3, %v5015_v15 }
 0x2ee   : > { %1919 = vmatprep.mubr.bf16.mxu0 %v5010_v6  ;;  %2150 = vmatprep.mubr.bf16.mxu1 %v5380_v0 }
 0x2f5   : > { %1920 = vmatmul.mubr.bf16.gmra.mxu0 %v5008_v11  ;;  %4692 = vmatmul.mubr.msk.bf16.gmra.mxu1 %vm1719_vm3, %v5019_v20 }
 0x2f6   : > { %1929 = vmatprep.mubr.bf16.mxu0 %v5014_v13  ;;  %2160 = vmatprep.mubr.bf16.mxu1 %v5380_v0 }
 0x2fd   : > { %1930 = vmatmul.mubr.bf16.gmra.mxu0 %v5012_v17  ;;  %4693 = vmatmul.mubr.msk.bf16.gmra.mxu1 %vm1719_vm3, %v5023_v19 }
 0x2fe   : > { %1939 = vmatprep.mubr.bf16.mxu0 %v5018_v4  ;;  %2170 = vmatprep.mubr.bf16.mxu1 %v5380_v0 }
 0x305   : > { %1940 = vmatmul.mubr.bf16.gmra.mxu0 %v5016_v10  ;;  %4694 = vmatmul.mubr.msk.bf16.gmra.mxu1 %vm1719_vm3, %v5047_v25 }
 0x306   : > { %1949 = vmatprep.mubr.bf16.mxu0 %v5022_v26  ;;  %2776 = vmatprep.mubr.bf16.mxu1 %v5844_v8 }
 0x30d   : > { %1950 = vmatmul.mubr.bf16.gmra.mxu0 %v5020_v27 }
 0x30e   : > { %1959 = vmatprep.mubr.bf16.mxu0 %v5026_v45 }
 0x315   : > { %1960 = vmatmul.mubr.bf16.gmra.mxu0 %v5024_v44 }
 0x316   : > { %1969 = vmatprep.mubr.bf16.mxu0 %v5913_v41 }
 0x31d   : > { %1970 = vmatmul.mubr.bf16.gmra.mxu0 %v5916_v40 }
 0x345   : > { %v2012_v42 = vpop.f32.mrf.mxu1 }
 0x347   : > { %v2014_v36 = vpop.f32.mrf.mxu1 }
 0x349   : > { %v2016_v39 = vpop.f32.mrf.mxu1 }
 0x34b   : > { %v2018_v43 = vpop.f32.mrf.mxu1 }
 0x34d   : > { %v2022_v8 = vpop.f32.mrf.mxu1 }
 0x34f   : > { %v2024_v46 = vpop.f32.mrf.mxu1 }
 0x351   : > { %v2026_v48 = vpop.f32.mrf.mxu1 }
 0x353   : > { %v2028_v49 = vpop.f32.mrf.mxu1 }
 0x355   : > { %v5919_v50 = vpop.f32.mrf.mxu1 }
 0x357   : > { %v5921_v34 = vpop.f32.mrf.mxu1 }
 0x359   : > { %v5923_v32 = vpop.f32.mrf.mxu1 }
 0x35b   : > { %v5928_v52 = vpop.f32.mrf.mxu1 }
 0x35d   : > { %v1811_v38 = vpop.f32.mrf.mxu0  ;;  %v5936_v53 = vpop.f32.mrf.mxu1 }
 0x35e   : > { %v1812_v31 = vadd.f32 %v1811_v38, %v5934_v37 }
 0x35f   : > { %v1813_v54 = vpop.f32.mrf.mxu0  ;;  %v5938_v55 = vpop.f32.mrf.mxu1 }
 0x360   : > { %v1814_v28 = vadd.f32 %v1813_v54, %v5931_v35  ;;  %v2013_v63 = vadd.f32 %v2012_v42, %v1812_v31 }
 0x361   : > { %v1815_v33 = vpop.f32.mrf.mxu0  ;;  %v5942_v56 = vpop.f32.mrf.mxu1 }
 0x362   : > { %v1816_v57 = vadd.f32 %v1815_v33, %v5934_v37  ;;  %v2015_v60 = vadd.f32 %v2014_v36, %v1814_v28  ;;  %v2179_v18 = vmax.f32 %v2013_v63, 0.0 }
 0x363   : > { %v1817_v58 = vpop.f32.mrf.mxu0  ;;  %v5945_v59 = vpop.f32.mrf.mxu1 }
 0x364   : > { %v2017_v61 = vadd.f32 %v2016_v39, %v1816_v57  ;;  %v1818_v62 = vadd.f32 %v1817_v58, %v5931_v35  ;;  %v2180_v12 = vmax.f32 %v2015_v60, 0.0 }
 0x365   : > { %v1821_v1 = vpop.f32.mrf.mxu0  ;;  %v5948_v2 = vpop.f32.mrf.mxu1 }
 0x366   : > { %v2019_v3 = vadd.f32 %v2018_v43, %v1818_v62  ;;  %v2181_v5 = vmax.f32 %v2017_v61, 0.0  ;;  %v1822_v21 = vadd.f32 %v1821_v1, %v5934_v37 }
 0x367   : > { %v1823_v7 = vpop.f32.mrf.mxu0  ;;  %v5950_v9 = vpop.f32.mrf.mxu1 }
 0x368   : > { %v2182_v14 = vmax.f32 %v2019_v3, 0.0  ;;  %v1824_v16 = vadd.f32 %v1823_v7, %v5931_v35  ;;  %v2245_v6 = vpack.c.bf16 %v2181_v5, %v2179_v18  ;;  %v2023_v4 = vadd.f32 %v2022_v8, %v1822_v21 }
 0x369   : > { %v1825_v23 = vpop.f32.mrf.mxu0  ;;  %v5954_v24 = vpop.f32.mrf.mxu1 }
 0x36a   : > { %v1826_v22 = vadd.f32 %v1825_v23, %v5934_v37  ;;  %v2246_v15 = vpack.c.bf16 %v2182_v14, %v2180_v12  ;;  %v2025_v13 = vadd.f32 %v2024_v46, %v1824_v16  ;;  %v2183_v39 = vmax.f32 %v2023_v4, 0.0 }
 0x36b   : > { %v1827_v11 = vpop.f32.mrf.mxu0  ;;  %v5957_v20 = vpop.f32.mrf.mxu1 }
 0x36c   : > { %v2027_v17 = vadd.f32 %v2026_v48, %v1826_v22  ;;  %v1828_v19 = vadd.f32 %v1827_v11, %v5931_v35  ;;  %2503 = vmatprep.mubr.bf16.mxu0 %v2246_v15  ;;  %v2184_v44 = vmax.f32 %v2025_v13, 0.0 }
 0x36d   : > { %v1831_v10 = vpop.f32.mrf.mxu0  ;;  %2504 = vmatmul.mubr.bf16.vlgmr.msra.gmra.mxu0 %v2245_v6  ;;  %v5960_v25 = vpop.f32.mrf.mxu1 }
 0x36e   : > { %v2029_v26 = vadd.f32 %v2028_v49, %v1828_v19  ;;  %v2185_v27 = vmax.f32 %v2027_v17, 0.0  ;;  %v1832_v43 = vadd.f32 %v1831_v10, %v5934_v37 }
 0x36f   : > { %v1833_v45 = vpop.f32.mrf.mxu0  ;;  %v5962_v47 = vpop.f32.mrf.mxu1 }
 0x370   : > { %v2186_v42 = vmax.f32 %v2029_v26, 0.0  ;;  %v1834_v36 = vadd.f32 %v1833_v45, %v5931_v35  ;;  %v2247_v38 = vpack.c.bf16 %v2185_v27, %v2183_v39  ;;  %v2033_v57 = vadd.f32 %v5919_v50, %v1832_v43 }
 0x371   : > { %v1835_v46 = vpop.f32.mrf.mxu0  ;;  %v5966_v48 = vpop.f32.mrf.mxu1 }
 0x372   : > { %v1836_v8 = vadd.f32 %v1835_v46, %v5934_v37  ;;  %v2248_v51 = vpack.c.bf16 %v2186_v42, %v2184_v44  ;;  %v2035_v28 = vadd.f32 %v5921_v34, %v1834_v36 }
 0x373   : > { %v1837_v54 = vpop.f32.mrf.mxu0  ;;  %v5969_v49 = vpop.f32.mrf.mxu1 }
 0x374   : > { %v2037_v31 = vadd.f32 %v5923_v32, %v1836_v8  ;;  %v1838_v33 = vadd.f32 %v1837_v54, %v5931_v35  ;;  %2513 = vmatprep.mubr.bf16.mxu0 %v2248_v51  ;;  %v2188_v3 = vmax.f32 %v2035_v28, 0.0  ;;  %v2187_v32 = vmax.f32 %v2033_v57, 0.0 }
 0x375   : > { %v1841_v58 = vpop.f32.mrf.mxu0  ;;  %2514 = vmatmul.mubr.bf16.gmra.mxu0 %v2247_v38  ;;  %v5975_v60 = vpop.f32.mrf.mxu1 }
 0x376   : > { %v2039_v61 = vadd.f32 %v5928_v52, %v1838_v33  ;;  %v2189_v62 = vmax.f32 %v2037_v31, 0.0  ;;  %v1842_v7 = vadd.f32 %v1841_v58, %v5934_v37 }
 0x377   : > { %v1843_v63 = vpop.f32.mrf.mxu0  ;;  %v5978_v1 = vpop.f32.mrf.mxu1 }
 0x378   : > { %v2190_v5 = vmax.f32 %v2039_v61, 0.0  ;;  %v1844_v34 = vadd.f32 %v1843_v63, %v5931_v35  ;;  %v2249_v18 = vpack.c.bf16 %v2189_v62, %v2187_v32  ;;  %v2043_v6 = vadd.f32 %v5936_v53, %v1842_v7 }
 0x379   : > { %v1845_v12 = vpop.f32.mrf.mxu0  ;;  %v5982_v14 = vpop.f32.mrf.mxu1 }
 0x37a   : > { %v1846_v50 = vadd.f32 %v1845_v12, %v5934_v37  ;;  %v2250_v16 = vpack.c.bf16 %v2190_v5, %v2188_v3  ;;  %v2045_v23 = vadd.f32 %v5938_v55, %v1844_v34 }
 0x37b   : > { %v1847_v21 = vpop.f32.mrf.mxu0  ;;  %v5985_v52 = vpop.f32.mrf.mxu1 }
 0x37c   : > { %v2047_v22 = vadd.f32 %v5942_v56, %v1846_v50  ;;  %v1848_v15 = vadd.f32 %v1847_v21, %v5931_v35  ;;  %2523 = vmatprep.mubr.bf16.mxu0 %v2250_v16  ;;  %v2192_v26 = vmax.f32 %v2045_v23, 0.0  ;;  %v2191_v56 = vmax.f32 %v2043_v6, 0.0 }
 0x37d   : > { %v1851_v11 = vpop.f32.mrf.mxu0  ;;  %2524 = vmatmul.mubr.bf16.gmra.mxu0 %v2249_v18  ;;  %v5991_v13 = vpop.f32.mrf.mxu1 }
 0x37e   : > { %v2049_v17 = vadd.f32 %v5945_v59, %v1848_v15  ;;  %v2193_v19 = vmax.f32 %v2047_v22, 0.0  ;;  %v1852_v45 = vadd.f32 %v1851_v11, %v5934_v37 }
 0x37f   : > { %v1853_v4 = vpop.f32.mrf.mxu0  ;;  %v5994_v10 = vpop.f32.mrf.mxu1 }
 0x380   : > { %v2194_v27 = vmax.f32 %v2049_v17, 0.0  ;;  %v1854_v55 = vadd.f32 %v1853_v4, %v5931_v35  ;;  %v2251_v39 = vpack.c.bf16 %v2193_v19, %v2191_v56  ;;  %v2053_v38 = vadd.f32 %v5948_v2, %v1852_v45 }
 0x381   : > { %v1855_v44 = vpop.f32.mrf.mxu0  ;;  %v5998_v42 = vpop.f32.mrf.mxu1 }
 0x382   : > { %v1856_v53 = vadd.f32 %v1855_v44, %v5934_v37  ;;  %v2252_v36 = vpack.c.bf16 %v2194_v27, %v2192_v26  ;;  %v2055_v46 = vadd.f32 %v5950_v9, %v1854_v55 }
 0x383   : > { %v1857_v43 = vpop.f32.mrf.mxu0  ;;  %v6001_v59 = vpop.f32.mrf.mxu1 }
 0x384   : > { %v2057_v8 = vadd.f32 %v5954_v24, %v1856_v53  ;;  %v1858_v51 = vadd.f32 %v1857_v43, %v5931_v35  ;;  %2533 = vmatprep.mubr.bf16.mxu0 %v2252_v36  ;;  %v2196_v61 = vmax.f32 %v2055_v46, 0.0  ;;  %v2195_v24 = vmax.f32 %v2053_v38, 0.0 }
 0x385   : > { %v1861_v54 = vpop.f32.mrf.mxu0  ;;  %2534 = vmatmul.mubr.bf16.gmra.mxu0 %v2251_v39  ;;  %v6007_v28 = vpop.f32.mrf.mxu1 }
 0x386   : > { %v2059_v31 = vadd.f32 %v5957_v20, %v1858_v51  ;;  %v2197_v33 = vmax.f32 %v2057_v8, 0.0  ;;  %v1862_v63 = vadd.f32 %v1861_v54, %v5934_v37 }
 0x387   : > { %v1863_v57 = vpop.f32.mrf.mxu0  ;;  %v6010_v58 = vpop.f32.mrf.mxu1 }
 0x388   : > { %v2198_v62 = vmax.f32 %v2059_v31, 0.0  ;;  %v1864_v9 = vadd.f32 %v1863_v57, %v5931_v35  ;;  %v2253_v32 = vpack.c.bf16 %v2197_v33, %v2195_v24  ;;  %v2063_v18 = vadd.f32 %v5960_v25, %v1862_v63 }
 0x389   : > { %v1865_v3 = vpop.f32.mrf.mxu0  ;;  %v6014_v5 = vpop.f32.mrf.mxu1 }
 0x38a   : > { %v1866_v2 = vadd.f32 %v1865_v3, %v5934_v37  ;;  %v2254_v34 = vpack.c.bf16 %v2198_v62, %v2196_v61  ;;  %v2065_v12 = vadd.f32 %v5962_v47, %v1864_v9 }
 0x38b   : > { %v1867_v7 = vpop.f32.mrf.mxu0  ;;  %v6017_v20 = vpop.f32.mrf.mxu1 }
 0x38c   : > { %v2067_v50 = vadd.f32 %v5966_v48, %v1866_v2  ;;  %v1868_v16 = vadd.f32 %v1867_v7, %v5931_v35  ;;  %2543 = vmatprep.mubr.bf16.mxu0 %v2254_v34  ;;  %v2200_v17 = vmax.f32 %v2065_v12, 0.0  ;;  %v2199_v48 = vmax.f32 %v2063_v18, 0.0 }
 0x38d   : > { %v1871_v21 = vpop.f32.mrf.mxu0  ;;  %2544 = vmatmul.mubr.bf16.gmra.mxu0 %v2253_v32  ;;  %v6023_v23 = vpop.f32.mrf.mxu1 }
 0x38e   : > { %v2069_v22 = vadd.f32 %v5969_v49, %v1868_v16  ;;  %v2201_v15 = vmax.f32 %v2067_v50, 0.0  ;;  %v1872_v4 = vadd.f32 %v1871_v21, %v5934_v37 }
 0x38f   : > { %v1873_v6 = vpop.f32.mrf.mxu0  ;;  %v6026_v11 = vpop.f32.mrf.mxu1 }
 0x390   : > { %v2202_v19 = vmax.f32 %v2069_v22, 0.0  ;;  %v1874_v47 = vadd.f32 %v1873_v6, %v5931_v35  ;;  %v2255_v56 = vpack.c.bf16 %v2201_v15, %v2199_v48  ;;  %v2073_v39 = vadd.f32 %v5975_v60, %v1872_v4 }
 0x391   : > { %v1875_v26 = vpop.f32.mrf.mxu0  ;;  %v6030_v27 = vpop.f32.mrf.mxu1 }
 0x392   : > { %v1876_v25 = vadd.f32 %v1875_v26, %v5934_v37  ;;  %v2256_v55 = vpack.c.bf16 %v2202_v19, %v2200_v17  ;;  %v2075_v44 = vadd.f32 %v5978_v1, %v1874_v47 }
 0x393   : > { %v1877_v45 = vpop.f32.mrf.mxu0  ;;  %v6033_v49 = vpop.f32.mrf.mxu1 }
 0x394   : > { %v2077_v53 = vadd.f32 %v5982_v14, %v1876_v25  ;;  %v1878_v36 = vadd.f32 %v1877_v45, %v5931_v35  ;;  %2553 = vmatprep.mubr.bf16.mxu0 %v2256_v55  ;;  %v2204_v31 = vmax.f32 %v2075_v44, 0.0  ;;  %v2203_v14 = vmax.f32 %v2073_v39, 0.0 }
 0x395   : > { %v1881_v43 = vpop.f32.mrf.mxu0  ;;  %2554 = vmatmul.mubr.bf16.gmra.mxu0 %v2255_v56  ;;  %v6039_v46 = vpop.f32.mrf.mxu1 }
 0x396   : > { %v2079_v8 = vadd.f32 %v5985_v52, %v1878_v36  ;;  %v2205_v51 = vmax.f32 %v2077_v53, 0.0  ;;  %v1882_v57 = vadd.f32 %v1881_v43, %v5934_v37 }
 0x397   : > { %v1883_v38 = vpop.f32.mrf.mxu0  ;;  %v6042_v54 = vpop.f32.mrf.mxu1 }
 0x398   : > { %v2206_v33 = vmax.f32 %v2079_v8, 0.0  ;;  %v1884_v1 = vadd.f32 %v1883_v38, %v5931_v35  ;;  %v2257_v24 = vpack.c.bf16 %v2205_v51, %v2203_v14  ;;  %v2083_v32 = vadd.f32 %v5991_v13, %v1882_v57 }
 0x399   : > { %v1885_v61 = vpop.f32.mrf.mxu0  ;;  %v6046_v62 = vpop.f32.mrf.mxu1 }
 0x39a   : > { %v1886_v60 = vadd.f32 %v1885_v61, %v5934_v37  ;;  %v2258_v9 = vpack.c.bf16 %v2206_v33, %v2204_v31  ;;  %v2085_v3 = vadd.f32 %v5994_v10, %v1884_v1 }
 0x39b   : > { %v1887_v63 = vpop.f32.mrf.mxu0  ;;  %v6049_v52 = vpop.f32.mrf.mxu1 }
 0x39c   : > { %v2087_v2 = vadd.f32 %v5998_v42, %v1886_v60  ;;  %v1888_v34 = vadd.f32 %v1887_v63, %v5931_v35  ;;  %2563 = vmatprep.mubr.bf16.mxu0 %v2258_v9  ;;  %v2208_v22 = vmax.f32 %v2085_v3, 0.0  ;;  %v2207_v42 = vmax.f32 %v2083_v32, 0.0 }
 0x39d   : > { %v1891_v7 = vpop.f32.mrf.mxu0  ;;  %2564 = vmatmul.mubr.bf16.gmra.mxu0 %v2257_v24  ;;  %v6055_v12 = vpop.f32.mrf.mxu1 }
 0x39e   : > { %v2089_v50 = vadd.f32 %v6001_v59, %v1888_v34  ;;  %v2209_v16 = vmax.f32 %v2087_v2, 0.0  ;;  %v1892_v6 = vadd.f32 %v1891_v7, %v5934_v37 }
 0x39f   : > { %v1893_v18 = vpop.f32.mrf.mxu0  ;;  %v6058_v21 = vpop.f32.mrf.mxu1 }
 0x3a0   : > { %v2210_v15 = vmax.f32 %v2089_v50, 0.0  ;;  %v1894_v10 = vadd.f32 %v1893_v18, %v5931_v35  ;;  %v2259_v48 = vpack.c.bf16 %v2209_v16, %v2207_v42  ;;  %v2093_v56 = vadd.f32 %v6007_v28, %v1892_v6 }
 0x3a1   : > { %v1895_v17 = vpop.f32.mrf.mxu0  ;;  %v6062_v19 = vpop.f32.mrf.mxu1 }
 0x3a2   : > { %v1896_v13 = vadd.f32 %v1895_v17, %v5934_v37  ;;  %v2260_v47 = vpack.c.bf16 %v2210_v15, %v2208_v22  ;;  %v2095_v26 = vadd.f32 %v6010_v58, %v1894_v10 }
 0x3a3   : > { %v1897_v4 = vpop.f32.mrf.mxu0  ;;  %v6065_v59 = vpop.f32.mrf.mxu1 }
 0x3a4   : > { %v2097_v25 = vadd.f32 %v6014_v5, %v1896_v13  ;;  %v1898_v55 = vadd.f32 %v1897_v4, %v5931_v35  ;;  %2573 = vmatprep.mubr.bf16.mxu0 %v2260_v47  ;;  %v2212_v8 = vmax.f32 %v2095_v26, 0.0  ;;  %v2211_v5 = vmax.f32 %v2093_v56, 0.0 }
 0x3a5   : > { %v1901_v45 = vpop.f32.mrf.mxu0  ;;  %2574 = vmatmul.mubr.bf16.gmra.mxu0 %v2259_v48  ;;  %v6071_v44 = vpop.f32.mrf.mxu1 }
 0x3a6   : > { %v2099_v53 = vadd.f32 %v6017_v20, %v1898_v55  ;;  %v2213_v36 = vmax.f32 %v2097_v25, 0.0  ;;  %v1902_v38 = vadd.f32 %v1901_v45, %v5934_v37 }
 0x3a7   : > { %v1903_v39 = vpop.f32.mrf.mxu0  ;;  %v6074_v43 = vpop.f32.mrf.mxu1 }
 0x3a8   : > { %v2214_v51 = vmax.f32 %v2099_v53, 0.0  ;;  %v1904_v58 = vadd.f32 %v1903_v39, %v5931_v35  ;;  %v2261_v14 = vpack.c.bf16 %v2213_v36, %v2211_v5  ;;  %v2103_v24 = vadd.f32 %v6023_v23, %v1902_v38 }
 0x3a9   : > { %v1905_v31 = vpop.f32.mrf.mxu0  ;;  %v6078_v33 = vpop.f32.mrf.mxu1 }
 0x3aa   : > { %v1906_v28 = vadd.f32 %v1905_v31, %v5934_v37  ;;  %v2262_v1 = vpack.c.bf16 %v2214_v51, %v2212_v8  ;;  %v2105_v61 = vadd.f32 %v6026_v11, %v1904_v58 }
 0x3ab   : > { %v1907_v57 = vpop.f32.mrf.mxu0  ;;  %v6081_v20 = vpop.f32.mrf.mxu1 }
 0x3ac   : > { %v2107_v60 = vadd.f32 %v6030_v27, %v1906_v28  ;;  %v1908_v9 = vadd.f32 %v1907_v57, %v5931_v35  ;;  %2583 = vmatprep.mubr.bf16.mxu0 %v2262_v1  ;;  %v2216_v50 = vmax.f32 %v2105_v61, 0.0  ;;  %v2215_v27 = vmax.f32 %v2103_v24, 0.0 }
 0x3ad   : > { %v1911_v63 = vpop.f32.mrf.mxu0  ;;  %2584 = vmatmul.mubr.bf16.gmra.mxu0 %v2261_v14  ;;  %v6087_v3 = vpop.f32.mrf.mxu1 }
 0x3ae   : > { %v2109_v2 = vadd.f32 %v6033_v49, %v1908_v9  ;;  %v2217_v34 = vmax.f32 %v2107_v60, 0.0  ;;  %v1912_v18 = vadd.f32 %v1911_v63, %v5934_v37 }
 0x3af   : > { %v1913_v32 = vpop.f32.mrf.mxu0  ;;  %v6090_v7 = vpop.f32.mrf.mxu1 }
 0x3b0   : > { %v2218_v16 = vmax.f32 %v2109_v2, 0.0  ;;  %v1914_v11 = vadd.f32 %v1913_v32, %v5931_v35  ;;  %v2263_v42 = vpack.c.bf16 %v2217_v34, %v2215_v27  ;;  %v2113_v48 = vadd.f32 %v6039_v46, %v1912_v18 }
 0x3b1   : > { %v1915_v22 = vpop.f32.mrf.mxu0  ;;  %v6094_v15 = vpop.f32.mrf.mxu1 }
 0x3b2   : > { %v1916_v23 = vadd.f32 %v1915_v22, %v5934_v37  ;;  %v2264_v10 = vpack.c.bf16 %v2218_v16, %v2216_v50  ;;  %v2115_v17 = vadd.f32 %v6042_v54, %v1914_v11 }
 0x3b3   : > { %v1917_v6 = vpop.f32.mrf.mxu0  ;;  %v6097_v49 = vpop.f32.mrf.mxu1 }
 0x3b4   : > { %v2117_v13 = vadd.f32 %v6046_v62, %v1916_v23  ;;  %v1918_v47 = vadd.f32 %v1917_v6, %v5931_v35  ;;  %2593 = vmatprep.mubr.bf16.mxu0 %v2264_v10  ;;  %v2220_v53 = vmax.f32 %v2115_v17, 0.0  ;;  %v2219_v62 = vmax.f32 %v2113_v48, 0.0 }
 0x3b5   : > { %v1921_v4 = vpop.f32.mrf.mxu0  ;;  %2594 = vmatmul.mubr.bf16.gmra.mxu0 %v2263_v42  ;;  %v6103_v26 = vpop.f32.mrf.mxu1 }
 0x3b6   : > { %v2119_v25 = vadd.f32 %v6049_v52, %v1918_v47  ;;  %v2221_v55 = vmax.f32 %v2117_v13, 0.0  ;;  %v1922_v39 = vadd.f32 %v1921_v4, %v5934_v37 }
 0x3b7   : > { %v1923_v56 = vpop.f32.mrf.mxu0  ;;  %v6106_v45 = vpop.f32.mrf.mxu1 }
 0x3b8   : > { %v2222_v36 = vmax.f32 %v2119_v25, 0.0  ;;  %v1924_v54 = vadd.f32 %v1923_v56, %v5931_v35  ;;  %v2265_v5 = vpack.c.bf16 %v2221_v55, %v2219_v62  ;;  %v2123_v14 = vadd.f32 %v6055_v12, %v1922_v39 }
 0x3b9   : > { %v1925_v8 = vpop.f32.mrf.mxu0  ;;  %v6110_v51 = vpop.f32.mrf.mxu1 }
 0x3ba   : > { %v1926_v46 = vadd.f32 %v1925_v8, %v5934_v37  ;;  %v2266_v58 = vpack.c.bf16 %v2222_v36, %v2220_v53  ;;  %v2125_v31 = vadd.f32 %v6058_v21, %v1924_v54 }
 0x3bb   : > { %v1927_v38 = vpop.f32.mrf.mxu0  ;;  %v6113_v52 = vpop.f32.mrf.mxu1 }
 0x3bc   : > { %v2127_v28 = vadd.f32 %v6062_v19, %v1926_v46  ;;  %v1928_v1 = vadd.f32 %v1927_v38, %v5931_v35  ;;  %2603 = vmatprep.mubr.bf16.mxu0 %v2266_v58  ;;  %v2224_v2 = vmax.f32 %v2125_v31, 0.0  ;;  %v2223_v19 = vmax.f32 %v2123_v14, 0.0 }
 0x3bd   : > { %v1931_v57 = vpop.f32.mrf.mxu0  ;;  %2604 = vmatmul.mubr.bf16.gmra.mxu0 %v2265_v5  ;;  %v6119_v61 = vpop.f32.mrf.mxu1 }
 0x3be   : > { %v2129_v60 = vadd.f32 %v6065_v59, %v1928_v1  ;;  %v2225_v9 = vmax.f32 %v2127_v28, 0.0  ;;  %v1932_v32 = vadd.f32 %v1931_v57, %v5934_v37 }
 0x3bf   : > { %v1933_v24 = vpop.f32.mrf.mxu0  ;;  %v6122_v63 = vpop.f32.mrf.mxu1 }
 0x3c0   : > { %v2226_v34 = vmax.f32 %v2129_v60, 0.0  ;;  %v1934_v21 = vadd.f32 %v1933_v24, %v5931_v35  ;;  %v2267_v27 = vpack.c.bf16 %v2225_v9, %v2223_v19  ;;  %v2133_v42 = vadd.f32 %v6071_v44, %v1932_v32 }
 0x3c1   : > { %v1935_v50 = vpop.f32.mrf.mxu0  ;;  %v6126_v16 = vpop.f32.mrf.mxu1 }
 0x3c2   : > { %v1936_v12 = vadd.f32 %v1935_v50, %v5934_v37  ;;  %v2268_v11 = vpack.c.bf16 %v2226_v34, %v2224_v2  ;;  %v2135_v22 = vadd.f32 %v6074_v43, %v1934_v21 }
 0x3c3   : > { %v1937_v18 = vpop.f32.mrf.mxu0  ;;  %v6129_v59 = vpop.f32.mrf.mxu1 }
 0x3c4   : > { %v2137_v23 = vadd.f32 %v6078_v33, %v1936_v12  ;;  %v1938_v10 = vadd.f32 %v1937_v18, %v5931_v35  ;;  %2613 = vmatprep.mubr.bf16.mxu0 %v2268_v11  ;;  %v2228_v25 = vmax.f32 %v2135_v22, 0.0  ;;  %v2227_v33 = vmax.f32 %v2133_v42, 0.0 }
 0x3c5   : > { %v1941_v6 = vpop.f32.mrf.mxu0  ;;  %2614 = vmatmul.mubr.bf16.gmra.mxu0 %v2267_v27  ;;  %v6135_v17 = vpop.f32.mrf.mxu1 }
 0x3c6   : > { %v2139_v13 = vadd.f32 %v6081_v20, %v1938_v10  ;;  %v2229_v47 = vmax.f32 %v2137_v23, 0.0  ;;  %v1942_v56 = vadd.f32 %v1941_v6, %v5934_v37 }
 0x3c7   : > { %v1943_v48 = vpop.f32.mrf.mxu0  ;;  %v6138_v4 = vpop.f32.mrf.mxu1 }
 0x3c8   : > { %v2230_v55 = vmax.f32 %v2139_v13, 0.0  ;;  %v1944_v43 = vadd.f32 %v1943_v48, %v5931_v35  ;;  %v2269_v62 = vpack.c.bf16 %v2229_v47, %v2227_v33  ;;  %v2143_v5 = vadd.f32 %v6087_v3, %v1942_v56 }
 0x3c9   : > { %v1945_v53 = vpop.f32.mrf.mxu0  ;;  %v2176_v36 = vpop.f32.mrf.mxu1 }
 0x3ca   : > { %v1946_v44 = vadd.f32 %v1945_v53, %v5934_v37  ;;  %v2270_v54 = vpack.c.bf16 %v2230_v55, %v2228_v25  ;;  %v2145_v20 = vadd.f32 %v6090_v7, %v1944_v43  ;;  %v2231_v9 = vmax.f32 %v2143_v5, 0.0  ;;  %v6169_v5 = vld [vmem:[%s5575_s19 + $0x4] ss:$12 sps:$4 sm:$0xff]  }
 0x3cb   : > { %v1947_v39 = vpop.f32.mrf.mxu0  ;;  %v2177_v8 = vpop.f32.mrf.mxu1 }
 0x3cc   : > { %v2147_v46 = vadd.f32 %v6094_v15, %v1946_v44  ;;  %v1948_v58 = vadd.f32 %v1947_v39, %v5931_v35  ;;  %2623 = vmatprep.mubr.bf16.mxu0 %v2270_v54  ;;  %v2232_v14 = vmax.f32 %v2145_v20, 0.0 }
 0x3cd   : > { %v1951_v38 = vpop.f32.mrf.mxu0  ;;  %2624 = vmatmul.mubr.bf16.gmra.mxu0 %v2269_v62 }
 0x3ce   : > { %v2149_v31 = vadd.f32 %v6097_v49, %v1948_v58  ;;  %v2233_v28 = vmax.f32 %v2147_v46, 0.0  ;;  %v1952_v7 = vadd.f32 %v1951_v38, %v5934_v37 }
 0x3cf   : > { %v1953_v1 = vpop.f32.mrf.mxu0 }
 0x3d0   : > { %v2234_v57 = vmax.f32 %v2149_v31, 0.0  ;;  %v1954_v60 = vadd.f32 %v1953_v1, %v5931_v35  ;;  %v2271_v34 = vpack.c.bf16 %v2233_v28, %v2231_v9  ;;  %v2153_v32 = vadd.f32 %v6103_v26, %v1952_v7 }
 0x3d1   : > { %v1955_v24 = vpop.f32.mrf.mxu0 }
 0x3d2   : > { %v1956_v15 = vadd.f32 %v1955_v24, %v5934_v37  ;;  %v2272_v2 = vpack.c.bf16 %v2234_v57, %v2232_v14  ;;  %v2155_v3 = vadd.f32 %v6106_v45, %v1954_v60  ;;  %v2235_v10 = vmax.f32 %v2153_v32, 0.0 }
 0x3d3   : > { %v1957_v21 = vpop.f32.mrf.mxu0 }
 0x3d4   : > { %v2157_v19 = vadd.f32 %v6110_v51, %v1956_v15  ;;  %v1958_v49 = vadd.f32 %v1957_v21, %v5931_v35  ;;  %2633 = vmatprep.mubr.bf16.mxu0 %v2272_v2  ;;  %v2236_v18 = vmax.f32 %v2155_v3, 0.0 }
 0x3d5   : > { %v1961_v50 = vpop.f32.mrf.mxu0  ;;  %2634 = vmatmul.mubr.bf16.gmra.mxu0 %v2271_v34 }
 0x3d6   : > { %v2159_v12 = vadd.f32 %v6113_v52, %v1958_v49  ;;  %v2237_v11 = vmax.f32 %v2157_v19, 0.0  ;;  %v1962_v45 = vadd.f32 %v1961_v50, %v5934_v37 }
 0x3d7   : > { %v1963_v27 = vpop.f32.mrf.mxu0 }
 0x3d8   : > { %v2238_v22 = vmax.f32 %v2159_v12, 0.0  ;;  %v1964_v23 = vadd.f32 %v1963_v27, %v5931_v35  ;;  %v2273_v13 = vpack.c.bf16 %v2237_v11, %v2235_v10  ;;  %v2163_v25 = vadd.f32 %v6119_v61, %v1962_v45 }
 0x3d9   : > { %v1965_v42 = vpop.f32.mrf.mxu0 }
 0x3da   : > { %v1966_v51 = vadd.f32 %v1965_v42, %v5934_v37  ;;  %v2274_v6 = vpack.c.bf16 %v2238_v22, %v2236_v18  ;;  %v2165_v26 = vadd.f32 %v6122_v63, %v1964_v23  ;;  %v2239_v63 = vmax.f32 %v2163_v25, 0.0 }
 0x3db   : > { %v1967_v47 = vpop.f32.mrf.mxu0 }
 0x3dc   : > { %v2167_v48 = vadd.f32 %v6126_v16, %v1966_v51  ;;  %v1968_v52 = vadd.f32 %v1967_v47, %v5931_v35  ;;  %2643 = vmatprep.mubr.bf16.mxu0 %v2274_v6  ;;  %v2240_v36 = vmax.f32 %v2165_v26, 0.0 }
 0x3dd   : > { %2644 = vmatmul.mubr.bf16.gmra.mxu0 %v2273_v13  ;;  %v1971_v55 = vpop.f32.mrf.mxu0 }
 0x3de   : > { %v2169_v43 = vadd.f32 %v6129_v59, %v1968_v52  ;;  %v1972_v33 = vadd.f32 %v1971_v55, %v5934_v37  ;;  %v2241_v56 = vmax.f32 %v2167_v48, 0.0 }
 0x3df   : > { %v1973_v53 = vpop.f32.mrf.mxu0 }
 0x3e0   : > { %v2242_v44 = vmax.f32 %v2169_v43, 0.0  ;;  %v1974_v54 = vadd.f32 %v1973_v53, %v5931_v35  ;;  %v2173_v16 = vadd.f32 %v6135_v17, %v1972_v33  ;;  %v2275_v8 = vpack.c.bf16 %v2241_v56, %v2239_v63 }
 0x3e1   : > { %v1975_v62 = vpop.f32.mrf.mxu0 }
 0x3e2   : > { %v2276_v39 = vpack.c.bf16 %v2242_v44, %v2240_v36  ;;  %v2175_v61 = vadd.f32 %v6138_v4, %v1974_v54  ;;  %v2243_v37 = vmax.f32 %v2173_v16, 0.0 }
 0x3e3   : > { %v1976_v20 = vpop.f32.mrf.mxu0 }
 0x3e4   : > { %2653 = vmatprep.mubr.bf16.mxu0 %v2276_v39  ;;  %v2244_v59 = vmax.f32 %v2175_v61, 0.0  ;;  %v2277_v58 = vpack.c.bf16 %v2243_v37, %v2243_v37 }
 0x3e5   : > { %2654 = vmatmul.mubr.bf16.gmra.mxu0 %v2275_v8 }
 0x3e6   : > { %v2278_v46 = vpack.c.bf16 %v2244_v59, %v2244_v59 }
 0x3e8   : > { %2663 = vmatprep.mubr.bf16.mxu0 %v2278_v46 }
 0x3ed   : > { %2664 = vmatmul.mubr.bf16.gmra.mxu0 %v2277_v58 }
 0x3ee   : > { %2756 = vmatprep.mubr.bf16.mxu0 %v6169_v5 }
 0x42d   : > { %v2505_v35 = vpop.f32.mrf.mxu0 }
 0x42f   : > { %v6172_v17 = vpop.f32.mrf.mxu0 }
 0x431   : > { %v2509_v38 = vpop.f32.mrf.mxu0 }
 0x432   : > { %v6174_v31 = vpack.c.bf16 %v2509_v38, %v2505_v35 }
 0x433   : > { %v6176_v4 = vpop.f32.mrf.mxu0 }
 0x435   : > { %v2515_v28 = vpop.f32.mrf.mxu0 }
 0x437   : > { %v6178_v1 = vpop.f32.mrf.mxu0 }
 0x439   : > { %v2519_v14 = vpop.f32.mrf.mxu0 }
 0x43a   : > { %v6180_v57 = vpack.c.bf16 %v2519_v14, %v2515_v28 }
 0x43b   : > { %v6182_v60 = vpop.f32.mrf.mxu0 }
 0x43c   : > { %v2675_v38 = vpack.c.bf16 %v6182_v60, %v6178_v1 }
 0x43d   : > { %v6184_v9 = vpop.f32.mrf.mxu0 }
 0x43f   : > { %v2527_v7 = vpop.f32.mrf.mxu0 }
 0x441   : > { %v6186_v24 = vpop.f32.mrf.mxu0 }
 0x442   : > { %v2676_v58 = vpack.c.bf16 %v6186_v24, %v6184_v9 }
 0x443   : > { %v2531_v15 = vpop.f32.mrf.mxu0 }
 0x444   : > { %v2677_v37 = vpack.c.bf16 %v2531_v15, %v2527_v7  ;;  %v2673_v7 = vpack.c.bf16 %v6176_v4, %v6172_v17 }
 0x445   : > { %v2535_v2 = vpop.f32.mrf.mxu0 }
 0x447   : > { %v2537_v34 = vpop.f32.mrf.mxu0 }
 0x449   : > { %v2539_v21 = vpop.f32.mrf.mxu0 }
 0x44a   : > { %v2678_v20 = vpack.c.bf16 %v2539_v21, %v2535_v2 }
 0x44b   : > { %v2541_v3 = vpop.f32.mrf.mxu0 }
 0x44c   : > { %v2679_v39 = vpack.c.bf16 %v2541_v3, %v2537_v34 }
 0x44d   : > { %v2545_v19 = vpop.f32.mrf.mxu0 }
 0x44f   : > { %v2547_v49 = vpop.f32.mrf.mxu0 }
 0x451   : > { %v2549_v32 = vpop.f32.mrf.mxu0 }
 0x452   : > { %v2680_v16 = vpack.c.bf16 %v2549_v32, %v2545_v19 }
 0x453   : > { %v2551_v50 = vpop.f32.mrf.mxu0 }
 0x454   : > { %v2681_v54 = vpack.c.bf16 %v2551_v50, %v2547_v49 }
 0x455   : > { %v2555_v12 = vpop.f32.mrf.mxu0 }
 0x457   : > { %v2557_v11 = vpop.f32.mrf.mxu0 }
 0x459   : > { %v2559_v27 = vpop.f32.mrf.mxu0 }
 0x45a   : > { %v2682_v36 = vpack.c.bf16 %v2559_v27, %v2555_v12 }
 0x45b   : > { %v2561_v18 = vpop.f32.mrf.mxu0 }
 0x45c   : > { %v2683_v33 = vpack.c.bf16 %v2561_v18, %v2557_v11 }
 0x45d   : > { %v2565_v22 = vpop.f32.mrf.mxu0 }
 0x45f   : > { %v2567_v23 = vpop.f32.mrf.mxu0 }
 0x461   : > { %v2569_v10 = vpop.f32.mrf.mxu0 }
 0x462   : > { %v2684_v55 = vpack.c.bf16 %v2569_v10, %v2565_v22 }
 0x463   : > { %v2571_v45 = vpop.f32.mrf.mxu0 }
 0x464   : > { %v2685_v52 = vpack.c.bf16 %v2571_v45, %v2567_v23 }
 0x465   : > { %v2575_v42 = vpop.f32.mrf.mxu0 }
 0x467   : > { %v2577_v51 = vpop.f32.mrf.mxu0 }
 0x469   : > { %v2579_v6 = vpop.f32.mrf.mxu0 }
 0x46a   : > { %v2686_v26 = vpack.c.bf16 %v2579_v6, %v2575_v42 }
 0x46b   : > { %v2581_v13 = vpop.f32.mrf.mxu0 }
 0x46c   : > { %v2687_v47 = vpack.c.bf16 %v2581_v13, %v2577_v51 }
 0x46d   : > { %v2585_v48 = vpop.f32.mrf.mxu0 }
 0x46e   : > { %2724 = vmatprep.subr.bf16.mxu0 %v2687_v47  ;;  %4800 = vmatprep.subr.bf16.mxu1 %v2687_v47 }
 0x46f   : > { %v6188_v25 = vpop.f32.mrf.mxu0  ;;  %2725 = vmatpush1.bf16.msra.mxu0 %v2686_v26  ;;  %4816 = vmatpush1.bf16.msra.mxu1 %v2686_v26 }
 0x470   : > { %2726 = vmatprep.subr.bf16.mxu0 %v2685_v52  ;;  %4801 = vmatprep.subr.bf16.mxu1 %v2685_v52 }
 0x471   : > { %v2589_v43 = vpop.f32.mrf.mxu0 }
 0x472   : > { %v6190_v56 = vpack.c.bf16 %v2589_v43, %v2585_v48 }
 0x473   : > { %v6192_v53 = vpop.f32.mrf.mxu0  ;;  %2727 = vmatpush1.bf16.msra.mxu0 %v2684_v55  ;;  %4817 = vmatpush1.bf16.msra.mxu1 %v2684_v55 }
 0x474   : > { %2728 = vmatprep.subr.bf16.mxu0 %v2683_v33  ;;  %4802 = vmatprep.subr.bf16.mxu1 %v2683_v33 }
 0x475   : > { %v2595_v44 = vpop.f32.mrf.mxu0 }
 0x477   : > { %v6194_v63 = vpop.f32.mrf.mxu0  ;;  %2729 = vmatpush1.bf16.msra.mxu0 %v2682_v36  ;;  %4818 = vmatpush1.bf16.msra.mxu1 %v2682_v36  ;;  %v2689_v36 = vpack.c.bf16 %v6192_v53, %v6188_v25  ;;  %v5127_v25 = vld [vmem:[%s5575_s19] ss:$12 sps:$4 sm:$0xff]   ;;  %v5128_v53 = vld [vmem:[%s5575_s19 + $0x30] ss:$12 sps:$4 sm:$0xff]  }
 0x478   : > { %2730 = vmatprep.subr.bf16.mxu0 %v2681_v54  ;;  %4803 = vmatprep.subr.bf16.mxu1 %v2681_v54 }
 0x479   : > { %v2599_v62 = vpop.f32.mrf.mxu0 }
 0x47a   : > { %v6196_v61 = vpack.c.bf16 %v2599_v62, %v2595_v44  ;;  %v5130_v62 = vld [vmem:[%s5575_s19 + $0x4c] ss:$12 sps:$4 sm:$0xff]  }
 0x47b   : > { %v6198_v8 = vpop.f32.mrf.mxu0  ;;  %2731 = vmatpush1.bf16.msra.mxu0 %v2680_v16  ;;  %4819 = vmatpush1.bf16.msra.mxu1 %v2680_v16  ;;  %v5129_v16 = vld [vmem:[%s5575_s19 + $0x1c] ss:$12 sps:$4 sm:$0xff]  }
 0x47c   : > { %2732 = vmatprep.subr.bf16.mxu0 %v2679_v39  ;;  %4804 = vmatprep.subr.bf16.mxu1 %v2679_v39  ;;  %v2691_v33 = vpack.c.bf16 %v6198_v8, %v6194_v63  ;;  %v5131_v39 = vld [vmem:[%s5575_s19 + $0x18] ss:$12 sps:$4 sm:$0xff]   ;;  %v5134_v8 = vld [vmem:[%s5575_s19 + $0x8] ss:$12 sps:$4 sm:$0xff]  }
 0x47d   : > { %v6200_v59 = vpop.f32.mrf.mxu0 }
 0x47f   : > { %v6202_v46 = vpop.f32.mrf.mxu0  ;;  %2733 = vmatpush1.bf16.msra.mxu0 %v2678_v20  ;;  %4820 = vmatpush1.bf16.msra.mxu1 %v2678_v20  ;;  %v5135_v20 = vld [vmem:[%s5575_s19 + $0x60] ss:$12 sps:$4 sm:$0xff]  }
 0x480   : > { %2734 = vmatprep.subr.bf16.mxu0 %v2677_v37  ;;  %4805 = vmatprep.subr.bf16.mxu1 %v2677_v37  ;;  %v5080_v37 = vld [vmem:[#allocation8 + $0x74] ss:$8 sps:$4 sm:$0xff]  }
 0x481   : > { %v6206_v35 = vpop.f32.mrf.mxu0 }
 0x482   : > { %v2692_v43 = vpack.c.bf16 %v6206_v35, %v6200_v59  ;;  %v5078_v59 = vld [vmem:[#allocation8 + $0x70] ss:$8 sps:$4 sm:$0xff]   ;;  %v5081_v35 = vld [vmem:[#allocation8 + $0x60] ss:$8 sps:$4 sm:$0xff]  }
 0x483   : > { %v6210_v28 = vpop.f32.mrf.mxu0  ;;  %2735 = vmatpush1.bf16.msra.mxu0 %v2676_v58  ;;  %4821 = vmatpush1.bf16.msra.mxu1 %v2676_v58  ;;  %v5083_v58 = vld [vmem:[#allocation8 + $0x64] ss:$8 sps:$4 sm:$0xff]  }
 0x484   : > { %2736 = vmatprep.subr.bf16.mxu0 %v2675_v38  ;;  %4806 = vmatprep.subr.bf16.mxu1 %v2675_v38  ;;  %v2693_v55 = vpack.c.bf16 %v6210_v28, %v6202_v46  ;;  %v5136_v46 = vld [vmem:[%s5575_s19 + $0x7c] ss:$12 sps:$4 sm:$0xff]  }
 0x485   : > { %v2615_v14 = vpop.f32.mrf.mxu0  ;;  %v5086_v38 = vld [vmem:[#allocation8 + $0x54] ss:$8 sps:$4 sm:$0xff]   ;;  %v5084_v28 = vld [vmem:[#allocation8 + $0x50] ss:$8 sps:$4 sm:$0xff]  }
 0x487   : > { %v2617_v15 = vpop.f32.mrf.mxu0  ;;  %2737 = vmatpush1.bf16.msra.mxu0 %v6180_v57  ;;  %4822 = vmatpush1.bf16.msra.mxu1 %v6180_v57 }
 0x488   : > { %2738 = vmatprep.subr.bf16.mxu0 %v2673_v7  ;;  %4807 = vmatprep.subr.bf16.mxu1 %v2673_v7  ;;  %v5138_v7 = vld [vmem:[%s5575_s19 + $0x78] ss:$12 sps:$4 sm:$0xff]  }
 0x489   : > { %v2619_v9 = vpop.f32.mrf.mxu0 }
 0x48a   : > { %v2694_v52 = vpack.c.bf16 %v2619_v9, %v2615_v14  ;;  %v5137_v14 = vld [vmem:[%s5575_s19 + $0x20] ss:$12 sps:$4 sm:$0xff]  }
 0x48b   : > { %v2621_v24 = vpop.f32.mrf.mxu0  ;;  %2739 = vmatpush1.bf16.msra.mxu0 %v6174_v31  ;;  %4823 = vmatpush1.bf16.msra.mxu1 %v6174_v31  ;;  %v5139_v9 = vld [vmem:[%s5575_s19 + $0x94] ss:$12 sps:$4 sm:$0xff]  }
 0x48c   : > { %v2695_v48 = vpack.c.bf16 %v2621_v24, %v2617_v15  ;;  %v5089_v15 = vld [vmem:[#allocation8 + $0x44] ss:$8 sps:$4 sm:$0xff]   ;;  %v5087_v24 = vld [vmem:[#allocation8 + $0x40] ss:$8 sps:$4 sm:$0xff]  }
 0x48d   : > { %v2625_v1 = vpop.f32.mrf.mxu0 }
 0x48f   : > { %v2627_v60 = vpop.f32.mrf.mxu0 }
 0x491   : > { %v2629_v2 = vpop.f32.mrf.mxu0 }
 0x492   : > { %v2696_v26 = vpack.c.bf16 %v2629_v2, %v2625_v1  ;;  %v5092_v1 = vld [vmem:[#allocation8 + $0x34] ss:$8 sps:$4 sm:$0xff]   ;;  %v5140_v2 = vld [vmem:[%s5575_s19 + $0x38] ss:$12 sps:$4 sm:$0xff]  }
 0x493   : > { %v2631_v34 = vpop.f32.mrf.mxu0 }
 0x494   : > { %v2697_v47 = vpack.c.bf16 %v2631_v34, %v2627_v60  ;;  %v5090_v60 = vld [vmem:[#allocation8 + $0x30] ss:$8 sps:$4 sm:$0xff]  }
 0x495   : > { %v2635_v21 = vpop.f32.mrf.mxu0  ;;  %v5141_v34 = vld [vmem:[%s5575_s19 + $0x90] ss:$12 sps:$4 sm:$0xff]  }
 0x497   : > { %v2637_v3 = vpop.f32.mrf.mxu0 }
 0x499   : > { %v2639_v17 = vpop.f32.mrf.mxu0 }
 0x49a   : > { %v2698_v13 = vpack.c.bf16 %v2639_v17, %v2635_v21  ;;  %v5095_v21 = vld [vmem:[#allocation8 + $0x24] ss:$8 sps:$4 sm:$0xff]   ;;  %v5093_v17 = vld [vmem:[#allocation8 + $0x20] ss:$8 sps:$4 sm:$0xff]  }
 0x49b   : > { %v2641_v4 = vpop.f32.mrf.mxu0 }
 0x49c   : > { %v2699_v51 = vpack.c.bf16 %v2641_v4, %v2637_v3  ;;  %v5142_v3 = vld [vmem:[%s5575_s19 + $0xac] ss:$12 sps:$4 sm:$0xff]  }
 0x49d   : > { %v2645_v19 = vpop.f32.mrf.mxu0  ;;  %v5098_v4 = vld [vmem:[#allocation8 + $0x14] ss:$8 sps:$4 sm:$0xff]  }
 0x49f   : > { %v2647_v49 = vpop.f32.mrf.mxu0 }
 0x4a1   : > { %v2649_v32 = vpop.f32.mrf.mxu0 }
 0x4a2   : > { %v2700_v45 = vpack.c.bf16 %v2649_v32, %v2645_v19  ;;  %v5096_v19 = vld [vmem:[#allocation8 + $0x10] ss:$8 sps:$4 sm:$0xff]  }
 0x4a3   : > { %v2651_v57 = vpop.f32.mrf.mxu0  ;;  %v5144_v32 = vld [vmem:[%s5575_s19 + $0xa8] ss:$12 sps:$4 sm:$0xff]  }
 0x4a4   : > { %v2701_v31 = vpack.c.bf16 %v2651_v57, %v2647_v49  ;;  %v5143_v49 = vld [vmem:[%s5575_s19 + $0x50] ss:$12 sps:$4 sm:$0xff]  }
 0x4a5   : > { %v2655_v50 = vpop.f32.mrf.mxu0  ;;  %v5101_v57 = vld [vmem:[#allocation8 + $0x4] ss:$8 sps:$4 sm:$0xff]  }
 0x4a7   : > { %v2657_v12 = vpop.f32.mrf.mxu0 }
 0x4a9   : > { %v2659_v11 = vpop.f32.mrf.mxu0 }
 0x4aa   : > { %v2702_v22 = vpack.c.bf16 %v2659_v11, %v2655_v50  ;;  %v5145_v50 = vld [vmem:[%s5575_s19 + $0xc4] ss:$12 sps:$4 sm:$0xff]   ;;  %v5104_v11 = vld [vmem:[#allocation8 + $0xf4] ss:$8 sps:$4 sm:$0xff]  }
 0x4ab   : > { %v2661_v27 = vpop.f32.mrf.mxu0 }
 0x4ac   : > { %v2703_v18 = vpack.c.bf16 %v2661_v27, %v2657_v12  ;;  %v5099_v12 = vld [vmem:[#allocation8] ss:$8 sps:$4 sm:$0xff]   ;;  %v5102_v27 = vld [vmem:[#allocation8 + $0xf0] ss:$8 sps:$4 sm:$0xff]  }
 0x4ad   : > { %v2665_v23 = vpop.f32.mrf.mxu0 }
 0x4ae   : > { %2740 = vmatprep.subr.bf16.mxu0 %v2703_v18  ;;  %4808 = vmatprep.subr.bf16.mxu1 %v2703_v18  ;;  %v2704_v44 = vpack.c.bf16 %v2665_v23, %v2665_v23  ;;  %v5146_v18 = vld [vmem:[%s5575_s19 + $0x68] ss:$12 sps:$4 sm:$0xff]  }
 0x4af   : > { %2741 = vmatpush2.bf16.msra.mxu0 %v2702_v22  ;;  %4824 = vmatpush2.bf16.msra.mxu1 %v2702_v22  ;;  %v2667_v10 = vpop.f32.mrf.mxu0  ;;  %v5147_v22 = vld [vmem:[%s5575_s19 + $0xc0] ss:$12 sps:$4 sm:$0xff]   ;;  %v5148_v23 = vld [vmem:[%s5575_s19 + $0xdc] ss:$12 sps:$4 sm:$0xff]  }
 0x4b0   : > { %2742 = vmatprep.subr.bf16.mxu0 %v2701_v31  ;;  %4809 = vmatprep.subr.bf16.mxu1 %v2701_v31  ;;  %v2705_v54 = vpack.c.bf16 %v2667_v10, %v2667_v10  ;;  %v2719_v63 = vsel %vm719_vm0, %v2704_v44, 0  ;;  %v5149_v31 = vld [vmem:[%s5575_s19 + $0x80] ss:$12 sps:$4 sm:$0xff]   ;;  %v5150_v10 = vld [vmem:[%s5575_s19 + $0xd8] ss:$12 sps:$4 sm:$0xff]  }
 0x4b1   : > { %v2669_v42 = vpop.f32.mrf.mxu0  ;;  %v5116_v44 = vld [vmem:[#allocation8 + $0xb4] ss:$8 sps:$4 sm:$0xff]  }
 0x4b2   : > { %v5152_v42 = vld [vmem:[%s5575_s19 + $0x98] ss:$12 sps:$4 sm:$0xff]  }
 0x4b3   : > { %2743 = vmatpush2.bf16.msra.mxu0 %v2700_v45  ;;  %4825 = vmatpush2.bf16.msra.mxu1 %v2700_v45  ;;  %v2670_v6 = vpop.f32.mrf.mxu0  ;;  %v5151_v45 = vld [vmem:[%s5575_s19 + $0xf4] ss:$12 sps:$4 sm:$0xff]  }
 0x4b4   : > { %2744 = vmatprep.subr.bf16.mxu0 %v2699_v51  ;;  %4810 = vmatprep.subr.bf16.mxu1 %v2699_v51  ;;  %v5153_v51 = vld [vmem:[%s5575_s19 + $0xf0] ss:$12 sps:$4 sm:$0xff]  }
 0x4b5   : > { %v5107_v6 = vld [vmem:[#allocation8 + $0xe4] ss:$8 sps:$4 sm:$0xff]  }
 0x4b7   : > { %2745 = vmatpush2.bf16.msra.mxu0 %v2698_v13  ;;  %4826 = vmatpush2.bf16.msra.mxu1 %v2698_v13  ;;  %v5154_v13 = vld [vmem:[%s5575_s19 + $0x10c] ss:$12 sps:$4 sm:$0xff]  }
 0x4b8   : > { %2746 = vmatprep.subr.bf16.mxu0 %v2697_v47  ;;  %4811 = vmatprep.subr.bf16.mxu1 %v2697_v47  ;;  %v5105_v47 = vld [vmem:[#allocation8 + $0xe0] ss:$8 sps:$4 sm:$0xff]  }
 0x4bb   : > { %2747 = vmatpush2.bf16.msra.mxu0 %v2696_v26  ;;  %4827 = vmatpush2.bf16.msra.mxu1 %v2696_v26  ;;  %v5110_v26 = vld [vmem:[#allocation8 + $0xd4] ss:$8 sps:$4 sm:$0xff]  }
 0x4bc   : > { %2748 = vmatprep.subr.bf16.mxu0 %v2695_v48  ;;  %4812 = vmatprep.subr.bf16.mxu1 %v2695_v48  ;;  %v5108_v48 = vld [vmem:[#allocation8 + $0xd0] ss:$8 sps:$4 sm:$0xff]  }
 0x4bf   : > { %2749 = vmatpush2.bf16.msra.mxu0 %v2694_v52  ;;  %4828 = vmatpush2.bf16.msra.mxu1 %v2694_v52  ;;  %v5155_v52 = vld [vmem:[%s5575_s19 + $0xb0] ss:$12 sps:$4 sm:$0xff]  }
 0x4c0   : > { %2750 = vmatprep.subr.bf16.mxu0 %v2693_v55  ;;  %4813 = vmatprep.subr.bf16.mxu1 %v2693_v55  ;;  %v5156_v55 = vld [vmem:[%s5575_s19 + $0x108] ss:$12 sps:$4 sm:$0xff]  }
 0x4c3   : > { %2751 = vmatpush2.bf16.msra.mxu0 %v2692_v43  ;;  %4829 = vmatpush2.bf16.msra.mxu1 %v2692_v43  ;;  %v5113_v43 = vld [vmem:[#allocation8 + $0xc4] ss:$8 sps:$4 sm:$0xff]  }
 0x4c4   : > { %2752 = vmatprep.subr.bf16.mxu0 %v2691_v33  ;;  %4814 = vmatprep.subr.bf16.mxu1 %v2691_v33  ;;  %v5157_v33 = vld [vmem:[%s5575_s19 + $0x124] ss:$12 sps:$4 sm:$0xff]  }
 0x4c7   : > { %2753 = vmatpush2.bf16.msra.mxu0 %v6196_v61  ;;  %4830 = vmatpush2.bf16.msra.mxu1 %v6196_v61  ;;  %v5133_v61 = vld [vmem:[%s5575_s19 + $0x64] ss:$12 sps:$4 sm:$0xff]  }
 0x4c8   : > { %2754 = vmatprep.subr.bf16.mxu0 %v2689_v36  ;;  %4815 = vmatprep.subr.bf16.mxu1 %v2689_v36  ;;  %v5111_v36 = vld [vmem:[#allocation8 + $0xc0] ss:$8 sps:$4 sm:$0xff]  }
 0x4cb   : > { %2755 = vmatpush2.bf16.msra.mxu0 %v6190_v56  ;;  %4831 = vmatpush2.bf16.msra.mxu1 %v6190_v56  ;;  %v5132_v56 = vld [vmem:[%s5575_s19 + $0x48] ss:$12 sps:$4 sm:$0xff]  }
 0x4cc   : > { %4727 = vmatprep.subr.msk.bf16.mxu0 %vm719_vm0, %v2705_v54  ;;  %3418 = vmatprep.subr.bf16.mxu1 %v5080_v37  ;;  %v5114_v54 = vld [vmem:[#allocation8 + $0xb0] ss:$8 sps:$4 sm:$0xff]   ;;  %v5123_v37 = vld [vmem:[#allocation8 + $0x80] ss:$8 sps:$4 sm:$0xff]  }
 0x4ce   : > { %2757 = vmatmul.mubr.bf16.vlgmr.msra.gmra.mxu0 %v5127_v25  ;;  %2777 = vmatmul.mubr.bf16.vlgmr.msra.gmra.mxu1 %v5128_v53  ;;  %v5159_v25 = vld [vmem:[%s5575_s19 + $0x120] ss:$12 sps:$4 sm:$0xff]   ;;  %v5119_v53 = vld [vmem:[#allocation8 + $0xa4] ss:$8 sps:$4 sm:$0xff]  }
 0x4cf   : > { %2766 = vmatprep.mubr.bf16.mxu0 %v5129_v16  ;;  %2940 = vmatpush1.bf16.msra.mxu0 %v2719_v63  ;;  %v5158_v63 = vld [vmem:[%s5575_s19 + $0xc8] ss:$12 sps:$4 sm:$0xff]  }
 0x4d0   : > { %2786 = vmatprep.mubr.bf16.mxu1 %v5130_v62  ;;  %3419 = vmatpush1.bf16.msra.mxu1 %v5078_v59  ;;  %v5160_v16 = vld [vmem:[%s5575_s19 + $0x13c] ss:$12 sps:$4 sm:$0xff]   ;;  %v5117_v62 = vld [vmem:[#allocation8 + $0xa0] ss:$8 sps:$4 sm:$0xff]  }
 0x4d1   : > { %3420 = vmatprep.subr.bf16.mxu1 %v5083_v58  ;;  %v5163_v59 = vld [vmem:[%s5575_s19 + $0x154] ss:$12 sps:$4 sm:$0xff]   ;;  %v5165_v58 = vld [vmem:[%s5575_s19 + $0x150] ss:$12 sps:$4 sm:$0xff]  }
 0x4d4   : > { %3421 = vmatpush1.bf16.msra.mxu1 %v5081_v35  ;;  %v5166_v35 = vld [vmem:[%s5575_s19 + $0x16c] ss:$12 sps:$4 sm:$0xff]  }
 0x4d5   : > { %3422 = vmatprep.subr.bf16.mxu1 %v5086_v38  ;;  %v5167_v38 = vld [vmem:[%s5575_s19 + $0x110] ss:$12 sps:$4 sm:$0xff]  }
 0x4d6   : > { %2767 = vmatmul.mubr.bf16.gmra.mxu0 %v5131_v39  ;;  %2787 = vmatmul.mubr.bf16.gmra.mxu1 %v5132_v56  ;;  %v5122_v39 = vld [vmem:[#allocation8 + $0x94] ss:$8 sps:$4 sm:$0xff]   ;;  %v5120_v56 = vld [vmem:[#allocation8 + $0x90] ss:$8 sps:$4 sm:$0xff]  }
 0x4d7   : > { %2957 = vmatprep.mubr.bf16.mxu0 %v5380_v0  ;;  %2796 = vmatprep.mubr.bf16.mxu1 %v5133_v61  ;;  %v5161_v61 = vld [vmem:[%s5575_s19 + $0xe0] ss:$12 sps:$4 sm:$0xff]  }
 0x4d8   : > { %3423 = vmatpush1.bf16.msra.mxu1 %v5084_v28  ;;  %v5168_v28 = vld [vmem:[%s5575_s19 + $0x168] ss:$12 sps:$4 sm:$0xff]  }
 0x4d9   : > { %3424 = vmatprep.subr.bf16.mxu1 %v5089_v15  ;;  %v5171_v15 = vld [vmem:[%s5575_s19 + $0x158] ss:$12 sps:$4 sm:$0xff]  }
 0x4dc   : > { %3425 = vmatpush1.bf16.msra.mxu1 %v5087_v24  ;;  %v5173_v24 = vld [vmem:[%s5575_s19 + $0x188] ss:$0 sps:$4 sm:$0xff]  }
 0x4dd   : > { %3426 = vmatprep.subr.bf16.mxu1 %v5092_v1 }
 0x4de   : > { %4728 = vmatmul.mubr.msk.bf16.vlgmr.msra.gmra.mxu0 %vm1719_vm3, %v5134_v8  ;;  %2797 = vmatmul.mubr.bf16.gmra.mxu1 %v5135_v20  ;;  %v5162_v8 = vld [vmem:[%s5575_s19 + $0x138] ss:$12 sps:$4 sm:$0xff]  }
 0x4df   : > { %2967 = vmatprep.mubr.bf16.mxu0 %v5380_v0  ;;  %2806 = vmatprep.mubr.bf16.mxu1 %v5136_v46  ;;  %v5125_v20 = vld [vmem:[#allocation8 + $0x84] ss:$8 sps:$4 sm:$0xff]  }
 0x4e0   : > { %3427 = vmatpush1.bf16.msra.mxu1 %v5090_v60  ;;  %v5164_v46 = vld [vmem:[%s5575_s19 + $0xf8] ss:$12 sps:$4 sm:$0xff]  }
 0x4e1   : > { %3428 = vmatprep.subr.bf16.mxu1 %v5095_v21 }
 0x4e4   : > { %3429 = vmatpush1.bf16.msra.mxu1 %v5093_v17 }
 0x4e5   : > { %3430 = vmatprep.subr.bf16.mxu1 %v5098_v4 }
 0x4e6   : > { %4729 = vmatmul.mubr.msk.bf16.gmra.mxu0 %vm1719_vm3, %v5137_v14  ;;  %2807 = vmatmul.mubr.bf16.gmra.mxu1 %v5138_v7  ;;  %v5169_v14 = vld [vmem:[%s5575_s19 + $0x128] ss:$12 sps:$4 sm:$0xff]   ;;  %v5170_v7 = vld [vmem:[%s5575_s19 + $0x140] ss:$12 sps:$4 sm:$0xff]  }
 0x4e7   : > { %2977 = vmatprep.mubr.bf16.mxu0 %v5380_v0  ;;  %2816 = vmatprep.mubr.bf16.mxu1 %v5139_v9  ;;  %v5172_v9 = vld [vmem:[%s5575_s19 + $0x170] ss:$12 sps:$4 sm:$0xff]  }
 0x4e8   : > { %3431 = vmatpush1.bf16.msra.mxu1 %v5096_v19 }
 0x4e9   : > { %3432 = vmatprep.subr.bf16.mxu1 %v5101_v57 }
 0x4ec   : > { %3433 = vmatpush1.bf16.msra.mxu1 %v5099_v12  ;;  %v2706_v12 = vld [vmem:[%s7322_s7] sm:$0x3] }
 0x4ed   : > { %3434 = vmatprep.subr.bf16.mxu1 %v5104_v11 }
 0x4ee   : > { %4730 = vmatmul.mubr.msk.bf16.gmra.mxu0 %vm1719_vm3, %v5140_v2  ;;  %2817 = vmatmul.mubr.bf16.gmra.mxu1 %v5141_v34 }
 0x4ef   : > { %2987 = vmatprep.mubr.bf16.mxu0 %v5380_v0  ;;  %2826 = vmatprep.mubr.bf16.mxu1 %v5142_v3 }
 0x4f0   : > { %3435 = vmatpush2.bf16.msra.mxu1 %v5102_v27 }
 0x4f1   : > { %3436 = vmatprep.subr.bf16.mxu1 %v5107_v6 }
 0x4f4   : > { %3437 = vmatpush2.bf16.msra.mxu1 %v5105_v47 }
 0x4f5   : > { %3438 = vmatprep.subr.bf16.mxu1 %v5110_v26 }
 0x4f6   : > { %4731 = vmatmul.mubr.msk.bf16.gmra.mxu0 %vm1719_vm3, %v5143_v49  ;;  %2827 = vmatmul.mubr.bf16.gmra.mxu1 %v5144_v32 }
 0x4f7   : > { %2997 = vmatprep.mubr.bf16.mxu0 %v5380_v0  ;;  %2836 = vmatprep.mubr.bf16.mxu1 %v5145_v50 }
 0x4f8   : > { %3439 = vmatpush2.bf16.msra.mxu1 %v5108_v48 }
 0x4f9   : > { %3440 = vmatprep.subr.bf16.mxu1 %v5113_v43 }
 0x4fc   : > { %3441 = vmatpush2.bf16.msra.mxu1 %v5111_v36 }
 0x4fd   : > { %3442 = vmatprep.subr.bf16.mxu1 %v5116_v44 }
 0x4fe   : > { %4732 = vmatmul.mubr.msk.bf16.gmra.mxu0 %vm1719_vm3, %v5146_v18  ;;  %2837 = vmatmul.mubr.bf16.gmra.mxu1 %v5147_v22  ;;  %v6336_v18 = vrot.slane %v2706_v12, %v5669_v29  ;;  %v6339_v22 = vrot.slane %v2706_v12, %v5671_v30 }
 0x4ff   : > { %3007 = vmatprep.mubr.bf16.mxu0 %v5380_v0  ;;  %2846 = vmatprep.mubr.bf16.mxu1 %v5148_v23 }
 0x500   : > { %3443 = vmatpush2.bf16.msra.mxu1 %v5114_v54 }
 0x501   : > { %3444 = vmatprep.subr.bf16.mxu1 %v5119_v53 }
 0x504   : > { %3445 = vmatpush2.bf16.msra.mxu1 %v5117_v62 }
 0x505   : > { %3446 = vmatprep.subr.bf16.mxu1 %v5122_v39 }
 0x506   : > { %4733 = vmatmul.mubr.msk.bf16.gmra.mxu0 %vm1719_vm3, %v5149_v31  ;;  %2847 = vmatmul.mubr.bf16.gmra.mxu1 %v5150_v10 }
 0x507   : > { %3017 = vmatprep.mubr.bf16.mxu0 %v5380_v0  ;;  %2856 = vmatprep.mubr.bf16.mxu1 %v5151_v45 }
 0x508   : > { %3447 = vmatpush2.bf16.msra.mxu1 %v5120_v56 }
 0x509   : > { %3448 = vmatprep.subr.bf16.mxu1 %v5125_v20 }
 0x50c   : > { %3449 = vmatpush2.bf16.msra.mxu1 %v5123_v37 }
 0x50e   : > { %4734 = vmatmul.mubr.msk.bf16.gmra.mxu0 %vm1719_vm3, %v5152_v42  ;;  %2857 = vmatmul.mubr.bf16.gmra.mxu1 %v5153_v51 }
 0x50f   : > { %3027 = vmatprep.mubr.bf16.mxu0 %v5380_v0  ;;  %2866 = vmatprep.mubr.bf16.mxu1 %v5154_v13 }
 0x516   : > { %4735 = vmatmul.mubr.msk.bf16.gmra.mxu0 %vm1719_vm3, %v5155_v52  ;;  %2867 = vmatmul.mubr.bf16.gmra.mxu1 %v5156_v55 }
 0x517   : > { %3037 = vmatprep.mubr.bf16.mxu0 %v5380_v0  ;;  %2876 = vmatprep.mubr.bf16.mxu1 %v5157_v33 }
 0x51e   : > { %4736 = vmatmul.mubr.msk.bf16.gmra.mxu0 %vm1719_vm3, %v5158_v63  ;;  %2877 = vmatmul.mubr.bf16.gmra.mxu1 %v5159_v25 }
 0x51f   : > { %3047 = vmatprep.mubr.bf16.mxu0 %v5380_v0  ;;  %2886 = vmatprep.mubr.bf16.mxu1 %v5160_v16 }
 0x526   : > { %4737 = vmatmul.mubr.msk.bf16.gmra.mxu0 %vm1719_vm3, %v5161_v61  ;;  %2887 = vmatmul.mubr.bf16.gmra.mxu1 %v5162_v8 }
 0x527   : > { %3057 = vmatprep.mubr.bf16.mxu0 %v5380_v0  ;;  %2896 = vmatprep.mubr.bf16.mxu1 %v5163_v59 }
 0x52e   : > { %4738 = vmatmul.mubr.msk.bf16.gmra.mxu0 %vm1719_vm3, %v5164_v46  ;;  %2897 = vmatmul.mubr.bf16.gmra.mxu1 %v5165_v58 }
 0x52f   : > { %3067 = vmatprep.mubr.bf16.mxu0 %v5380_v0  ;;  %2906 = vmatprep.mubr.bf16.mxu1 %v5166_v35 }
 0x536   : > { %4739 = vmatmul.mubr.msk.bf16.gmra.mxu0 %vm1719_vm3, %v5167_v38  ;;  %2907 = vmatmul.mubr.bf16.gmra.mxu1 %v5168_v28 }
 0x537   : > { %3077 = vmatprep.mubr.bf16.mxu0 %v5380_v0  ;;  %2916 = vmatprep.mubr.bf16.mxu1 %v5913_v41 }
 0x53e   : > { %4740 = vmatmul.mubr.msk.bf16.gmra.mxu0 %vm1719_vm3, %v5169_v14  ;;  %2917 = vmatmul.mubr.bf16.gmra.mxu1 %v5916_v40 }
 0x53f   : > { %3087 = vmatprep.mubr.bf16.mxu0 %v5380_v0 }
 0x546   : > { %4741 = vmatmul.mubr.msk.bf16.gmra.mxu0 %vm1719_vm3, %v5170_v7 }
 0x547   : > { %3097 = vmatprep.mubr.bf16.mxu0 %v5380_v0 }
 0x54e   : > { %4742 = vmatmul.mubr.msk.bf16.gmra.mxu0 %vm1719_vm3, %v5171_v15 }
 0x54f   : > { %3107 = vmatprep.mubr.bf16.mxu0 %v5380_v0 }
 0x556   : > { %4743 = vmatmul.mubr.msk.bf16.gmra.mxu0 %vm1719_vm3, %v5172_v9 }
 0x557   : > { %3117 = vmatprep.mubr.bf16.mxu0 %v5380_v0 }
 0x55e   : > { %4744 = vmatmul.mubr.msk.bf16.gmra.mxu0 %vm1719_vm3, %v5173_v24 }
 0x55f   : > { %3703 = vmatprep.mubr.bf16.mxu0 %v6169_v5 }
 0x58e   : > { %v2758_v1 = vpop.f32.mrf.mxu0  ;;  %v6316_v60 = vpop.f32.mrf.mxu1 }
 0x58f   : > { %v2759_v6 = vadd.f32 %v2758_v1, %v6339_v22 }
 0x590   : > { %v2760_v2 = vpop.f32.mrf.mxu0  ;;  %v6318_v34 = vpop.f32.mrf.mxu1 }
 0x591   : > { %v2761_v42 = vadd.f32 %v2760_v2, %v6336_v18  ;;  %v2781_v12 = vadd.f32 %v6318_v34, %v6336_v18 }
 0x592   : > { %v2762_v21 = vpop.f32.mrf.mxu0  ;;  %v6320_v3 = vpop.f32.mrf.mxu1 }
 0x593   : > { %v2763_v51 = vadd.f32 %v2762_v21, %v6339_v22 }
 0x594   : > { %v2764_v17 = vpop.f32.mrf.mxu0  ;;  %v6322_v4 = vpop.f32.mrf.mxu1 }
 0x595   : > { %v2765_v26 = vadd.f32 %v2764_v17, %v6336_v18  ;;  %v2779_v17 = vadd.f32 %v6316_v60, %v6339_v22 }
 0x596   : > { %v2768_v19 = vpop.f32.mrf.mxu0  ;;  %v6324_v49 = vpop.f32.mrf.mxu1 }
 0x597   : > { %v2769_v20 = vadd.f32 %v2768_v19, %v6339_v22 }
 0x598   : > { %v2770_v32 = vpop.f32.mrf.mxu0  ;;  %v6326_v57 = vpop.f32.mrf.mxu1 }
 0x599   : > { %v2771_v56 = vadd.f32 %v2770_v32, %v6336_v18 }
 0x59a   : > { %v2772_v50 = vpop.f32.mrf.mxu0  ;;  %v6328_v5 = vpop.f32.mrf.mxu1 }
 0x59b   : > { %v2773_v61 = vadd.f32 %v2772_v50, %v6339_v22 }
 0x59c   : > { %v2774_v11 = vpop.f32.mrf.mxu0  ;;  %v6333_v27 = vpop.f32.mrf.mxu1 }
 0x59d   : > { %v2775_v58 = vadd.f32 %v2774_v11, %v6336_v18  ;;  %v2783_v11 = vadd.f32 %v6320_v3, %v6339_v22 }
 0x59e   : > { %v2959_v23 = vpop.f32.mrf.mxu0  ;;  %v6341_v31 = vpop.f32.mrf.mxu1 }
 0x59f   : > { %v2960_v55 = vadd.f32 %v2959_v23, %v2759_v6  ;;  %v2785_v6 = vadd.f32 %v6322_v4, %v6336_v18 }
 0x5a0   : > { %v2961_v10 = vpop.f32.mrf.mxu0  ;;  %v6343_v45 = vpop.f32.mrf.mxu1 }
 0x5a1   : > { %v2962_v48 = vadd.f32 %v2961_v10, %v2761_v42  ;;  %v3126_v16 = vmax.f32 %v2960_v55, 0.0 }
 0x5a2   : > { %v2963_v13 = vpop.f32.mrf.mxu0  ;;  %v6348_v47 = vpop.f32.mrf.mxu1 }
 0x5a3   : > { %v2964_v52 = vadd.f32 %v2963_v13, %v2763_v51  ;;  %v3127_v25 = vmax.f32 %v2962_v48, 0.0 }
 0x5a4   : > { %v2965_v43 = vpop.f32.mrf.mxu0  ;;  %v6351_v33 = vpop.f32.mrf.mxu1 }
 0x5a5   : > { %v2966_v36 = vadd.f32 %v2965_v43, %v2765_v26  ;;  %v3128_v44 = vmax.f32 %v2964_v52, 0.0 }
 0x5a6   : > { %v2969_v54 = vpop.f32.mrf.mxu0  ;;  %v6353_v63 = vpop.f32.mrf.mxu1 }
 0x5a7   : > { %v3129_v53 = vmax.f32 %v2966_v36, 0.0  ;;  %v3192_v59 = vpack.c.bf16 %v3128_v44, %v3126_v16  ;;  %v2970_v28 = vadd.f32 %v2969_v54, %v2769_v20  ;;  %v2789_v54 = vadd.f32 %v6324_v49, %v6339_v22 }
 0x5a8   : > { %v2971_v62 = vpop.f32.mrf.mxu0  ;;  %v6355_v39 = vpop.f32.mrf.mxu1  ;;  %v2791_v16 = vadd.f32 %v6326_v57, %v6336_v18 }
 0x5a9   : > { %v3193_v8 = vpack.c.bf16 %v3129_v53, %v3127_v25  ;;  %v2972_v35 = vadd.f32 %v2971_v62, %v2771_v56  ;;  %v3130_v19 = vmax.f32 %v2970_v28, 0.0  ;;  %v2793_v62 = vadd.f32 %v6328_v5, %v6339_v22 }
 0x5aa   : > { %v2973_v37 = vpop.f32.mrf.mxu0  ;;  %v6360_v46 = vpop.f32.mrf.mxu1 }
 0x5ab   : > { %v2974_v38 = vadd.f32 %v2973_v37, %v2773_v61  ;;  %3450 = vmatprep.mubr.bf16.mxu1 %v3193_v8  ;;  %v3131_v2 = vmax.f32 %v2972_v35, 0.0 }
 0x5ac   : > { %v2975_v14 = vpop.f32.mrf.mxu0  ;;  %3451 = vmatmul.mubr.bf16.vlgmr.msra.gmra.mxu1 %v3192_v59  ;;  %v6363_v7 = vpop.f32.mrf.mxu1  ;;  %v2795_v59 = vadd.f32 %v6333_v27, %v6336_v18 }
 0x5ad   : > { %v2976_v15 = vadd.f32 %v2975_v14, %v2775_v58  ;;  %v3132_v9 = vmax.f32 %v2974_v38, 0.0 }
 0x5ae   : > { %v2979_v24 = vpop.f32.mrf.mxu0  ;;  %v6365_v1 = vpop.f32.mrf.mxu1 }
 0x5af   : > { %v3133_v21 = vmax.f32 %v2976_v15, 0.0  ;;  %v3194_v10 = vpack.c.bf16 %v3132_v9, %v3130_v19  ;;  %v2980_v26 = vadd.f32 %v2979_v24, %v2779_v17  ;;  %v2799_v24 = vadd.f32 %v6341_v31, %v6339_v22 }
 0x5b0   : > { %v2981_v32 = vpop.f32.mrf.mxu0  ;;  %v6369_v50 = vpop.f32.mrf.mxu1  ;;  %v2801_v17 = vadd.f32 %v6343_v45, %v6336_v18  ;;  %v2803_v19 = vadd.f32 %v6348_v47, %v6339_v22 }
 0x5b1   : > { %v3195_v23 = vpack.c.bf16 %v3133_v21, %v3131_v2  ;;  %v2982_v13 = vadd.f32 %v2981_v32, %v2781_v12  ;;  %v3134_v25 = vmax.f32 %v2980_v26, 0.0 }
 0x5b2   : > { %v2983_v42 = vpop.f32.mrf.mxu0  ;;  %v6375_v51 = vpop.f32.mrf.mxu1 }
 0x5b3   : > { %v2984_v60 = vadd.f32 %v2983_v42, %v2783_v11  ;;  %3460 = vmatprep.mubr.bf16.mxu1 %v3195_v23  ;;  %v3135_v36 = vmax.f32 %v2982_v13, 0.0 }
 0x5b4   : > { %v2985_v48 = vpop.f32.mrf.mxu0  ;;  %3461 = vmatmul.mubr.bf16.gmra.mxu1 %v3194_v10  ;;  %v6379_v52 = vpop.f32.mrf.mxu1  ;;  %v2805_v10 = vadd.f32 %v6351_v33, %v6336_v18 }
 0x5b5   : > { %v2986_v34 = vadd.f32 %v2985_v48, %v2785_v6  ;;  %v3136_v55 = vmax.f32 %v2984_v60, 0.0 }
 0x5b6   : > { %v2989_v43 = vpop.f32.mrf.mxu0  ;;  %v6381_v3 = vpop.f32.mrf.mxu1 }
 0x5b7   : > { %v3137_v44 = vmax.f32 %v2986_v34, 0.0  ;;  %v3196_v61 = vpack.c.bf16 %v3136_v55, %v3134_v25  ;;  %v2990_v58 = vadd.f32 %v2989_v43, %v2789_v54  ;;  %v2809_v43 = vadd.f32 %v6353_v63, %v6339_v22 }
 0x5b8   : > { %v2991_v4 = vpop.f32.mrf.mxu0  ;;  %v6385_v53 = vpop.f32.mrf.mxu1  ;;  %v2811_v54 = vadd.f32 %v6355_v39, %v6336_v18  ;;  %v2813_v25 = vadd.f32 %v6360_v46, %v6339_v22 }
 0x5b9   : > { %v3197_v56 = vpack.c.bf16 %v3137_v44, %v3135_v36  ;;  %v2992_v37 = vadd.f32 %v2991_v4, %v2791_v16  ;;  %v3138_v2 = vmax.f32 %v2990_v58, 0.0 }
 0x5ba   : > { %v2993_v8 = vpop.f32.mrf.mxu0  ;;  %v6391_v20 = vpop.f32.mrf.mxu1 }
 0x5bb   : > { %v2994_v49 = vadd.f32 %v2993_v8, %v2793_v62  ;;  %3470 = vmatprep.mubr.bf16.mxu1 %v3197_v56  ;;  %v3139_v15 = vmax.f32 %v2992_v37, 0.0 }
 0x5bc   : > { %v2995_v35 = vpop.f32.mrf.mxu0  ;;  %3471 = vmatmul.mubr.bf16.gmra.mxu1 %v3196_v61  ;;  %v6395_v38 = vpop.f32.mrf.mxu1  ;;  %v2815_v61 = vadd.f32 %v6363_v7, %v6336_v18 }
 0x5bd   : > { %v2996_v57 = vadd.f32 %v2995_v35, %v2795_v59  ;;  %v3140_v28 = vmax.f32 %v2994_v49, 0.0 }
 0x5be   : > { %v2999_v14 = vpop.f32.mrf.mxu0  ;;  %v6397_v5 = vpop.f32.mrf.mxu1 }
 0x5bf   : > { %v3141_v9 = vmax.f32 %v2996_v57, 0.0  ;;  %v3198_v12 = vpack.c.bf16 %v3140_v28, %v3138_v2  ;;  %v3000_v6 = vadd.f32 %v2999_v14, %v2799_v24  ;;  %v2819_v14 = vadd.f32 %v6365_v1, %v6339_v22 }
 0x5c0   : > { %v3001_v27 = vpop.f32.mrf.mxu0  ;;  %v6401_v21 = vpop.f32.mrf.mxu1  ;;  %v2821_v24 = vadd.f32 %v6369_v50, %v6336_v18  ;;  %v2823_v2 = vadd.f32 %v6375_v51, %v6339_v22 }
 0x5c1   : > { %v3199_v32 = vpack.c.bf16 %v3141_v9, %v3139_v15  ;;  %v3002_v42 = vadd.f32 %v3001_v27, %v2801_v17  ;;  %v3142_v36 = vmax.f32 %v3000_v6, 0.0 }
 0x5c2   : > { %v3003_v11 = vpop.f32.mrf.mxu0  ;;  %v6407_v23 = vpop.f32.mrf.mxu1 }
 0x5c3   : > { %v3004_v31 = vadd.f32 %v3003_v11, %v2803_v19  ;;  %3480 = vmatprep.mubr.bf16.mxu1 %v3199_v32  ;;  %v3143_v34 = vmax.f32 %v3002_v42, 0.0 }
 0x5c4   : > { %v3005_v13 = vpop.f32.mrf.mxu0  ;;  %3481 = vmatmul.mubr.bf16.gmra.mxu1 %v3198_v12  ;;  %v6411_v60 = vpop.f32.mrf.mxu1  ;;  %v2825_v12 = vadd.f32 %v6379_v52, %v6336_v18 }
 0x5c5   : > { %v3006_v45 = vadd.f32 %v3005_v13, %v2805_v10  ;;  %v3144_v26 = vmax.f32 %v3004_v31, 0.0 }
 0x5c6   : > { %v3009_v48 = vpop.f32.mrf.mxu0  ;;  %v6413_v47 = vpop.f32.mrf.mxu1 }
 0x5c7   : > { %v3145_v55 = vmax.f32 %v3006_v45, 0.0  ;;  %v3200_v16 = vpack.c.bf16 %v3144_v26, %v3142_v36  ;;  %v3010_v59 = vadd.f32 %v3009_v48, %v2809_v43  ;;  %v2829_v48 = vadd.f32 %v6381_v3, %v6339_v22 }
 0x5c8   : > { %v3011_v33 = vpop.f32.mrf.mxu0  ;;  %v6417_v44 = vpop.f32.mrf.mxu1  ;;  %v2831_v43 = vadd.f32 %v6385_v53, %v6336_v18  ;;  %v2833_v36 = vadd.f32 %v6391_v20, %v6339_v22 }
 0x5c9   : > { %v3201_v4 = vpack.c.bf16 %v3145_v55, %v3143_v34  ;;  %v3012_v8 = vadd.f32 %v3011_v33, %v2811_v54  ;;  %v3146_v15 = vmax.f32 %v3010_v59, 0.0 }
 0x5ca   : > { %v3013_v62 = vpop.f32.mrf.mxu0  ;;  %v6423_v56 = vpop.f32.mrf.mxu1 }
 0x5cb   : > { %v3014_v63 = vadd.f32 %v3013_v62, %v2813_v25  ;;  %3490 = vmatprep.mubr.bf16.mxu1 %v3201_v4  ;;  %v3147_v57 = vmax.f32 %v3012_v8, 0.0 }
 0x5cc   : > { %v3015_v37 = vpop.f32.mrf.mxu0  ;;  %3491 = vmatmul.mubr.bf16.gmra.mxu1 %v3200_v16  ;;  %v6427_v49 = vpop.f32.mrf.mxu1  ;;  %v2835_v16 = vadd.f32 %v6395_v38, %v6336_v18 }
 0x5cd   : > { %v3016_v39 = vadd.f32 %v3015_v37, %v2815_v61  ;;  %v3148_v58 = vmax.f32 %v3014_v63, 0.0 }
 0x5ce   : > { %v3019_v35 = vpop.f32.mrf.mxu0  ;;  %v6429_v46 = vpop.f32.mrf.mxu1 }
 0x5cf   : > { %v3149_v28 = vmax.f32 %v3016_v39, 0.0  ;;  %v3202_v17 = vpack.c.bf16 %v3148_v58, %v3146_v15  ;;  %v3020_v10 = vadd.f32 %v3019_v35, %v2819_v14  ;;  %v2839_v35 = vadd.f32 %v6397_v5, %v6339_v22 }
 0x5d0   : > { %v3021_v7 = vpop.f32.mrf.mxu0  ;;  %v6433_v9 = vpop.f32.mrf.mxu1  ;;  %v2841_v14 = vadd.f32 %v6401_v21, %v6336_v18  ;;  %v2843_v15 = vadd.f32 %v6407_v23, %v6339_v22 }
 0x5d1   : > { %v3203_v27 = vpack.c.bf16 %v3149_v28, %v3147_v57  ;;  %v3022_v11 = vadd.f32 %v3021_v7, %v2821_v24  ;;  %v3150_v34 = vmax.f32 %v3020_v10, 0.0 }
 0x5d2   : > { %v3023_v19 = vpop.f32.mrf.mxu0  ;;  %v6439_v32 = vpop.f32.mrf.mxu1 }
 0x5d3   : > { %v3024_v1 = vadd.f32 %v3023_v19, %v2823_v2  ;;  %3500 = vmatprep.mubr.bf16.mxu1 %v3203_v27  ;;  %v3151_v45 = vmax.f32 %v3022_v11, 0.0 }
 0x5d4   : > { %v3025_v42 = vpop.f32.mrf.mxu0  ;;  %3501 = vmatmul.mubr.bf16.gmra.mxu1 %v3202_v17  ;;  %v6443_v31 = vpop.f32.mrf.mxu1  ;;  %v2845_v17 = vadd.f32 %v6411_v60, %v6336_v18 }
 0x5d5   : > { %v3026_v50 = vadd.f32 %v3025_v42, %v2825_v12  ;;  %v3152_v6 = vmax.f32 %v3024_v1, 0.0 }
 0x5d6   : > { %v3029_v13 = vpop.f32.mrf.mxu0  ;;  %v6445_v51 = vpop.f32.mrf.mxu1 }
 0x5d7   : > { %v3153_v26 = vmax.f32 %v3026_v50, 0.0  ;;  %v3204_v54 = vpack.c.bf16 %v3152_v6, %v3150_v34  ;;  %v3030_v61 = vadd.f32 %v3029_v13, %v2829_v48  ;;  %v2849_v13 = vadd.f32 %v6413_v47, %v6339_v22 }
 0x5d8   : > { %v3031_v52 = vpop.f32.mrf.mxu0  ;;  %v6449_v55 = vpop.f32.mrf.mxu1  ;;  %v2851_v48 = vadd.f32 %v6417_v44, %v6336_v18  ;;  %v2853_v34 = vadd.f32 %v6423_v56, %v6339_v22 }
 0x5d9   : > { %v3205_v33 = vpack.c.bf16 %v3153_v26, %v3151_v45  ;;  %v3032_v62 = vadd.f32 %v3031_v52, %v2831_v43  ;;  %v3154_v57 = vmax.f32 %v3030_v61, 0.0 }
 0x5da   : > { %v3033_v25 = vpop.f32.mrf.mxu0  ;;  %v6455_v4 = vpop.f32.mrf.mxu1 }
 0x5db   : > { %v3034_v3 = vadd.f32 %v3033_v25, %v2833_v36  ;;  %3510 = vmatprep.mubr.bf16.mxu1 %v3205_v33  ;;  %v3155_v39 = vmax.f32 %v3032_v62, 0.0 }
 0x5dc   : > { %v3035_v8 = vpop.f32.mrf.mxu0  ;;  %3511 = vmatmul.mubr.bf16.gmra.mxu1 %v3204_v54  ;;  %v6459_v63 = vpop.f32.mrf.mxu1  ;;  %v2855_v54 = vadd.f32 %v6427_v49, %v6336_v18 }
 0x5dd   : > { %v3036_v53 = vadd.f32 %v3035_v8, %v2835_v16  ;;  %v3156_v59 = vmax.f32 %v3034_v3, 0.0 }
 0x5de   : > { %v3039_v37 = vpop.f32.mrf.mxu0  ;;  %v6461_v20 = vpop.f32.mrf.mxu1 }
 0x5df   : > { %v3157_v58 = vmax.f32 %v3036_v53, 0.0  ;;  %v3206_v24 = vpack.c.bf16 %v3156_v59, %v3154_v57  ;;  %v3040_v12 = vadd.f32 %v3039_v37, %v2839_v35  ;;  %v2859_v37 = vadd.f32 %v6429_v46, %v6339_v22 }
 0x5e0   : > { %v3041_v38 = vpop.f32.mrf.mxu0  ;;  %v6465_v28 = vpop.f32.mrf.mxu1  ;;  %v2861_v35 = vadd.f32 %v6433_v9, %v6336_v18  ;;  %v2863_v57 = vadd.f32 %v6439_v32, %v6339_v22 }
 0x5e1   : > { %v3207_v7 = vpack.c.bf16 %v3157_v58, %v3155_v39  ;;  %v3042_v19 = vadd.f32 %v3041_v38, %v2841_v14  ;;  %v3158_v45 = vmax.f32 %v3040_v12, 0.0 }
 0x5e2   : > { %v3043_v2 = vpop.f32.mrf.mxu0  ;;  %v6471_v27 = vpop.f32.mrf.mxu1 }
 0x5e3   : > { %v3044_v5 = vadd.f32 %v3043_v2, %v2843_v15  ;;  %3520 = vmatprep.mubr.bf16.mxu1 %v3207_v7  ;;  %v3159_v50 = vmax.f32 %v3042_v19, 0.0 }
 0x5e4   : > { %v3045_v11 = vpop.f32.mrf.mxu0  ;;  %3521 = vmatmul.mubr.bf16.gmra.mxu1 %v3206_v24  ;;  %v6475_v1 = vpop.f32.mrf.mxu1  ;;  %v2865_v24 = vadd.f32 %v6443_v31, %v6336_v18 }
 0x5e5   : > { %v3046_v21 = vadd.f32 %v3045_v11, %v2845_v17  ;;  %v3160_v10 = vmax.f32 %v3044_v5, 0.0 }
 0x5e6   : > { %v3049_v42 = vpop.f32.mrf.mxu0  ;;  %v6477_v23 = vpop.f32.mrf.mxu1 }
 0x5e7   : > { %v3161_v6 = vmax.f32 %v3046_v21, 0.0  ;;  %v3208_v43 = vpack.c.bf16 %v3160_v10, %v3158_v45  ;;  %v3050_v16 = vadd.f32 %v3049_v42, %v2849_v13  ;;  %v2869_v42 = vadd.f32 %v6445_v51, %v6339_v22 }
 0x5e8   : > { %v3051_v60 = vpop.f32.mrf.mxu0  ;;  %v6481_v26 = vpop.f32.mrf.mxu1  ;;  %v2871_v13 = vadd.f32 %v6449_v55, %v6336_v18  ;;  %v2873_v45 = vadd.f32 %v6455_v4, %v6339_v22 }
 0x5e9   : > { %v3209_v52 = vpack.c.bf16 %v3161_v6, %v3159_v50  ;;  %v3052_v25 = vadd.f32 %v3051_v60, %v2851_v48  ;;  %v3162_v39 = vmax.f32 %v3050_v16, 0.0 }
 0x5ea   : > { %v3053_v36 = vpop.f32.mrf.mxu0  ;;  %v6487_v33 = vpop.f32.mrf.mxu1 }
 0x5eb   : > { %v3054_v47 = vadd.f32 %v3053_v36, %v2853_v34  ;;  %3530 = vmatprep.mubr.bf16.mxu1 %v3209_v52  ;;  %v3163_v53 = vmax.f32 %v3052_v25, 0.0 }
 0x5ec   : > { %v3055_v62 = vpop.f32.mrf.mxu0  ;;  %3531 = vmatmul.mubr.bf16.gmra.mxu1 %v3208_v43  ;;  %v6491_v3 = vpop.f32.mrf.mxu1  ;;  %v2875_v43 = vadd.f32 %v6459_v63, %v6336_v18 }
 0x5ed   : > { %v3056_v44 = vadd.f32 %v3055_v62, %v2855_v54  ;;  %v3164_v61 = vmax.f32 %v3054_v47, 0.0 }
 0x5ee   : > { %v3059_v8 = vpop.f32.mrf.mxu0  ;;  %v6493_v56 = vpop.f32.mrf.mxu1 }
 0x5ef   : > { %v3165_v59 = vmax.f32 %v3056_v44, 0.0  ;;  %v3210_v14 = vpack.c.bf16 %v3164_v61, %v3162_v39  ;;  %v3060_v17 = vadd.f32 %v3059_v8, %v2859_v37  ;;  %v2879_v8 = vadd.f32 %v6461_v20, %v6339_v22 }
 0x5f0   : > { %v3061_v49 = vpop.f32.mrf.mxu0  ;;  %v6497_v58 = vpop.f32.mrf.mxu1  ;;  %v2881_v37 = vadd.f32 %v6465_v28, %v6336_v18  ;;  %v2883_v39 = vadd.f32 %v6471_v27, %v6339_v22  ;;  %v2889_v27 = vadd.f32 %v6477_v23, %v6339_v22 }
 0x5f1   : > { %v3211_v38 = vpack.c.bf16 %v3165_v59, %v3163_v53  ;;  %v3062_v2 = vadd.f32 %v3061_v49, %v2861_v35  ;;  %v3166_v50 = vmax.f32 %v3060_v17, 0.0 }
 0x5f2   : > { %v3063_v15 = vpop.f32.mrf.mxu0  ;;  %v6503_v7 = vpop.f32.mrf.mxu1 }
 0x5f3   : > { %v3064_v46 = vadd.f32 %v3063_v15, %v2863_v57  ;;  %3540 = vmatprep.mubr.bf16.mxu1 %v3211_v38  ;;  %v3167_v21 = vmax.f32 %v3062_v2, 0.0 }
 0x5f4   : > { %v3065_v19 = vpop.f32.mrf.mxu0  ;;  %3541 = vmatmul.mubr.bf16.gmra.mxu1 %v3210_v14  ;;  %v6507_v5 = vpop.f32.mrf.mxu1  ;;  %v2885_v14 = vadd.f32 %v6475_v1, %v6336_v18  ;;  %v2891_v1 = vadd.f32 %v6481_v26, %v6336_v18 }
 0x5f5   : > { %v3066_v9 = vadd.f32 %v3065_v19, %v2865_v24  ;;  %v3168_v12 = vmax.f32 %v3064_v46, 0.0 }
 0x5f6   : > { %v3069_v11 = vpop.f32.mrf.mxu0  ;;  %v6509_v32 = vpop.f32.mrf.mxu1 }
 0x5f7   : > { %v3169_v10 = vmax.f32 %v3066_v9, 0.0  ;;  %v3212_v48 = vpack.c.bf16 %v3168_v12, %v3166_v50  ;;  %v3070_v54 = vadd.f32 %v3069_v11, %v2869_v42 }
 0x5f8   : > { %v3071_v31 = vpop.f32.mrf.mxu0  ;;  %v6513_v6 = vpop.f32.mrf.mxu1 }
 0x5f9   : > { %v3213_v60 = vpack.c.bf16 %v3169_v10, %v3167_v21  ;;  %v3072_v36 = vadd.f32 %v3071_v31, %v2871_v13  ;;  %v3170_v53 = vmax.f32 %v3070_v54, 0.0  ;;  %v2893_v10 = vadd.f32 %v6487_v33, %v6339_v22 }
 0x5fa   : > { %v3073_v34 = vpop.f32.mrf.mxu0  ;;  %v6519_v52 = vpop.f32.mrf.mxu1  ;;  %v2895_v13 = vadd.f32 %v6491_v3, %v6336_v18  ;;  %v2899_v33 = vadd.f32 %v6493_v56, %v6339_v22  ;;  %v2903_v3 = vadd.f32 %v6503_v7, %v6339_v22  ;;  %v2909_v7 = vadd.f32 %v6509_v32, %v6339_v22 }
 0x5fb   : > { %v3074_v51 = vadd.f32 %v3073_v34, %v2873_v45  ;;  %3550 = vmatprep.mubr.bf16.mxu1 %v3213_v60  ;;  %v3171_v44 = vmax.f32 %v3072_v36, 0.0 }
 0x5fc   : > { %v3075_v25 = vpop.f32.mrf.mxu0  ;;  %3551 = vmatmul.mubr.bf16.gmra.mxu1 %v3212_v48  ;;  %v6523_v47 = vpop.f32.mrf.mxu1 }
 0x5fd   : > { %v3076_v55 = vadd.f32 %v3075_v25, %v2875_v43  ;;  %v3172_v16 = vmax.f32 %v3074_v51, 0.0 }
 0x5fe   : > { %v3079_v62 = vpop.f32.mrf.mxu0  ;;  %v6525_v4 = vpop.f32.mrf.mxu1 }
 0x5ff   : > { %v3173_v61 = vmax.f32 %v3076_v55, 0.0  ;;  %v3214_v35 = vpack.c.bf16 %v3172_v16, %v3170_v53  ;;  %v3080_v20 = vadd.f32 %v3079_v62, %v2879_v8  ;;  %v2901_v55 = vadd.f32 %v6497_v58, %v6336_v18 }
 0x600   : > { %v3081_v63 = vpop.f32.mrf.mxu0  ;;  %v6529_v59 = vpop.f32.mrf.mxu1  ;;  %v2919_v32 = vadd.f32 %v6525_v4, %v6339_v22 }
 0x601   : > { %v3215_v49 = vpack.c.bf16 %v3173_v61, %v3171_v44  ;;  %v3082_v15 = vadd.f32 %v3081_v63, %v2881_v37  ;;  %v3174_v11 = vmax.f32 %v3080_v20, 0.0  ;;  %v2905_v61 = vadd.f32 %v6507_v5, %v6336_v18 }
 0x602   : > { %v3083_v57 = vpop.f32.mrf.mxu0  ;;  %v2922_v38 = vpop.f32.mrf.mxu1  ;;  %v2913_v5 = vadd.f32 %v6519_v52, %v6339_v22 }
 0x603   : > { %v3084_v24 = vadd.f32 %v3083_v57, %v2883_v39  ;;  %3560 = vmatprep.mubr.bf16.mxu1 %v3215_v49  ;;  %v3175_v9 = vmax.f32 %v3082_v15, 0.0 }
 0x604   : > { %v3085_v2 = vpop.f32.mrf.mxu0  ;;  %3561 = vmatmul.mubr.bf16.gmra.mxu1 %v3214_v35  ;;  %v2923_v46 = vpop.f32.mrf.mxu1 }
 0x605   : > { %v3086_v17 = vadd.f32 %v3085_v2, %v2885_v14  ;;  %v3176_v19 = vmax.f32 %v3084_v24, 0.0  ;;  %v2911_v14 = vadd.f32 %v6513_v6, %v6336_v18  ;;  %v2915_v2 = vadd.f32 %v6523_v47, %v6336_v18 }
 0x606   : > { %v3089_v28 = vpop.f32.mrf.mxu0  ;;  %v2921_v6 = vadd.f32 %v6529_v59, %v6336_v18 }
 0x607   : > { %v3177_v12 = vmax.f32 %v3086_v17, 0.0  ;;  %v3216_v50 = vpack.c.bf16 %v3176_v19, %v3174_v11  ;;  %v3090_v48 = vadd.f32 %v3089_v28, %v2889_v27 }
 0x608   : > { %v3091_v21 = vpop.f32.mrf.mxu0 }
 0x609   : > { %v3217_v42 = vpack.c.bf16 %v3177_v12, %v3175_v9  ;;  %v3092_v45 = vadd.f32 %v3091_v21, %v2891_v1  ;;  %v3178_v54 = vmax.f32 %v3090_v48, 0.0 }
 0x60a   : > { %v3093_v31 = vpop.f32.mrf.mxu0 }
 0x60b   : > { %v3094_v60 = vadd.f32 %v3093_v31, %v2893_v10  ;;  %3570 = vmatprep.mubr.bf16.mxu1 %v3217_v42  ;;  %v3179_v51 = vmax.f32 %v3092_v45, 0.0 }
 0x60c   : > { %v3095_v34 = vpop.f32.mrf.mxu0  ;;  %3571 = vmatmul.mubr.bf16.gmra.mxu1 %v3216_v50 }
 0x60d   : > { %v3096_v23 = vadd.f32 %v3095_v34, %v2895_v13  ;;  %v3180_v43 = vmax.f32 %v3094_v60, 0.0 }
 0x60e   : > { %v3099_v36 = vpop.f32.mrf.mxu0 }
 0x60f   : > { %v3181_v26 = vmax.f32 %v3096_v23, 0.0  ;;  %v3218_v62 = vpack.c.bf16 %v3180_v43, %v3178_v54  ;;  %v3100_v63 = vadd.f32 %v3099_v36, %v2899_v33 }
 0x610   : > { %v3101_v25 = vpop.f32.mrf.mxu0 }
 0x611   : > { %v3219_v16 = vpack.c.bf16 %v3181_v26, %v3179_v51  ;;  %v3102_v8 = vadd.f32 %v3101_v25, %v2901_v55  ;;  %v3182_v57 = vmax.f32 %v3100_v63, 0.0 }
 0x612   : > { %v3103_v44 = vpop.f32.mrf.mxu0 }
 0x613   : > { %v3104_v53 = vadd.f32 %v3103_v44, %v2903_v3  ;;  %3580 = vmatprep.mubr.bf16.mxu1 %v3219_v16  ;;  %v3183_v35 = vmax.f32 %v3102_v8, 0.0 }
 0x614   : > { %v3105_v37 = vpop.f32.mrf.mxu0  ;;  %3581 = vmatmul.mubr.bf16.gmra.mxu1 %v3218_v62 }
 0x615   : > { %v3106_v56 = vadd.f32 %v3105_v37, %v2905_v61  ;;  %v3184_v39 = vmax.f32 %v3104_v53, 0.0 }
 0x616   : > { %v3109_v49 = vpop.f32.mrf.mxu0 }
 0x617   : > { %v3185_v58 = vmax.f32 %v3106_v56, 0.0  ;;  %v3220_v24 = vpack.c.bf16 %v3184_v39, %v3182_v57  ;;  %v3110_v19 = vadd.f32 %v3109_v49, %v2909_v7 }
 0x618   : > { %v3111_v38 = vpop.f32.mrf.mxu0 }
 0x619   : > { %v3221_v15 = vpack.c.bf16 %v3185_v58, %v3183_v35  ;;  %v3112_v46 = vadd.f32 %v3111_v38, %v2911_v14  ;;  %v3186_v21 = vmax.f32 %v3110_v19, 0.0 }
 0x61a   : > { %v3113_v20 = vpop.f32.mrf.mxu0 }
 0x61b   : > { %v3114_v17 = vadd.f32 %v3113_v20, %v2913_v5  ;;  %3590 = vmatprep.mubr.bf16.mxu1 %v3221_v15  ;;  %v3187_v27 = vmax.f32 %v3112_v46, 0.0 }
 0x61c   : > { %v3115_v28 = vpop.f32.mrf.mxu0  ;;  %3591 = vmatmul.mubr.bf16.gmra.mxu1 %v3220_v24 }
 0x61d   : > { %v3116_v9 = vadd.f32 %v3115_v28, %v2915_v2  ;;  %v3188_v52 = vmax.f32 %v3114_v17, 0.0 }
 0x61e   : > { %v3119_v12 = vpop.f32.mrf.mxu0 }
 0x61f   : > { %v3189_v11 = vmax.f32 %v3116_v9, 0.0  ;;  %v3120_v1 = vadd.f32 %v3119_v12, %v2919_v32  ;;  %v3222_v50 = vpack.c.bf16 %v3188_v52, %v3186_v21 }
 0x620   : > { %v3121_v47 = vpop.f32.mrf.mxu0 }
 0x621   : > { %v3223_v10 = vpack.c.bf16 %v3189_v11, %v3187_v27  ;;  %v3122_v42 = vadd.f32 %v3121_v47, %v2921_v6  ;;  %v3190_v22 = vmax.f32 %v3120_v1, 0.0 }
 0x622   : > { %v3123_v31 = vpop.f32.mrf.mxu0 }
 0x623   : > { %v3191_v13 = vmax.f32 %v3122_v42, 0.0  ;;  %3600 = vmatprep.mubr.bf16.mxu1 %v3223_v10  ;;  %v3224_v18 = vpack.c.bf16 %v3190_v22, %v3190_v22 }
 0x624   : > { %v3124_v4 = vpop.f32.mrf.mxu0  ;;  %3601 = vmatmul.mubr.bf16.gmra.mxu1 %v3222_v50 }
 0x625   : > { %v3225_v45 = vpack.c.bf16 %v3191_v13, %v3191_v13 }
 0x627   : > { %3610 = vmatprep.mubr.bf16.mxu1 %v3225_v45 }
 0x62c   : > { %3611 = vmatmul.mubr.bf16.gmra.mxu1 %v3224_v18 }
 0x62d   : > { %3904 = vmatprep.mubr.bf16.mxu1 %v5380_v0 }
 0x66c   : > { %v6566_v59 = vpop.f32.mrf.mxu1 }
 0x66e   : > { %v6568_v60 = vpop.f32.mrf.mxu1 }
 0x670   : > { %v6570_v48 = vpop.f32.mrf.mxu1 }
 0x671   : > { %v3619_v34 = vpack.c.bf16 %v6570_v48, %v6566_v59 }
 0x672   : > { %v6574_v23 = vpop.f32.mrf.mxu1 }
 0x674   : > { %v6576_v43 = vpop.f32.mrf.mxu1 }
 0x676   : > { %v6578_v36 = vpop.f32.mrf.mxu1 }
 0x678   : > { %v6580_v51 = vpop.f32.mrf.mxu1 }
 0x679   : > { %v3621_v26 = vpack.c.bf16 %v6580_v51, %v6576_v43 }
 0x67a   : > { %v6584_v33 = vpop.f32.mrf.mxu1 }
 0x67c   : > { %v6586_v54 = vpop.f32.mrf.mxu1 }
 0x67e   : > { %v3474_v25 = vpop.f32.mrf.mxu1 }
 0x680   : > { %v3476_v55 = vpop.f32.mrf.mxu1 }
 0x682   : > { %v3478_v3 = vpop.f32.mrf.mxu1 }
 0x683   : > { %v3624_v45 = vpack.c.bf16 %v3478_v3, %v3474_v25 }
 0x684   : > { %v3482_v16 = vpop.f32.mrf.mxu1 }
 0x686   : > { %v3484_v62 = vpop.f32.mrf.mxu1 }
 0x688   : > { %v3486_v44 = vpop.f32.mrf.mxu1 }
 0x689   : > { %v3625_v22 = vpack.c.bf16 %v3486_v44, %v3482_v16  ;;  %v3620_v16 = vpack.c.bf16 %v6574_v23, %v6568_v60 }
 0x68a   : > { %v3488_v61 = vpop.f32.mrf.mxu1 }
 0x68b   : > { %v3626_v42 = vpack.c.bf16 %v3488_v61, %v3484_v62  ;;  %v3623_v62 = vpack.c.bf16 %v3476_v55, %v6586_v54 }
 0x68c   : > { %v3492_v8 = vpop.f32.mrf.mxu1 }
 0x68e   : > { %v3494_v53 = vpop.f32.mrf.mxu1 }
 0x690   : > { %v3496_v63 = vpop.f32.mrf.mxu1 }
 0x691   : > { %v3627_v47 = vpack.c.bf16 %v3496_v63, %v3492_v8  ;;  %v3622_v8 = vpack.c.bf16 %v6584_v33, %v6578_v36 }
 0x692   : > { %v3498_v37 = vpop.f32.mrf.mxu1 }
 0x693   : > { %v3628_v21 = vpack.c.bf16 %v3498_v37, %v3494_v53 }
 0x694   : > { %v3502_v56 = vpop.f32.mrf.mxu1 }
 0x696   : > { %v3504_v39 = vpop.f32.mrf.mxu1 }
 0x698   : > { %v3506_v49 = vpop.f32.mrf.mxu1 }
 0x699   : > { %v3629_v27 = vpack.c.bf16 %v3506_v49, %v3502_v56 }
 0x69a   : > { %v3508_v35 = vpop.f32.mrf.mxu1 }
 0x69b   : > { %v3630_v6 = vpack.c.bf16 %v3508_v35, %v3504_v39 }
 0x69c   : > { %v3512_v58 = vpop.f32.mrf.mxu1 }
 0x69e   : > { %v3514_v7 = vpop.f32.mrf.mxu1 }
 0x6a0   : > { %v3516_v57 = vpop.f32.mrf.mxu1 }
 0x6a1   : > { %v3631_v32 = vpack.c.bf16 %v3516_v57, %v3512_v58 }
 0x6a2   : > { %v3518_v38 = vpop.f32.mrf.mxu1 }
 0x6a3   : > { %v3632_v17 = vpack.c.bf16 %v3518_v38, %v3514_v7 }
 0x6a4   : > { %v3522_v14 = vpop.f32.mrf.mxu1 }
 0x6a6   : > { %v3524_v5 = vpop.f32.mrf.mxu1 }
 0x6a8   : > { %v3526_v15 = vpop.f32.mrf.mxu1 }
 0x6a9   : > { %v3633_v2 = vpack.c.bf16 %v3526_v15, %v3522_v14 }
 0x6aa   : > { %v3528_v24 = vpop.f32.mrf.mxu1 }
 0x6ab   : > { %v3634_v20 = vpack.c.bf16 %v3528_v24, %v3524_v5 }
 0x6ac   : > { %v6588_v46 = vpop.f32.mrf.mxu1 }
 0x6ad   : > { %3671 = vmatprep.subr.bf16.mxu0 %v3634_v20 }
 0x6ae   : > { %v6590_v19 = vpop.f32.mrf.mxu1  ;;  %3672 = vmatpush1.bf16.msra.mxu0 %v3633_v2 }
 0x6af   : > { %3673 = vmatprep.subr.bf16.mxu0 %v3632_v17 }
 0x6b0   : > { %v6592_v28 = vpop.f32.mrf.mxu1 }
 0x6b1   : > { %v3635_v9 = vpack.c.bf16 %v6592_v28, %v6588_v46  ;;  %v5182_v46 = vld [vmem:[%s5575_s19 + $0x34] ss:$12 sps:$4 sm:$0xff]   ;;  %v5183_v28 = vld [vmem:[%s5575_s19 + $0x30] ss:$12 sps:$4 sm:$0xff]  }
 0x6b2   : > { %v6596_v52 = vpop.f32.mrf.mxu1  ;;  %3674 = vmatpush1.bf16.msra.mxu0 %v3631_v32 }
 0x6b3   : > { %v3636_v12 = vpack.c.bf16 %v6596_v52, %v6590_v19  ;;  %3675 = vmatprep.subr.bf16.mxu0 %v3630_v6  ;;  %v5181_v19 = vld [vmem:[%s5575_s19 + $0x68] ss:$12 sps:$4 sm:$0xff]   ;;  %v5185_v52 = vld [vmem:[%s5575_s19 + $0x4c] ss:$12 sps:$4 sm:$0xff]  }
 0x6b4   : > { %v6600_v11 = vpop.f32.mrf.mxu1 }
 0x6b6   : > { %v6602_v1 = vpop.f32.mrf.mxu1  ;;  %3676 = vmatpush1.bf16.msra.mxu0 %v3629_v27  ;;  %v5174_v27 = vld [vmem:[%s5575_s19 + $0x8] ss:$12 sps:$4 sm:$0xff]  }
 0x6b7   : > { %3677 = vmatprep.subr.bf16.mxu0 %v3628_v21 }
 0x6b8   : > { %v6604_v10 = vpop.f32.mrf.mxu1 }
 0x6b9   : > { %v3637_v50 = vpack.c.bf16 %v6604_v10, %v6600_v11  ;;  %v5179_v11 = vld [vmem:[%s5575_s19 + $0x1c] ss:$12 sps:$4 sm:$0xff]   ;;  %v5180_v10 = vld [vmem:[%s5575_s19 + $0x18] ss:$12 sps:$4 sm:$0xff]  }
 0x6ba   : > { %v6608_v31 = vpop.f32.mrf.mxu1  ;;  %3678 = vmatpush1.bf16.msra.mxu0 %v3627_v47 }
 0x6bb   : > { %v3638_v13 = vpack.c.bf16 %v6608_v31, %v6602_v1  ;;  %3679 = vmatprep.subr.bf16.mxu0 %v3626_v42  ;;  %v5177_v1 = vld [vmem:[%s5575_s19] ss:$12 sps:$4 sm:$0xff]   ;;  %v5178_v31 = vld [vmem:[%s5575_s19 + $0x50] ss:$12 sps:$4 sm:$0xff]  }
 0x6bc   : > { %v6612_v4 = vpop.f32.mrf.mxu1 }
 0x6be   : > { %v6614_v18 = vpop.f32.mrf.mxu1  ;;  %3680 = vmatpush1.bf16.msra.mxu0 %v3625_v22 }
 0x6bf   : > { %3681 = vmatprep.subr.bf16.mxu0 %v3624_v45  ;;  %v5175_v45 = vld [vmem:[%s5575_s19 + $0x20] ss:$12 sps:$4 sm:$0xff]  }
 0x6c0   : > { %v6617_v61 = vpop.f32.mrf.mxu1 }
 0x6c2   : > { %v6621_v53 = vpop.f32.mrf.mxu1  ;;  %3682 = vmatpush1.bf16.msra.mxu0 %v3623_v62  ;;  %v3639_v62 = vpack.c.bf16 %v6617_v61, %v6612_v4  ;;  %v5189_v4 = vld [vmem:[%s5575_s19 + $0x60] ss:$12 sps:$4 sm:$0xff]   ;;  %v5190_v61 = vld [vmem:[%s5575_s19 + $0xb0] ss:$12 sps:$4 sm:$0xff]  }
 0x6c3   : > { %3683 = vmatprep.subr.bf16.mxu0 %v3622_v8  ;;  %v3640_v22 = vpack.c.bf16 %v6621_v53, %v6614_v18  ;;  %v5176_v18 = vld [vmem:[%s5575_s19 + $0x38] ss:$12 sps:$4 sm:$0xff]   ;;  %v5191_v8 = vld [vmem:[%s5575_s19 + $0x7c] ss:$12 sps:$4 sm:$0xff]  }
 0x6c4   : > { %v3562_v63 = vpop.f32.mrf.mxu1  ;;  %v5192_v53 = vld [vmem:[%s5575_s19 + $0x78] ss:$12 sps:$4 sm:$0xff]  }
 0x6c6   : > { %v3564_v25 = vpop.f32.mrf.mxu1  ;;  %3684 = vmatpush1.bf16.msra.mxu0 %v3621_v26 }
 0x6c7   : > { %3685 = vmatprep.subr.bf16.mxu0 %v3620_v16  ;;  %v5194_v16 = vld [vmem:[%s5575_s19 + $0x94] ss:$12 sps:$4 sm:$0xff]  }
 0x6c8   : > { %v3566_v54 = vpop.f32.mrf.mxu1 }
 0x6c9   : > { %v3641_v42 = vpack.c.bf16 %v3566_v54, %v3562_v63  ;;  %v5193_v63 = vld [vmem:[%s5575_s19 + $0xc8] ss:$12 sps:$4 sm:$0xff]   ;;  %v5196_v54 = vld [vmem:[%s5575_s19 + $0xe0] ss:$12 sps:$4 sm:$0xff]  }
 0x6ca   : > { %v3568_v55 = vpop.f32.mrf.mxu1  ;;  %3686 = vmatpush1.bf16.msra.mxu0 %v3619_v34 }
 0x6cb   : > { %v3642_v47 = vpack.c.bf16 %v3568_v55, %v3564_v25  ;;  %v5195_v25 = vld [vmem:[%s5575_s19 + $0x90] ss:$12 sps:$4 sm:$0xff]   ;;  %v5197_v55 = vld [vmem:[%s5575_s19 + $0xac] ss:$12 sps:$4 sm:$0xff]  }
 0x6cc   : > { %v3572_v36 = vpop.f32.mrf.mxu1 }
 0x6ce   : > { %v3574_v33 = vpop.f32.mrf.mxu1 }
 0x6d0   : > { %v3576_v3 = vpop.f32.mrf.mxu1 }
 0x6d1   : > { %v3643_v21 = vpack.c.bf16 %v3576_v3, %v3572_v36  ;;  %v5198_v36 = vld [vmem:[%s5575_s19 + $0xa8] ss:$12 sps:$4 sm:$0xff]   ;;  %v5200_v3 = vld [vmem:[%s5575_s19 + $0xc4] ss:$12 sps:$4 sm:$0xff]  }
 0x6d2   : > { %v3578_v44 = vpop.f32.mrf.mxu1 }
 0x6d3   : > { %v3644_v6 = vpack.c.bf16 %v3578_v44, %v3574_v33  ;;  %v5199_v33 = vld [vmem:[%s5575_s19 + $0xf8] ss:$12 sps:$4 sm:$0xff]   ;;  %v5201_v44 = vld [vmem:[%s5575_s19 + $0xc0] ss:$12 sps:$4 sm:$0xff]  }
 0x6d4   : > { %v3582_v37 = vpop.f32.mrf.mxu1 }
 0x6d6   : > { %v3584_v56 = vpop.f32.mrf.mxu1 }
 0x6d8   : > { %v3586_v39 = vpop.f32.mrf.mxu1 }
 0x6d9   : > { %v3645_v32 = vpack.c.bf16 %v3586_v39, %v3582_v37  ;;  %v5202_v37 = vld [vmem:[%s5575_s19 + $0x110] ss:$12 sps:$4 sm:$0xff]   ;;  %v5204_v39 = vld [vmem:[%s5575_s19 + $0xd8] ss:$12 sps:$4 sm:$0xff]  }
 0x6da   : > { %v3588_v60 = vpop.f32.mrf.mxu1 }
 0x6db   : > { %v3646_v2 = vpack.c.bf16 %v3588_v60, %v3584_v56  ;;  %v5203_v56 = vld [vmem:[%s5575_s19 + $0xdc] ss:$12 sps:$4 sm:$0xff]  }
 0x6dc   : > { %v3592_v23 = vpop.f32.mrf.mxu1  ;;  %v5205_v60 = vld [vmem:[%s5575_s19 + $0x128] ss:$12 sps:$4 sm:$0xff]  }
 0x6de   : > { %v3594_v49 = vpop.f32.mrf.mxu1 }
 0x6e0   : > { %v3596_v35 = vpop.f32.mrf.mxu1 }
 0x6e1   : > { %v3647_v24 = vpack.c.bf16 %v3596_v35, %v3592_v23  ;;  %v5206_v23 = vld [vmem:[%s5575_s19 + $0xf4] ss:$12 sps:$4 sm:$0xff]  }
 0x6e2   : > { %v3598_v43 = vpop.f32.mrf.mxu1  ;;  %v5208_v35 = vld [vmem:[%s5575_s19 + $0x140] ss:$12 sps:$4 sm:$0xff]  }
 0x6e3   : > { %v3648_v48 = vpack.c.bf16 %v3598_v43, %v3594_v49  ;;  %v5207_v49 = vld [vmem:[%s5575_s19 + $0xf0] ss:$12 sps:$4 sm:$0xff]   ;;  %v5209_v43 = vld [vmem:[%s5575_s19 + $0x10c] ss:$12 sps:$4 sm:$0xff]  }
 0x6e4   : > { %v3602_v51 = vpop.f32.mrf.mxu1 }
 0x6e6   : > { %v3604_v26 = vpop.f32.mrf.mxu1 }
 0x6e8   : > { %v3606_v58 = vpop.f32.mrf.mxu1 }
 0x6e9   : > { %v3649_v38 = vpack.c.bf16 %v3606_v58, %v3602_v51  ;;  %v5210_v51 = vld [vmem:[%s5575_s19 + $0x108] ss:$12 sps:$4 sm:$0xff]   ;;  %v5212_v58 = vld [vmem:[%s5575_s19 + $0x124] ss:$12 sps:$4 sm:$0xff]  }
 0x6ea   : > { %v3608_v7 = vpop.f32.mrf.mxu1 }
 0x6eb   : > { %v3650_v57 = vpack.c.bf16 %v3608_v7, %v3604_v26  ;;  %v5211_v26 = vld [vmem:[%s5575_s19 + $0x158] ss:$12 sps:$4 sm:$0xff]   ;;  %v5213_v7 = vld [vmem:[%s5575_s19 + $0x120] ss:$12 sps:$4 sm:$0xff]  }
 0x6ec   : > { %v3612_v59 = vpop.f32.mrf.mxu1 }
 0x6ed   : > { %v3651_v34 = vpack.c.bf16 %v3612_v59, %v3612_v59  ;;  %3687 = vmatprep.subr.bf16.mxu0 %v3650_v57  ;;  %v5214_v57 = vld [vmem:[%s5575_s19 + $0x170] ss:$12 sps:$4 sm:$0xff]   ;;  %v5216_v59 = vld [vmem:[%s5575_s19 + $0x138] ss:$12 sps:$4 sm:$0xff]  }
 0x6ee   : > { %v3614_v14 = vpop.f32.mrf.mxu1  ;;  %3688 = vmatpush2.bf16.msra.mxu0 %v3649_v38  ;;  %v5215_v38 = vld [vmem:[%s5575_s19 + $0x13c] ss:$12 sps:$4 sm:$0xff]  }
 0x6ef   : > { %v3666_v5 = vsel %vm719_vm0, %v3651_v34, 0  ;;  %v3652_v15 = vpack.c.bf16 %v3614_v14, %v3614_v14  ;;  %3689 = vmatprep.subr.bf16.mxu0 %v3648_v48  ;;  %v5217_v48 = vld [vmem:[%s5575_s19 + $0x188] ss:$0 sps:$4 sm:$0xff]   ;;  %v5218_v34 = vld [vmem:[%s5575_s19 + $0x154] ss:$12 sps:$4 sm:$0xff]  }
 0x6f0   : > { %v3616_v20 = vpop.f32.mrf.mxu1  ;;  %v5219_v14 = vld [vmem:[%s5575_s19 + $0x150] ss:$12 sps:$4 sm:$0xff]  }
 0x6f1   : > { %4777 = vmatprep.subr.msk.bf16.mxu1 %vm719_vm0, %v3652_v15  ;;  %v5221_v15 = vld [vmem:[%s5575_s19 + $0x168] ss:$12 sps:$4 sm:$0xff]  }
 0x6f2   : > { %v3617_v17 = vpop.f32.mrf.mxu1  ;;  %3690 = vmatpush2.bf16.msra.mxu0 %v3647_v24  ;;  %3887 = vmatpush1.bf16.msra.mxu1 %v3666_v5  ;;  %v5220_v5 = vld [vmem:[%s5575_s19 + $0x16c] ss:$12 sps:$4 sm:$0xff]  }
 0x6f3   : > { %3691 = vmatprep.subr.bf16.mxu0 %v3646_v2 }
 0x6f5   : > { %4778 = vmatmul.mubr.msk.bf16.vlgmr.msra.gmra.mxu1 %vm1719_vm3, %v5174_v27 }
 0x6f6   : > { %3692 = vmatpush2.bf16.msra.mxu0 %v3645_v32  ;;  %3914 = vmatprep.mubr.bf16.mxu1 %v5380_v0 }
 0x6f7   : > { %3693 = vmatprep.subr.bf16.mxu0 %v3644_v6 }
 0x6fa   : > { %3694 = vmatpush2.bf16.msra.mxu0 %v3643_v21 }
 0x6fb   : > { %3695 = vmatprep.subr.bf16.mxu0 %v3642_v47  ;;  %v3653_v47 = vld [vmem:[%s7324_s9] sm:$0x3] }
 0x6fd   : > { %4779 = vmatmul.mubr.msk.bf16.gmra.mxu1 %vm1719_vm3, %v5175_v45  ;;  %v6743_v45 = vrot.slane %v3653_v47, %v5669_v29 }
 0x6fe   : > { %3696 = vmatpush2.bf16.msra.mxu0 %v3641_v42  ;;  %3924 = vmatprep.mubr.bf16.mxu1 %v5380_v0 }
 0x6ff   : > { %3697 = vmatprep.subr.bf16.mxu0 %v3640_v22 }
 0x702   : > { %3698 = vmatpush2.bf16.msra.mxu0 %v3639_v62 }
 0x703   : > { %3699 = vmatprep.subr.bf16.mxu0 %v3638_v13  ;;  %v5188_v13 = vld [vmem:[%s5575_s19 + $0x64] ss:$12 sps:$4 sm:$0xff]  }
 0x705   : > { %4780 = vmatmul.mubr.msk.bf16.gmra.mxu1 %vm1719_vm3, %v5176_v18 }
 0x706   : > { %3700 = vmatpush2.bf16.msra.mxu0 %v3637_v50  ;;  %3934 = vmatprep.mubr.bf16.mxu1 %v5380_v0  ;;  %v5187_v50 = vld [vmem:[%s5575_s19 + $0x98] ss:$12 sps:$4 sm:$0xff]  }
 0x707   : > { %3701 = vmatprep.subr.bf16.mxu0 %v3636_v12  ;;  %v5186_v12 = vld [vmem:[%s5575_s19 + $0x48] ss:$12 sps:$4 sm:$0xff]  }
 0x70a   : > { %3702 = vmatpush2.bf16.msra.mxu0 %v3635_v9  ;;  %v5184_v9 = vld [vmem:[%s5575_s19 + $0x80] ss:$12 sps:$4 sm:$0xff]  }
 0x70d   : > { %3704 = vmatmul.mubr.bf16.vlgmr.msra.gmra.mxu0 %v5177_v1  ;;  %4781 = vmatmul.mubr.msk.bf16.gmra.mxu1 %vm1719_vm3, %v5178_v31 }
 0x70e   : > { %3713 = vmatprep.mubr.bf16.mxu0 %v5179_v11  ;;  %3944 = vmatprep.mubr.bf16.mxu1 %v5380_v0 }
 0x715   : > { %3714 = vmatmul.mubr.bf16.gmra.mxu0 %v5180_v10  ;;  %4782 = vmatmul.mubr.msk.bf16.gmra.mxu1 %vm1719_vm3, %v5181_v19 }
 0x716   : > { %3723 = vmatprep.mubr.bf16.mxu0 %v5182_v46  ;;  %3954 = vmatprep.mubr.bf16.mxu1 %v5380_v0 }
 0x71d   : > { %3724 = vmatmul.mubr.bf16.gmra.mxu0 %v5183_v28  ;;  %4783 = vmatmul.mubr.msk.bf16.gmra.mxu1 %vm1719_vm3, %v5184_v9 }
 0x71e   : > { %3733 = vmatprep.mubr.bf16.mxu0 %v5185_v52  ;;  %3964 = vmatprep.mubr.bf16.mxu1 %v5380_v0 }
 0x725   : > { %3734 = vmatmul.mubr.bf16.gmra.mxu0 %v5186_v12  ;;  %4784 = vmatmul.mubr.msk.bf16.gmra.mxu1 %vm1719_vm3, %v5187_v50 }
 0x726   : > { %3743 = vmatprep.mubr.bf16.mxu0 %v5188_v13  ;;  %3974 = vmatprep.mubr.bf16.mxu1 %v5380_v0 }
 0x72d   : > { %3744 = vmatmul.mubr.bf16.gmra.mxu0 %v5189_v4  ;;  %4785 = vmatmul.mubr.msk.bf16.gmra.mxu1 %vm1719_vm3, %v5190_v61 }
 0x72e   : > { %3753 = vmatprep.mubr.bf16.mxu0 %v5191_v8  ;;  %3984 = vmatprep.mubr.bf16.mxu1 %v5380_v0 }
 0x735   : > { %3754 = vmatmul.mubr.bf16.gmra.mxu0 %v5192_v53  ;;  %4786 = vmatmul.mubr.msk.bf16.gmra.mxu1 %vm1719_vm3, %v5193_v63 }
 0x736   : > { %3763 = vmatprep.mubr.bf16.mxu0 %v5194_v16  ;;  %3994 = vmatprep.mubr.bf16.mxu1 %v5380_v0 }
 0x73d   : > { %3764 = vmatmul.mubr.bf16.gmra.mxu0 %v5195_v25  ;;  %4787 = vmatmul.mubr.msk.bf16.gmra.mxu1 %vm1719_vm3, %v5196_v54 }
 0x73e   : > { %3773 = vmatprep.mubr.bf16.mxu0 %v5197_v55  ;;  %4004 = vmatprep.mubr.bf16.mxu1 %v5380_v0 }
 0x745   : > { %3774 = vmatmul.mubr.bf16.gmra.mxu0 %v5198_v36  ;;  %4788 = vmatmul.mubr.msk.bf16.gmra.mxu1 %vm1719_vm3, %v5199_v33 }
 0x746   : > { %3783 = vmatprep.mubr.bf16.mxu0 %v5200_v3  ;;  %4014 = vmatprep.mubr.bf16.mxu1 %v5380_v0 }
 0x74d   : > { %3784 = vmatmul.mubr.bf16.gmra.mxu0 %v5201_v44  ;;  %4789 = vmatmul.mubr.msk.bf16.gmra.mxu1 %vm1719_vm3, %v5202_v37 }
 0x74e   : > { %3793 = vmatprep.mubr.bf16.mxu0 %v5203_v56  ;;  %4024 = vmatprep.mubr.bf16.mxu1 %v5380_v0 }
 0x755   : > { %3794 = vmatmul.mubr.bf16.gmra.mxu0 %v5204_v39  ;;  %4790 = vmatmul.mubr.msk.bf16.gmra.mxu1 %vm1719_vm3, %v5205_v60 }
 0x756   : > { %3803 = vmatprep.mubr.bf16.mxu0 %v5206_v23  ;;  %4034 = vmatprep.mubr.bf16.mxu1 %v5380_v0 }
 0x75d   : > { %3804 = vmatmul.mubr.bf16.gmra.mxu0 %v5207_v49  ;;  %4791 = vmatmul.mubr.msk.bf16.gmra.mxu1 %vm1719_vm3, %v5208_v35 }
 0x75e   : > { %3813 = vmatprep.mubr.bf16.mxu0 %v5209_v43  ;;  %4044 = vmatprep.mubr.bf16.mxu1 %v5380_v0 }
 0x765   : > { %3814 = vmatmul.mubr.bf16.gmra.mxu0 %v5210_v51  ;;  %4792 = vmatmul.mubr.msk.bf16.gmra.mxu1 %vm1719_vm3, %v5211_v26 }
 0x766   : > { %3823 = vmatprep.mubr.bf16.mxu0 %v5212_v58  ;;  %4054 = vmatprep.mubr.bf16.mxu1 %v5380_v0 }
 0x76d   : > { %3824 = vmatmul.mubr.bf16.gmra.mxu0 %v5213_v7  ;;  %4793 = vmatmul.mubr.msk.bf16.gmra.mxu1 %vm1719_vm3, %v5214_v57 }
 0x76e   : > { %3833 = vmatprep.mubr.bf16.mxu0 %v5215_v38  ;;  %4064 = vmatprep.mubr.bf16.mxu1 %v5380_v0 }
 0x775   : > { %3834 = vmatmul.mubr.bf16.gmra.mxu0 %v5216_v59  ;;  %4794 = vmatmul.mubr.msk.bf16.gmra.mxu1 %vm1719_vm3, %v5217_v48 }
 0x776   : > { %3843 = vmatprep.mubr.bf16.mxu0 %v5218_v34 }
 0x77d   : > { %3844 = vmatmul.mubr.bf16.gmra.mxu0 %v5219_v14 }
 0x77e   : > { %3853 = vmatprep.mubr.bf16.mxu0 %v5220_v5 }
 0x785   : > { %3854 = vmatmul.mubr.bf16.gmra.mxu0 %v5221_v15 }
 0x786   : > { %3863 = vmatprep.mubr.bf16.mxu0 %v5913_v41  ;;  %v6738_v41 = vrot.slane %v3653_v47, %v5671_v30  ;;  %v4140_v47 = vld [vmem:[%s7326_s11 + $0x8] sm:$0xff] }
 0x78d   : > { %3864 = vmatmul.mubr.bf16.gmra.mxu0 %v5916_v40 }
 0x78e   : > { %4347 = vmatprep.mubr.f32.mxu0 %v4140_v47 }
 0x7b5   : > { %v3906_v24 = vpop.f32.mrf.mxu1 }
 0x7b7   : > { %v3908_v20 = vpop.f32.mrf.mxu1 }
 0x7b9   : > { %v3910_v0 = vpop.f32.mrf.mxu1 }
 0x7bb   : > { %v3912_v2 = vpop.f32.mrf.mxu1 }
 0x7bd   : > { %v3916_v17 = vpop.f32.mrf.mxu1 }
 0x7bf   : > { %v3918_v32 = vpop.f32.mrf.mxu1 }
 0x7c1   : > { %v3920_v6 = vpop.f32.mrf.mxu1 }
 0x7c3   : > { %v3922_v27 = vpop.f32.mrf.mxu1 }
 0x7c5   : > { %v3926_v21 = vpop.f32.mrf.mxu1 }
 0x7c7   : > { %v3928_v42 = vpop.f32.mrf.mxu1 }
 0x7c9   : > { %v6735_v22 = vpop.f32.mrf.mxu1 }
 0x7ca   : > { %7346 = vst [vmem:[#allocation13_spill] sm:$0xff] %v6735_v22 }
 0x7cb   : > { %v6740_v40 = vpop.f32.mrf.mxu1 }
 0x7cd   : > { %v3705_v62 = vpop.f32.mrf.mxu0  ;;  %v6745_v18 = vpop.f32.mrf.mxu1 }
 0x7ce   : > { %v3706_v1 = vadd.f32 %v3705_v62, %v6738_v41 }
 0x7cf   : > { %v3707_v31 = vpop.f32.mrf.mxu0  ;;  %v6748_v11 = vpop.f32.mrf.mxu1 }
 0x7d0   : > { %v3708_v10 = vadd.f32 %v3707_v31, %v6743_v45  ;;  %v6751_v19 = vadd.f32 %v3906_v24, %v3706_v1 }
 0x7d1   : > { %v3709_v46 = vpop.f32.mrf.mxu0  ;;  %v6753_v30 = vpop.f32.mrf.mxu1 }
 0x7d2   : > { %7347 = vst [vmem:[#allocation14_spill] sm:$0xff] %v6751_v19  ;;  %v3710_v28 = vadd.f32 %v3709_v46, %v6738_v41  ;;  %v6756_v9 = vadd.f32 %v3908_v20, %v3708_v10 }
 0x7d3   : > { %v3711_v29 = vpop.f32.mrf.mxu0  ;;  %v6758_v52 = vpop.f32.mrf.mxu1 }
 0x7d4   : > { %7348 = vst [vmem:[#allocation15_spill] sm:$0xff] %v6756_v9  ;;  %v3712_v12 = vadd.f32 %v3711_v29, %v6743_v45  ;;  %v6761_v50 = vadd.f32 %v3910_v0, %v3710_v28 }
 0x7d5   : > { %v3715_v13 = vpop.f32.mrf.mxu0  ;;  %v6763_v4 = vpop.f32.mrf.mxu1 }
 0x7d6   : > { %7349 = vst [vmem:[#allocation16_spill] sm:$0xff] %v6761_v50  ;;  %v3716_v61 = vadd.f32 %v3715_v13, %v6738_v41  ;;  %v6766_v8 = vadd.f32 %v3912_v2, %v3712_v12 }
 0x7d7   : > { %v3717_v53 = vpop.f32.mrf.mxu0  ;;  %v6768_v63 = vpop.f32.mrf.mxu1 }
 0x7d8   : > { %7350 = vst [vmem:[#allocation17_spill] sm:$0xff] %v6766_v8  ;;  %v3718_v16 = vadd.f32 %v3717_v53, %v6743_v45  ;;  %v6771_v25 = vadd.f32 %v3916_v17, %v3716_v61 }
 0x7d9   : > { %v3719_v54 = vpop.f32.mrf.mxu0  ;;  %v6773_v55 = vpop.f32.mrf.mxu1 }
 0x7da   : > { %7351 = vst [vmem:[#allocation18_spill] sm:$0xff] %v6771_v25  ;;  %v3720_v36 = vadd.f32 %v3719_v54, %v6738_v41  ;;  %v6776_v33 = vadd.f32 %v3918_v32, %v3718_v16 }
 0x7db   : > { %v3721_v3 = vpop.f32.mrf.mxu0  ;;  %v6778_v44 = vpop.f32.mrf.mxu1 }
 0x7dc   : > { %7352 = vst [vmem:[#allocation19_spill] sm:$0xff] %v6776_v33  ;;  %v3722_v37 = vadd.f32 %v3721_v3, %v6743_v45  ;;  %v6781_v56 = vadd.f32 %v3920_v6, %v3720_v36 }
 0x7dd   : > { %v3725_v39 = vpop.f32.mrf.mxu0  ;;  %v6783_v60 = vpop.f32.mrf.mxu1 }
 0x7de   : > { %7353 = vst [vmem:[#allocation20_spill] sm:$0xff] %v6781_v56  ;;  %v3726_v23 = vadd.f32 %v3725_v39, %v6738_v41  ;;  %v6786_v49 = vadd.f32 %v3922_v27, %v3722_v37 }
 0x7df   : > { %v3727_v35 = vpop.f32.mrf.mxu0  ;;  %v6788_v43 = vpop.f32.mrf.mxu1 }
 0x7e0   : > { %7354 = vst [vmem:[#allocation21_spill] sm:$0xff] %v6786_v49  ;;  %v3728_v51 = vadd.f32 %v3727_v35, %v6743_v45  ;;  %v6791_v26 = vadd.f32 %v3926_v21, %v3726_v23 }
 0x7e1   : > { %v3729_v58 = vpop.f32.mrf.mxu0  ;;  %v6793_v7 = vpop.f32.mrf.mxu1 }
 0x7e2   : > { %7355 = vst [vmem:[#allocation22_spill] sm:$0xff] %v6791_v26  ;;  %v6795_v57 = vadd.f32 %v3928_v42, %v3728_v51  ;;  %v6829_v19 = vadd.f32 %v3729_v58, %v6738_v41 }
 0x7e3   : > { %v3731_v38 = vpop.f32.mrf.mxu0  ;;  %v6797_v59 = vpop.f32.mrf.mxu1 }
 0x7e4   : > { %7356 = vst [vmem:[#allocation23_spill] sm:$0xff] %v6795_v57  ;;  %7360 = vst [vmem:[#allocation27_spill] sm:$0xff] %v6829_v19  ;;  %v6833_v50 = vadd.f32 %v3731_v38, %v6743_v45 }
 0x7e5   : > { %v3735_v48 = vpop.f32.mrf.mxu0  ;;  %v6799_v34 = vpop.f32.mrf.mxu1 }
 0x7e6   : > { %v6836_v8 = vadd.f32 %v3735_v48, %v6738_v41 }
 0x7e7   : > { %v3737_v14 = vpop.f32.mrf.mxu0  ;;  %v6801_v5 = vpop.f32.mrf.mxu1 }
 0x7e8   : > { %v6839_v25 = vadd.f32 %v3737_v14, %v6743_v45 }
 0x7e9   : > { %v3739_v15 = vpop.f32.mrf.mxu0  ;;  %v6803_v24 = vpop.f32.mrf.mxu1 }
 0x7ea   : > { %v6845_v26 = vadd.f32 %v3739_v15, %v6738_v41 }
 0x7eb   : > { %v3741_v20 = vpop.f32.mrf.mxu0  ;;  %v3972_v0 = vpop.f32.mrf.mxu1 }
 0x7ec   : > { %v6848_v58 = vadd.f32 %v3741_v20, %v6743_v45 }
 0x7ed   : > { %v3745_v2 = vpop.f32.mrf.mxu0  ;;  %v3976_v17 = vpop.f32.mrf.mxu1 }
 0x7ee   : > { %v6853_v48 = vadd.f32 %v3745_v2, %v6738_v41 }
 0x7ef   : > { %v3747_v32 = vpop.f32.mrf.mxu0  ;;  %v3978_v6 = vpop.f32.mrf.mxu1 }
 0x7f0   : > { %v6856_v14 = vadd.f32 %v3747_v32, %v6743_v45 }
 0x7f1   : > { %v3749_v27 = vpop.f32.mrf.mxu0  ;;  %v3980_v21 = vpop.f32.mrf.mxu1 }
 0x7f2   : > { %v6863_v20 = vadd.f32 %v3749_v27, %v6738_v41 }
 0x7f3   : > { %v3751_v42 = vpop.f32.mrf.mxu0  ;;  %v3982_v62 = vpop.f32.mrf.mxu1 }
 0x7f4   : > { %v3752_v2 = vadd.f32 %v3751_v42, %v6743_v45 }
 0x7f5   : > { %v6808_v1 = vpop.f32.mrf.mxu0  ;;  %v3986_v31 = vpop.f32.mrf.mxu1 }
 0x7f7   : > { %v3757_v10 = vpop.f32.mrf.mxu0  ;;  %v6810_v46 = vpop.f32.mrf.mxu1 }
 0x7f9   : > { %v3759_v28 = vpop.f32.mrf.mxu0  ;;  %v6812_v29 = vpop.f32.mrf.mxu1 }
 0x7fb   : > { %v3761_v12 = vpop.f32.mrf.mxu0  ;;  %v6814_v13 = vpop.f32.mrf.mxu1 }
 0x7fd   : > { %v3765_v61 = vpop.f32.mrf.mxu0  ;;  %v6816_v53 = vpop.f32.mrf.mxu1 }
 0x7fe   : > { %v3766_v32 = vadd.f32 %v3765_v61, %v6738_v41 }
 0x7ff   : > { %v3767_v16 = vpop.f32.mrf.mxu0  ;;  %v6818_v54 = vpop.f32.mrf.mxu1 }
 0x801   : > { %v3769_v36 = vpop.f32.mrf.mxu0  ;;  %v6820_v3 = vpop.f32.mrf.mxu1 }
 0x803   : > { %v3771_v37 = vpop.f32.mrf.mxu0  ;;  %v6822_v39 = vpop.f32.mrf.mxu1 }
 0x804   : > { %7357 = vst [vmem:[#allocation24_spill] sm:$0xff] %v6822_v39  ;;  %v3772_v38 = vadd.f32 %v3771_v37, %v6743_v45 }
 0x805   : > { %v3775_v23 = vpop.f32.mrf.mxu0  ;;  %v6824_v35 = vpop.f32.mrf.mxu1 }
 0x806   : > { %7358 = vst [vmem:[#allocation25_spill] sm:$0xff] %v6824_v35  ;;  %v3776_v33 = vadd.f32 %v3775_v23, %v6738_v41  ;;  %v3768_v23 = vadd.f32 %v3767_v16, %v6743_v45  ;;  %v3762_v35 = vadd.f32 %v3761_v12, %v6743_v45 }
 0x807   : > { %v3777_v51 = vpop.f32.mrf.mxu0  ;;  %v6826_v47 = vpop.f32.mrf.mxu1 }
 0x808   : > { %7359 = vst [vmem:[#allocation26_spill] sm:$0xff] %v6826_v47  ;;  %v3778_v9 = vadd.f32 %v3777_v51, %v6743_v45  ;;  %v3977_v22 = vadd.f32 %v3976_v17, %v3776_v33  ;;  %v4176_v33 = vld [vmem:[%s7325_s10 + $0xf8] sm:$0xff] }
 0x809   : > { %v3779_v56 = vpop.f32.mrf.mxu0  ;;  %v6842_v49 = vpop.f32.mrf.mxu1 }
 0x80a   : > { %7361 = vst [vmem:[#allocation28_spill] sm:$0xff] %v6842_v49  ;;  %v3780_v51 = vadd.f32 %v3779_v56, %v6738_v41  ;;  %v3770_v49 = vadd.f32 %v3769_v36, %v6738_v41  ;;  %v3979_v47 = vadd.f32 %v3978_v6, %v3778_v9  ;;  %v3758_v36 = vadd.f32 %v3757_v10, %v6743_v45 }
 0x80b   : > { %v3781_v57 = vpop.f32.mrf.mxu0  ;;  %v6860_v15 = vpop.f32.mrf.mxu1  ;;  %v3760_v9 = vadd.f32 %v3759_v28, %v6738_v41  ;;  %v4101_v61 = vmax.f32 %v3977_v22, 0.0 }
 0x80c   : > { %7362 = vst [vmem:[#allocation29_spill] sm:$0xff] %v6860_v15  ;;  %v3782_v37 = vadd.f32 %v3781_v57, %v6743_v45  ;;  %v3981_v56 = vadd.f32 %v3980_v21, %v3780_v51  ;;  %v3973_v15 = vadd.f32 %v3972_v0, %v3772_v38  ;;  %v3969_v57 = vadd.f32 %v6801_v5, %v3768_v23  ;;  %v4175_v0 = vld [vmem:[%s7325_s10 + $0xf0] sm:$0xff] }
 0x80d   : > { %v3785_v16 = vpop.f32.mrf.mxu0  ;;  %v6869_v19 = vpop.f32.mrf.mxu1  ;;  %v3971_v6 = vadd.f32 %v6803_v24, %v3770_v49  ;;  %v4102_v12 = vmax.f32 %v3979_v47, 0.0  ;;  %v3756_v49 = vadd.f32 %v6808_v1, %v6738_v41  ;;  %v6890_v5 = vadd.f32 %v6797_v59, %v3762_v35  ;;  %v4174_v47 = vld [vmem:[%s7325_s10 + $0xe8] sm:$0xff] }
 0x80e   : > { %v3786_v27 = vadd.f32 %v3785_v16, %v6738_v41  ;;  %v3983_v39 = vadd.f32 %v3982_v62, %v3782_v37  ;;  %v4103_v21 = vmax.f32 %v3981_v56, 0.0  ;;  %v3967_v24 = vadd.f32 %v6799_v34, %v3766_v32 }
 0x80f   : > { %v3787_v17 = vpop.f32.mrf.mxu0  ;;  %v6879_v42 = vpop.f32.mrf.mxu1  ;;  %v6906_v22 = vadd.f32 %v6788_v43, %v3758_v36  ;;  %v3961_v34 = vadd.f32 %v6793_v7, %v3760_v9  ;;  %v4099_v35 = vmax.f32 %v3971_v6, 0.0  ;;  %v4098_v16 = vmax.f32 %v3969_v57, 0.0  ;;  %v4170_v57 = vld [vmem:[%s7325_s10 + $0xc8] sm:$0xff] }
 0x810   : > { %v4104_v62 = vmax.f32 %v3983_v39, 0.0  ;;  %v3788_v10 = vadd.f32 %v3787_v17, %v6743_v45  ;;  %v6885_v28 = vadd.f32 %v3986_v31, %v3786_v27  ;;  %v4100_v39 = vmax.f32 %v3973_v15, 0.0  ;;  %v4173_v31 = vld [vmem:[%s7325_s10 + $0xe0] sm:$0xff]  ;;  %v4172_v15 = vld [vmem:[%s7325_s10 + $0xd8] sm:$0xff] }
 0x811   : > { %v3789_v38 = vpop.f32.mrf.mxu0  ;;  %v6896_v51 = vpop.f32.mrf.mxu1  ;;  %v4241_v37 = vmul.f32 %v4175_v0, %v4103_v21  ;;  %v4240_v27 = vmul.f32 %v4174_v47, %v4102_v12  ;;  %v6922_v7 = vadd.f32 %v6778_v44, %v3752_v2  ;;  %v3957_v9 = vadd.f32 %v6783_v60, %v3756_v49  ;;  %v4168_v49 = vld [vmem:[%s7325_s10 + $0xb8] sm:$0xff] }
 0x812   : > { %7363 = vst [vmem:[#allocation30_spill] sm:$0xff] %v6885_v28  ;;  %v4242_v23 = vmul.f32 %v4176_v33, %v4104_v62  ;;  %v3790_v1 = vadd.f32 %v3789_v38, %v6738_v41  ;;  %v6903_v59 = vadd.f32 %v6810_v46, %v3788_v10  ;;  %v4171_v46 = vld [vmem:[%s7325_s10 + $0xd0] sm:$0xff]  ;;  %v4097_v6 = vmax.f32 %v3967_v24, 0.0 }
 0x813   : > { %v3791_v56 = vpop.f32.mrf.mxu0  ;;  %v6912_v32 = vpop.f32.mrf.mxu1  ;;  %v4239_v21 = vmul.f32 %v4173_v31, %v4101_v61  ;;  %v4096_v12 = vmax.f32 %v6890_v5, 0.0  ;;  %v4238_v44 = vmul.f32 %v4172_v15, %v4100_v39  ;;  %v6940_v0 = vadd.f32 %v6768_v63, %v6856_v14  ;;  %v4167_v63 = vld [vmem:[%s7325_s10 + $0xb0] sm:$0xff]  ;;  %v4166_v31 = vld [vmem:[%s7325_s10 + $0xa8] sm:$0xff] }
 0x814   : > { %7364 = vst [vmem:[#allocation31_spill] sm:$0xff] %v6903_v59  ;;  %v3792_v43 = vadd.f32 %v3791_v56, %v6743_v45  ;;  %v6919_v36 = vadd.f32 %v6812_v29, %v3790_v1  ;;  %4283 = vmatprep.subr.mxu0 %v4242_v23  ;;  %v4169_v29 = vld [vmem:[%s7325_s10 + $0xc0] sm:$0xff]  ;;  %v3951_v62 = vadd.f32 %v6773_v55, %v6863_v20  ;;  %v4095_v10 = vmax.f32 %v3961_v34, 0.0 }
 0x815   : > { %v3795_v33 = vpop.f32.mrf.mxu0  ;;  %4284 = vmatpush1.msra.mxu0 %v4241_v37  ;;  %v6928_v17 = vpop.f32.mrf.mxu1  ;;  %v4237_v5 = vmul.f32 %v4171_v46, %v4099_v35  ;;  %v4236_v14 = vmul.f32 %v4170_v57, %v4098_v16  ;;  %v6959_v20 = vadd.f32 %v6758_v52, %v6848_v58  ;;  %v3947_v38 = vadd.f32 %v6763_v4, %v6853_v48  ;;  %v4165_v52 = vld [vmem:[%s7325_s10 + $0xa0] sm:$0xff]  ;;  %v4164_v37 = vld [vmem:[%s7325_s10 + $0x98] sm:$0xff] }
 0x816   : > { %7365 = vst [vmem:[#allocation32_spill] sm:$0xff] %v6919_v36  ;;  %v3796_v2 = vadd.f32 %v3795_v33, %v6738_v41  ;;  %v6936_v60 = vadd.f32 %v6814_v13, %v3792_v43  ;;  %4285 = vmatprep.subr.mxu0 %v4240_v27  ;;  %v4094_v13 = vmax.f32 %v6906_v22, 0.0  ;;  %v4093_v39 = vmax.f32 %v3957_v9, 0.0  ;;  %v4163_v27 = vld [vmem:[%s7325_s10 + $0x90] sm:$0xff]  ;;  %v4162_v9 = vld [vmem:[%s7325_s10 + $0x88] sm:$0xff]  ;;  %v4161_v33 = vld [vmem:[%s7325_s10 + $0x80] sm:$0xff] }
 0x817   : > { %v3797_v24 = vpop.f32.mrf.mxu0  ;;  %4286 = vmatpush1.msra.mxu0 %v4239_v21  ;;  %v6947_v61 = vpop.f32.mrf.mxu1  ;;  %v4235_v23 = vmul.f32 %v4169_v29, %v4097_v6  ;;  %v4234_v58 = vmul.f32 %v4168_v49, %v4096_v12  ;;  %v3939_v48 = vadd.f32 %v6748_v11, %v6839_v25  ;;  %v3941_v35 = vadd.f32 %v6753_v30, %v6845_v26  ;;  %v7368_v12 = vld [vmem:[#allocation27_spill] sm:$0xff]  ;;  %v7369_v29 = vld [vmem:[#allocation13_spill] sm:$0xff] }
 0x818   : > { %7366 = vst [vmem:[#allocation33_spill] sm:$0xff] %v6936_v60  ;;  %v3798_v47 = vadd.f32 %v3797_v24, %v6743_v45  ;;  %v6955_v55 = vadd.f32 %v6816_v53, %v3796_v2  ;;  %4287 = vmatprep.subr.mxu0 %v4238_v44  ;;  %v4092_v53 = vmax.f32 %v6922_v7, 0.0  ;;  %v4091_v15 = vmax.f32 %v3951_v62, 0.0  ;;  %v4159_v24 = vld [vmem:[%s7325_s10 + $0x70] sm:$0xff] }
 0x819   : > { %v3799_v1 = vpop.f32.mrf.mxu0  ;;  %4288 = vmatpush1.msra.mxu0 %v4237_v5  ;;  %v6966_v22 = vpop.f32.mrf.mxu1  ;;  %v4233_v56 = vmul.f32 %v4167_v63, %v4095_v10  ;;  %v4232_v11 = vmul.f32 %v4166_v31, %v4094_v13  ;;  %v3933_v26 = vadd.f32 %v6740_v40, %v6833_v50  ;;  %v3937_v43 = vadd.f32 %v6745_v18, %v6836_v8  ;;  %v7367_v18 = vld [vmem:[#allocation24_spill] sm:$0xff] }
 0x81a   : > { %v3800_v34 = vadd.f32 %v3799_v1, %v6738_v41  ;;  %v6974_v4 = vadd.f32 %v6818_v54, %v3798_v47  ;;  %4289 = vmatprep.subr.mxu0 %v4236_v14  ;;  %v4090_v54 = vmax.f32 %v6940_v0, 0.0  ;;  %v4089_v7 = vmax.f32 %v3947_v38, 0.0  ;;  %v4160_v0 = vld [vmem:[%s7325_s10 + $0x78] sm:$0xff]  ;;  %v4158_v38 = vld [vmem:[%s7325_s10 + $0x68] sm:$0xff] }
 0x81b   : > { %v3801_v16 = vpop.f32.mrf.mxu0  ;;  %4290 = vmatpush1.msra.mxu0 %v4235_v23  ;;  %v6983_v46 = vpop.f32.mrf.mxu1  ;;  %v4231_v6 = vmul.f32 %v4165_v52, %v4093_v39  ;;  %v4230_v40 = vmul.f32 %v4164_v37, %v4092_v53  ;;  %v3931_v44 = vadd.f32 %v7369_v29, %v7368_v12  ;;  %v4087_v2 = vmax.f32 %v3941_v35, 0.0  ;;  %v7370_v14 = vld [vmem:[#allocation25_spill] sm:$0xff]  ;;  %v4157_v53 = vld [vmem:[%s7325_s10 + $0x60] sm:$0xff] }
 0x81c   : > { %v3802_v25 = vadd.f32 %v3801_v16, %v6743_v45  ;;  %v6991_v30 = vadd.f32 %v6820_v3, %v3800_v34  ;;  %4291 = vmatprep.subr.mxu0 %v4234_v58  ;;  %v4088_v3 = vmax.f32 %v6959_v20, 0.0  ;;  %v4229_v62 = vmul.f32 %v4163_v27, %v4091_v15  ;;  %v7371_v58 = vld [vmem:[#allocation26_spill] sm:$0xff]  ;;  %v4156_v35 = vld [vmem:[%s7325_s10 + $0x58] sm:$0xff]  ;;  %v7372_v16 = vld [vmem:[#allocation23_spill] sm:$0xff] }
 0x81d   : > { %v3805_v57 = vpop.f32.mrf.mxu0  ;;  %4292 = vmatpush1.msra.mxu0 %v4233_v56  ;;  %v7000_v21 = vpop.f32.mrf.mxu1  ;;  %v4086_v5 = vmax.f32 %v3939_v48, 0.0  ;;  %v4228_v13 = vmul.f32 %v4162_v9, %v4090_v54  ;;  %v4085_v20 = vmax.f32 %v3937_v43, 0.0  ;;  %v4227_v39 = vmul.f32 %v4161_v33, %v4089_v7  ;;  %v4155_v27 = vld [vmem:[%s7325_s10 + $0x50] sm:$0xff]  ;;  %v4154_v43 = vld [vmem:[%s7325_s10 + $0x48] sm:$0xff]  ;;  %v4153_v33 = vld [vmem:[%s7325_s10 + $0x40] sm:$0xff] }
 0x81e   : > { %v3806_v50 = vadd.f32 %v3805_v57, %v6738_v41  ;;  %v7008_v8 = vadd.f32 %v7367_v18, %v3802_v25  ;;  %4293 = vmatprep.subr.mxu0 %v4232_v11  ;;  %v4084_v1 = vmax.f32 %v3933_v26, 0.0  ;;  %v4226_v52 = vmul.f32 %v4160_v0, %v4088_v3  ;;  %v7373_v25 = vld [vmem:[#allocation22_spill] sm:$0xff]  ;;  %v7374_v57 = vld [vmem:[#allocation21_spill] sm:$0xff]  ;;  %v7376_v0 = vld [vmem:[#allocation19_spill] sm:$0xff] }
 0x81f   : > { %v3807_v10 = vpop.f32.mrf.mxu0  ;;  %4294 = vmatpush1.msra.mxu0 %v4231_v6  ;;  %v7015_v49 = vpop.f32.mrf.mxu1  ;;  %v4083_v48 = vmax.f32 %v3931_v44, 0.0  ;;  %v4225_v15 = vmul.f32 %v4159_v24, %v4087_v2  ;;  %v4082_v54 = vmax.f32 %v7372_v16, 0.0  ;;  %v4224_v11 = vmul.f32 %v4158_v38, %v4086_v5  ;;  %v4152_v12 = vld [vmem:[%s7325_s10 + $0x38] sm:$0xff]  ;;  %v7377_v24 = vld [vmem:[#allocation18_spill] sm:$0xff] }
 0x820   : > { %v3808_v63 = vadd.f32 %v3807_v10, %v6743_v45  ;;  %v7022_v47 = vadd.f32 %v7370_v14, %v3806_v50  ;;  %4295 = vmatprep.subr.mxu0 %v4230_v40  ;;  %v4081_v26 = vmax.f32 %v7373_v25, 0.0  ;;  %v4223_v7 = vmul.f32 %v4157_v53, %v4085_v20  ;;  %v7375_v50 = vld [vmem:[#allocation20_spill] sm:$0xff]  ;;  %v4149_v53 = vld [vmem:[%s7325_s10 + $0x20] sm:$0xff] }
 0x821   : > { %v7027_v31 = vpop.f32.mrf.mxu0  ;;  %4296 = vmatpush1.msra.mxu0 %v4229_v62  ;;  %v7029_v23 = vpop.f32.mrf.mxu1  ;;  %v4080_v3 = vmax.f32 %v7374_v57, 0.0  ;;  %v4222_v40 = vmul.f32 %v4156_v35, %v4084_v1  ;;  %v4079_v18 = vmax.f32 %v7375_v50, 0.0  ;;  %v4221_v29 = vmul.f32 %v4155_v27, %v4083_v48  ;;  %v4151_v10 = vld [vmem:[%s7325_s10 + $0x30] sm:$0xff]  ;;  %v4148_v35 = vld [vmem:[%s7325_s10 + $0x18] sm:$0xff]  ;;  %v7380_v27 = vld [vmem:[#allocation15_spill] sm:$0xff] }
 0x822   : > { %v7035_v34 = vadd.f32 %v7371_v58, %v3808_v63  ;;  %4297 = vmatprep.subr.mxu0 %v4228_v13  ;;  %v4078_v62 = vmax.f32 %v7376_v0, 0.0  ;;  %v4220_v5 = vmul.f32 %v4154_v43, %v4082_v54  ;;  %v4077_v13 = vmax.f32 %v7377_v24, 0.0  ;;  %v4150_v63 = vld [vmem:[%s7325_s10 + $0x28] sm:$0xff]  ;;  %v7379_v58 = vld [vmem:[#allocation16_spill] sm:$0xff]  ;;  %v7381_v43 = vld [vmem:[#allocation14_spill] sm:$0xff] }
 0x823   : > { %v7040_v37 = vpop.f32.mrf.mxu0  ;;  %4298 = vmatpush1.msra.mxu0 %v4227_v39  ;;  %v7042_v56 = vpop.f32.mrf.mxu1  ;;  %v4219_v14 = vmul.f32 %v4153_v33, %v4081_v26  ;;  %v7378_v39 = vld [vmem:[#allocation17_spill] sm:$0xff]  ;;  %v4075_v48 = vmax.f32 %v7379_v58, 0.0  ;;  %v4147_v25 = vld [vmem:[%s7325_s10 + $0x10] sm:$0xff]  ;;  %v4146_v57 = vld [vmem:[%s7325_s10 + $0x8] sm:$0xff] }
 0x824   : > { %4299 = vmatprep.subr.mxu0 %v4226_v52  ;;  %v4076_v1 = vmax.f32 %v7378_v39, 0.0  ;;  %v4218_v52 = vmul.f32 %v4152_v12, %v4080_v3  ;;  %v4216_v26 = vmul.f32 %v4150_v63, %v4078_v62  ;;  %v4215_v3 = vmul.f32 %v4149_v53, %v4077_v13  ;;  %v4145_v50 = vld [vmem:[%s7325_s10] sm:$0xff] }
 0x825   : > { %v7052_v9 = vpop.f32.mrf.mxu0  ;;  %4300 = vmatpush1.msra.mxu0 %v4225_v15  ;;  %v7054_v6 = vpop.f32.mrf.mxu1  ;;  %v4217_v15 = vmul.f32 %v4151_v10, %v4079_v18  ;;  %v4213_v12 = vmul.f32 %v4147_v25, %v4075_v48 }
 0x826   : > { %4301 = vmatprep.subr.mxu0 %v4224_v11  ;;  %v4074_v11 = vmax.f32 %v7380_v27, 0.0  ;;  %v4214_v18 = vmul.f32 %v4148_v35, %v4076_v1 }
 0x827   : > { %v7064_v44 = vpop.f32.mrf.mxu0  ;;  %4302 = vmatpush1.msra.mxu0 %v4223_v7  ;;  %v7066_v2 = vpop.f32.mrf.mxu1  ;;  %v4073_v7 = vmax.f32 %v7381_v43, 0.0 }
 0x828   : > { %4303 = vmatprep.subr.mxu0 %v4222_v40  ;;  %v4212_v62 = vmul.f32 %v4146_v57, %v4074_v11 }
 0x829   : > { %v7076_v20 = vpop.f32.mrf.mxu0  ;;  %4304 = vmatpush1.msra.mxu0 %v4221_v29  ;;  %v7078_v38 = vpop.f32.mrf.mxu1  ;;  %v4211_v10 = vmul.f32 %v4145_v50, %v4073_v7 }
 0x82a   : > { %4305 = vmatprep.subr.mxu0 %v4220_v5 }
 0x82b   : > { %v7088_v16 = vpop.f32.mrf.mxu0  ;;  %4306 = vmatpush1.msra.mxu0 %v4219_v14  ;;  %v4052_v54 = vpop.f32.mrf.mxu1 }
 0x82c   : > { %4307 = vmatprep.subr.mxu0 %v4218_v52 }
 0x82d   : > { %v7098_v33 = vpop.f32.mrf.mxu0  ;;  %4308 = vmatpush1.msra.mxu0 %v4217_v15  ;;  %v4056_v40 = vpop.f32.mrf.mxu1 }
 0x82e   : > { %4309 = vmatprep.subr.mxu0 %v4216_v26 }
 0x82f   : > { %v7103_v29 = vpop.f32.mrf.mxu0  ;;  %4310 = vmatpush1.msra.mxu0 %v4215_v3  ;;  %v4058_v0 = vpop.f32.mrf.mxu1 }
 0x830   : > { %4311 = vmatprep.subr.mxu0 %v4214_v18 }
 0x831   : > { %v3829_v5 = vpop.f32.mrf.mxu0  ;;  %4312 = vmatpush1.msra.mxu0 %v4213_v12  ;;  %v4060_v24 = vpop.f32.mrf.mxu1 }
 0x832   : > { %4313 = vmatprep.subr.mxu0 %v4212_v62 }
 0x833   : > { %v3831_v13 = vpop.f32.mrf.mxu0  ;;  %4314 = vmatpush1.msra.mxu0 %v4211_v10  ;;  %v4062_v63 = vpop.f32.mrf.mxu1 }
 0x835   : > { %v3835_v14 = vpop.f32.mrf.mxu0  ;;  %v7105_v39 = vpop.f32.mrf.mxu1 }
 0x836   : > { %7382 = vst [vmem:[#allocation24_spill] sm:$0xff] %v7105_v39 }
 0x837   : > { %v3837_v1 = vpop.f32.mrf.mxu0  ;;  %v7107_v53 = vpop.f32.mrf.mxu1 }
 0x839   : > { %v3839_v52 = vpop.f32.mrf.mxu0  ;;  %v4070_v58 = vpop.f32.mrf.mxu1 }
 0x83b   : > { %v3841_v48 = vpop.f32.mrf.mxu0  ;;  %v4071_v35 = vpop.f32.mrf.mxu1 }
 0x83d   : > { %v3845_v15 = vpop.f32.mrf.mxu0 }
 0x83e   : > { %v3846_v59 = vadd.f32 %v3845_v15, %v6738_v41 }
 0x83f   : > { %v3847_v27 = vpop.f32.mrf.mxu0 }
 0x840   : > { %v3848_v10 = vadd.f32 %v3847_v27, %v6743_v45 }
 0x841   : > { %v3849_v11 = vpop.f32.mrf.mxu0 }
 0x842   : > { %v3850_v12 = vadd.f32 %v3849_v11, %v6738_v41 }
 0x843   : > { %v3851_v25 = vpop.f32.mrf.mxu0 }
 0x844   : > { %v3852_v50 = vadd.f32 %v3851_v25, %v6743_v45  ;;  %v4051_v11 = vadd.f32 %v7078_v38, %v3850_v12 }
 0x845   : > { %v3855_v26 = vpop.f32.mrf.mxu0 }
 0x846   : > { %v3856_v57 = vadd.f32 %v3855_v26, %v6738_v41  ;;  %v3842_v26 = vadd.f32 %v3841_v48, %v6743_v45  ;;  %v4053_v60 = vadd.f32 %v4052_v54, %v3852_v50  ;;  %v4207_v54 = vld [vmem:[%s7325_s10 + $0x1f0] sm:$0xff]  ;;  %v4206_v48 = vld [vmem:[%s7325_s10 + $0x1e8] sm:$0xff]  ;;  %v4205_v50 = vld [vmem:[%s7325_s10 + $0x1e0] sm:$0xff] }
 0x847   : > { %v3857_v43 = vpop.f32.mrf.mxu0 }
 0x848   : > { %v3858_v7 = vadd.f32 %v3857_v43, %v6743_v45  ;;  %v4057_v36 = vadd.f32 %v4056_v40, %v3856_v57  ;;  %v4049_v40 = vadd.f32 %v7066_v2, %v3848_v10  ;;  %v4043_v2 = vadd.f32 %v7042_v56, %v3842_v26  ;;  %v4203_v10 = vld [vmem:[%s7325_s10 + $0x1d0] sm:$0xff] }
 0x849   : > { %v3859_v3 = vpop.f32.mrf.mxu0  ;;  %v4132_v57 = vmax.f32 %v4053_v60, 0.0  ;;  %v3828_v56 = vadd.f32 %v7103_v29, %v6743_v45 }
 0x84a   : > { %v3860_v18 = vadd.f32 %v3859_v3, %v6738_v41  ;;  %v4059_v58 = vadd.f32 %v4058_v0, %v3858_v7  ;;  %v3840_v3 = vadd.f32 %v3839_v52, %v6738_v41  ;;  %v4208_v0 = vld [vmem:[%s7325_s10 + $0x1f8] sm:$0xff]  ;;  %v3836_v52 = vadd.f32 %v3835_v14, %v6738_v41 }
 0x84b   : > { %v3861_v62 = vpop.f32.mrf.mxu0  ;;  %v4133_v38 = vmax.f32 %v4057_v36, 0.0  ;;  %v3830_v14 = vadd.f32 %v3829_v5, %v6738_v41  ;;  %v4131_v36 = vmax.f32 %v4051_v11, 0.0 }
 0x84c   : > { %v3862_v35 = vadd.f32 %v3861_v62, %v6743_v45  ;;  %v4061_v28 = vadd.f32 %v4060_v24, %v3860_v18  ;;  %v3838_v24 = vadd.f32 %v3837_v1, %v6743_v45  ;;  %v4134_v15 = vmax.f32 %v4059_v58, 0.0 }
 0x84d   : > { %v7117_v43 = vpop.f32.mrf.mxu0  ;;  %v3832_v1 = vadd.f32 %v3831_v13, %v6743_v45  ;;  %v4130_v13 = vmax.f32 %v4049_v40, 0.0  ;;  %v4037_v58 = vadd.f32 %v7000_v21, %v3836_v52  ;;  %v4271_v29 = vmul.f32 %v4205_v50, %v4133_v38 }
 0x84e   : > { %v4063_v25 = vadd.f32 %v4062_v63, %v3862_v35  ;;  %v4135_v39 = vmax.f32 %v4061_v28, 0.0  ;;  %v4047_v28 = vadd.f32 %v7054_v6, %v3846_v59  ;;  %v4041_v59 = vadd.f32 %v7029_v23, %v3840_v3  ;;  %v4204_v6 = vld [vmem:[%s7325_s10 + $0x1d8] sm:$0xff]  ;;  %v4201_v3 = vld [vmem:[%s7325_s10 + $0x1c0] sm:$0xff] }
 0x84f   : > { %v7125_v27 = vpop.f32.mrf.mxu0  ;;  %v4039_v60 = vadd.f32 %v7015_v49, %v3838_v24  ;;  %v4272_v5 = vmul.f32 %v4206_v48, %v4134_v15  ;;  %v3826_v23 = vadd.f32 %v7098_v33, %v6738_v41  ;;  %v3822_v49 = vadd.f32 %v7088_v16, %v6743_v45  ;;  %v4200_v24 = vld [vmem:[%s7325_s10 + $0x1b8] sm:$0xff] }
 0x850   : > { %v4136_v63 = vmax.f32 %v4063_v25, 0.0  ;;  %v4273_v12 = vmul.f32 %v4207_v54, %v4135_v39  ;;  %v4129_v35 = vmax.f32 %v4047_v28, 0.0  ;;  %v4202_v39 = vld [vmem:[%s7325_s10 + $0x1c8] sm:$0xff]  ;;  %v4033_v26 = vadd.f32 %v6983_v46, %v3832_v1  ;;  %v4199_v54 = vld [vmem:[%s7325_s10 + $0x1b0] sm:$0xff] }
 0x851   : > { %v3869_v7 = vpop.f32.mrf.mxu0  ;;  %v4128_v25 = vmax.f32 %v4043_v2, 0.0  ;;  %v4270_v33 = vmul.f32 %v4204_v6, %v4132_v57  ;;  %v3820_v21 = vadd.f32 %v7076_v20, %v6738_v41  ;;  %v4031_v11 = vadd.f32 %v6966_v22, %v3830_v14  ;;  %v4198_v28 = vld [vmem:[%s7325_s10 + $0x1a8] sm:$0xff]  ;;  %v4196_v57 = vld [vmem:[%s7325_s10 + $0x198] sm:$0xff] }
 0x852   : > { %v4274_v18 = vmul.f32 %v4208_v0, %v4136_v63  ;;  %v4127_v0 = vmax.f32 %v4041_v59, 0.0  ;;  %v4269_v16 = vmul.f32 %v4203_v10, %v4131_v36  ;;  %v3818_v46 = vadd.f32 %v7064_v44, %v6743_v45  ;;  %v4197_v7 = vld [vmem:[%s7325_s10 + $0x1a0] sm:$0xff]  ;;  %v7383_v6 = vld [vmem:[#allocation29_spill] sm:$0xff] }
 0x853   : > { %v3870_v62 = vpop.f32.mrf.mxu0  ;;  %v4029_v40 = vadd.f32 %v6947_v61, %v3828_v56  ;;  %v4126_v15 = vmax.f32 %v4039_v60, 0.0  ;;  %v4268_v20 = vmul.f32 %v4202_v39, %v4130_v13  ;;  %v3816_v22 = vadd.f32 %v7052_v9, %v6738_v41  ;;  %v7384_v60 = vld [vmem:[#allocation28_spill] sm:$0xff] }
 0x854   : > { %4315 = vmatprep.subr.mxu0 %v4274_v18  ;;  %v4027_v63 = vadd.f32 %v6928_v17, %v3826_v23  ;;  %v4125_v52 = vmax.f32 %v4037_v58, 0.0  ;;  %v4267_v44 = vmul.f32 %v4201_v3, %v4129_v35  ;;  %v3812_v61 = vadd.f32 %v7040_v37, %v6743_v45  ;;  %v4195_v18 = vld [vmem:[%s7325_s10 + $0x190] sm:$0xff] }
 0x855   : > { %4316 = vmatpush2.msra.mxu0 %v4273_v12  ;;  %v4023_v38 = vadd.f32 %v6912_v32, %v3822_v49  ;;  %v4124_v48 = vmax.f32 %v4033_v26, 0.0  ;;  %v4266_v9 = vmul.f32 %v4200_v24, %v4128_v25  ;;  %v3810_v17 = vadd.f32 %v7027_v31, %v6738_v41  ;;  %v4191_v58 = vld [vmem:[%s7325_s10 + $0x170] sm:$0xff]  ;;  %v4189_v25 = vld [vmem:[%s7325_s10 + $0x160] sm:$0xff] }
 0x856   : > { %4317 = vmatprep.subr.mxu0 %v4272_v5  ;;  %v4021_v1 = vadd.f32 %v6896_v51, %v3820_v21  ;;  %v4123_v2 = vmax.f32 %v4031_v11, 0.0  ;;  %v4265_v37 = vmul.f32 %v4199_v54, %v4127_v0  ;;  %v4019_v32 = vadd.f32 %v6879_v42, %v3818_v46  ;;  %v4194_v51 = vld [vmem:[%s7325_s10 + $0x188] sm:$0xff]  ;;  %v4193_v42 = vld [vmem:[%s7325_s10 + $0x180] sm:$0xff]  ;;  %v4188_v21 = vld [vmem:[%s7325_s10 + $0x158] sm:$0xff] }
 0x857   : > { %4318 = vmatpush2.msra.mxu0 %v4271_v29  ;;  %v4122_v50 = vmax.f32 %v4029_v40, 0.0  ;;  %v4264_v14 = vmul.f32 %v4198_v28, %v4126_v15  ;;  %v4017_v31 = vadd.f32 %v6869_v19, %v3816_v22  ;;  %v4121_v59 = vmax.f32 %v4027_v63, 0.0  ;;  %v4192_v19 = vld [vmem:[%s7325_s10 + $0x178] sm:$0xff]  ;;  %v4190_v29 = vld [vmem:[%s7325_s10 + $0x168] sm:$0xff]  ;;  %v4187_v24 = vld [vmem:[%s7325_s10 + $0x150] sm:$0xff] }
 0x858   : > { %4319 = vmatprep.subr.mxu0 %v4270_v33  ;;  %v4263_v36 = vmul.f32 %v4197_v7, %v4125_v52  ;;  %v4013_v12 = vadd.f32 %v7383_v6, %v3812_v61  ;;  %v4120_v62 = vmax.f32 %v4023_v38, 0.0  ;;  %v4262_v56 = vmul.f32 %v4196_v57, %v4124_v48  ;;  %v4186_v15 = vld [vmem:[%s7325_s10 + $0x148] sm:$0xff]  ;;  %v4185_v22 = vld [vmem:[%s7325_s10 + $0x140] sm:$0xff]  ;;  %v7385_v61 = vld [vmem:[#allocation24_spill] sm:$0xff] }
 0x859   : > { %4320 = vmatpush2.msra.mxu0 %v4269_v16  ;;  %v4011_v13 = vadd.f32 %v7384_v60, %v3810_v17  ;;  %v4119_v10 = vmax.f32 %v4021_v1, 0.0  ;;  %v4261_v5 = vmul.f32 %v4195_v18, %v4123_v2  ;;  %v4118_v23 = vmax.f32 %v4019_v32, 0.0  ;;  %v7386_v48 = vld [vmem:[#allocation33_spill] sm:$0xff]  ;;  %v4181_v7 = vld [vmem:[%s7325_s10 + $0x120] sm:$0xff]  ;;  %v7387_v17 = vld [vmem:[#allocation32_spill] sm:$0xff] }
 0x85a   : > { %4321 = vmatprep.subr.mxu0 %v4268_v20  ;;  %v4260_v35 = vmul.f32 %v4194_v51, %v4122_v50  ;;  %v4117_v39 = vmax.f32 %v4017_v31, 0.0  ;;  %v4259_v49 = vmul.f32 %v4193_v42, %v4121_v59  ;;  %v4116_v26 = vmax.f32 %v4013_v12, 0.0  ;;  %v7388_v2 = vld [vmem:[#allocation31_spill] sm:$0xff]  ;;  %v7389_v18 = vld [vmem:[#allocation30_spill] sm:$0xff] }
 0x85b   : > { %4322 = vmatpush2.msra.mxu0 %v4267_v44  ;;  %v4258_v3 = vmul.f32 %v4192_v19, %v4120_v62  ;;  %v4115_v33 = vmax.f32 %v4011_v13, 0.0  ;;  %v4257_v11 = vmul.f32 %v4191_v58, %v4119_v10  ;;  %v4114_v0 = vmax.f32 %v7035_v34, 0.0  ;;  %v4178_v31 = vld [vmem:[%s7325_s10 + $0x108] sm:$0xff]  ;;  %v4177_v6 = vld [vmem:[%s7325_s10 + $0x100] sm:$0xff] }
 0x85c   : > { %4323 = vmatprep.subr.mxu0 %v4266_v9  ;;  %v4256_v16 = vmul.f32 %v4190_v29, %v4118_v23  ;;  %v3868_v46 = vadd.f32 %v7125_v27, %v6743_v45  ;;  %v4113_v40 = vmax.f32 %v7022_v47, 0.0  ;;  %v4255_v54 = vmul.f32 %v4189_v25, %v4117_v39  ;;  %v4184_v47 = vld [vmem:[%s7325_s10 + $0x138] sm:$0xff]  ;;  %v4209_v62 = vld [vmem:[%s7325_s10 + $0x200] sm:$0xff]  ;;  %v4144_v39 = vld [vmem:[%s7326_s11 + $0x28] sm:$0xf] }
 0x85d   : > { %4324 = vmatpush2.msra.mxu0 %v4265_v37  ;;  %v3866_v34 = vadd.f32 %v7117_v43, %v6738_v41  ;;  %v4112_v20 = vmax.f32 %v7008_v8, 0.0  ;;  %v4254_v63 = vmul.f32 %v4188_v21, %v4116_v26  ;;  %v4111_v45 = vmax.f32 %v6991_v30, 0.0  ;;  %v4183_v41 = vld [vmem:[%s7325_s10 + $0x130] sm:$0xff]  ;;  %v4182_v30 = vld [vmem:[%s7325_s10 + $0x128] sm:$0xff]  ;;  %v4139_v19 = vld [vmem:[%s7326_s11] sm:$0xff] }
 0x85e   : > { %4325 = vmatprep.subr.mxu0 %v4264_v14  ;;  %v4253_v27 = vmul.f32 %v4187_v24, %v4115_v33  ;;  %v4110_v52 = vmax.f32 %v6974_v4, 0.0  ;;  %v4252_v8 = vmul.f32 %v4186_v15, %v4114_v0  ;;  %v4069_v43 = vadd.f32 %v7107_v53, %v3868_v46  ;;  %v4179_v37 = vld [vmem:[%s7325_s10 + $0x110] sm:$0xff]  ;;  %v4142_v23 = vld [vmem:[%s7326_s11 + $0x18] sm:$0xf] }
 0x85f   : > { %4326 = vmatpush2.msra.mxu0 %v4263_v36  ;;  %v4109_v28 = vmax.f32 %v6955_v55, 0.0  ;;  %v4251_v44 = vmul.f32 %v4185_v22, %v4113_v40  ;;  %v4067_v38 = vadd.f32 %v7385_v61, %v3866_v34  ;;  %v4108_v4 = vmax.f32 %v7386_v48, 0.0  ;;  %v4180_v55 = vld [vmem:[%s7325_s10 + $0x118] sm:$0xff]  ;;  %v4210_v36 = vld [vmem:[%s7325_s10 + $0x208] sm:$0xff] }
 0x860   : > { %4327 = vmatprep.subr.mxu0 %v4262_v56  ;;  %v4250_v9 = vmul.f32 %v4184_v47, %v4112_v20  ;;  %v4107_v53 = vmax.f32 %v7387_v17, 0.0  ;;  %v4249_v1 = vmul.f32 %v4183_v41, %v4111_v45  ;;  %v4106_v57 = vmax.f32 %v7388_v2, 0.0 }
 0x861   : > { %4328 = vmatpush2.msra.mxu0 %v4261_v5  ;;  %v4248_v32 = vmul.f32 %v4182_v30, %v4110_v52  ;;  %v4138_v50 = vmax.f32 %v4069_v43, 0.0  ;;  %v4105_v14 = vmax.f32 %v7389_v18, 0.0  ;;  %v4247_v59 = vmul.f32 %v4181_v7, %v4109_v28  ;;  %v4143_v5 = vld [vmem:[%s7326_s11 + $0x20] sm:$0xf] }
 0x862   : > { %4329 = vmatprep.subr.mxu0 %v4260_v35  ;;  %v4137_v51 = vmax.f32 %v4067_v38, 0.0  ;;  %v4246_v12 = vmul.f32 %v4180_v55, %v4108_v4  ;;  %v4245_v42 = vmul.f32 %v4179_v37, %v4107_v53  ;;  %v4244_v56 = vmul.f32 %v4178_v31, %v4106_v57  ;;  %v4141_v35 = vld [vmem:[%s7326_s11 + $0x10] sm:$0xff] }
 0x863   : > { %4330 = vmatpush2.msra.mxu0 %v4259_v49  ;;  %v4276_v60 = vmul.f32 %v4210_v36, %v4138_v50  ;;  %v4243_v13 = vmul.f32 %v4177_v6, %v4105_v14  ;;  %v5382_v58 = vmov 0.0   ;;  %v4446_v20 = vstv %s4445_s22 }
 0x864   : > { %4331 = vmatprep.subr.mxu0 %v4258_v3  ;;  %v4275_v10 = vmul.f32 %v4209_v62, %v4137_v51 }
 0x865   : > { %4332 = vmatpush2.msra.mxu0 %v4257_v11 }
 0x866   : > { %4333 = vmatprep.subr.mxu0 %v4256_v16 }
 0x867   : > { %4334 = vmatpush2.msra.mxu0 %v4255_v54 }
 0x868   : > { %4335 = vmatprep.subr.mxu0 %v4254_v63 }
 0x869   : > { %4336 = vmatpush2.msra.mxu0 %v4253_v27 }
 0x86a   : > { %4337 = vmatprep.subr.mxu0 %v4252_v8 }
 0x86b   : > { %4338 = vmatpush2.msra.mxu0 %v4251_v44 }
 0x86c   : > { %4339 = vmatprep.subr.mxu0 %v4250_v9 }
 0x86d   : > { %4340 = vmatpush2.msra.mxu0 %v4249_v1 }
 0x86e   : > { %4341 = vmatprep.subr.mxu0 %v4248_v32 }
 0x86f   : > { %4342 = vmatpush2.msra.mxu0 %v4247_v59 }
 0x870   : > { %4343 = vmatprep.subr.mxu0 %v4246_v12 }
 0x871   : > { %4344 = vmatpush2.msra.mxu0 %v4245_v42 }
 0x872   : > { %4345 = vmatprep.subr.mxu0 %v4244_v56 }
 0x873   : > { %4346 = vmatpush2.msra.mxu0 %v4243_v13 }
 0x874   : > { %4348 = vmatmul.mubr.f32.vlgmr.msra.gmra.mxu0 %v4139_v19  ;;  %4390 = vmatprep.subr.mxu0 %v4276_v60 }
 0x875   : > { %4353 = vmatprep.mubr.f32.mxu0 %v4143_v5  ;;  %4391 = vmatpush1.msra.mxu0 %v4275_v10 }
 0x878   : > { %4354 = vmatmul.mubr.f32.gmra.mxu0 %v4142_v23 }
 0x879   : > { %4424 = vmatprep.mubr.f32.mxu0 %v5382_v58 }
 0x87c   : > { %4795 = vmatmul.mubr.msk.f32.vlgmr.msra.gmra.mxu0 %vm1719_vm3, %v4141_v35 }
 0x87d   : > { %4430 = vmatprep.mubr.f32.mxu0 %v5382_v58 }
 0x880   : > { %4796 = vmatmul.mubr.msk.f32.gmra.mxu0 %vm1719_vm3, %v4144_v39 }
 0x934   : > { %v4349_v29 = vpop.f32.mrf.mxu0 }
 0x936   : > { %v4351_v49 = vpop.f32.mrf.mxu0 }
 0x938   : > { %v4355_v26 = vpop.f32.mrf.mxu0 }
 0x93a   : > { %v4357_v25 = vpop.f32.mrf.mxu0 }
 0x93c   : > { %v4426_v3 = vpop.f32.mrf.mxu0 }
 0x93d   : > { %v4427_v21 = vadd.f32 %v4426_v3, %v4349_v29 }
 0x93e   : > { %v4428_v33 = vpop.f32.mrf.mxu0 }
 0x93f   : > { %v4429_v11 = vadd.f32 %v4428_v33, %v4351_v49 }
 0x940   : > { %v4432_v0 = vpop.f32.mrf.mxu0 }
 0x941   : > { %v4433_v24 = vadd.f32 %v4432_v0, %v4355_v26  ;;  %v4437_v16 = vadd.f32 %v4429_v11, %v4427_v21 }
 0x942   : > { %v4434_v46 = vpop.f32.mrf.mxu0 }
 0x943   : > { %v4435_v40 = vadd.f32 %v4434_v46, %v4357_v25  ;;  %4438 = vadd.xlane.f32.xlu0 %v4437_v16  ;;  %v4440_v15 = vsel %vm719_vm0, %v4433_v24, 0.0 }
 0x945   : > { %v4441_v54 = vsel %vm719_vm0, %v4435_v40, 0.0 }
 0x946   : > { %v4442_v34 = vadd.f32 %v4441_v54, %v4440_v15 }
 0x948   : > { %4443 = vadd.xlane.f32.xlu0 %v4442_v34 }
 0x9cc   : > { %v4439_v22 = vpop.xlane.xlu0 %4438 }
 0x9cd   : > { %v4447_v63 = vadd.f32 %v4446_v20, %v4439_v22 }
 0x9cf   : > { %4450 = vst.msk [vmem:[%s527_s14] sm:$0xff] %vm4449_vm4, %v4447_v63 }
 0x9d1   : > { %v4444_v45 = vpop.xlane.xlu0 %4443 }
 0x9d2   : > { %v4448_v47 = vadd.f32 %v4446_v20, %v4444_v45 }
 0x9d4   : > { %4452 = vst.msk [vmem:[%s527_s14 + $0x8] sm:$0xf] %vm4451_vm5, %v4448_v47 }
 0x9d5 PF: > { %p26_p8 = scmp.ge.s32.totalorder %s5526_s20, 4   ;;  %s7390_s27 = smov %s5362_s28 }
 0x9d6   : > { %s7391_s28 = smov %s5366_s29  ;;  %s7392_s29 = smov %s5536_s18 }
 0x9d7   : > { %s7393_s30 = smov %s5526_s20  ;;  %28 = sbr.rel (!%p26_p8) target bundleno = 9 (0x9), region = 127 }
 0x9dc   :  { %4474 = vsyncpa [#allocation4], 1 }
 0x9dd   :  { %4476 = vsyncpa [#allocation4 + $0x1], 1 }
 0x9de   :  { %4477 = vsyncpa [#allocation6], 1 }
 0x9df   :  { %4478 = vsyncpa [#allocation9], 1 }

</bundles_post_ra>
